<compile_context>
chip_gen: v7x
topology: tpu7x:2x2x1
jax: 0.10.0
libtpu: 0.0.40
codegen_flags: <defaults>
</compile_context>

<pallas_src>
import numpy as np
import jax
import jax.numpy as jnp
from jax import lax
from jax.experimental import pallas as pl
from jax.experimental.pallas import tpu as pltpu

# ----------------------------- config ---------------------------------------
B = 2                      # batch
N_CAMS = 2                 # number of camera views
J = 8                      # num_joints
HHM, WHM = 16, 16          # heatmap_size (h, w)
HW = HHM * WHM
IMG_W, IMG_H = 64.0, 64.0  # image_size
CUBE = (8, 8, 8)           # INITIAL_CUBE_SIZE
NBINS = CUBE[0] * CUBE[1] * CUBE[2]
SPACE_SIZE = (2000.0, 2000.0, 2000.0)
SPACE_CENTER = (0.0, 0.0, 1000.0)

# camera param packing (flattened, 18 floats per camera):
#   [0:9] R row-major, [9:12] T, [12:14] f, [14:16] c, [16] width, [17] height
CAM_STRIDE = 18


# ----------------------------- static voxel grid -----------------------------
def compute_grid_np(box_size, box_center, n_bins):
    g1x = np.linspace(-box_size[0] / 2, box_size[0] / 2, n_bins[0]) + box_center[0]
    g1y = np.linspace(-box_size[1] / 2, box_size[1] / 2, n_bins[1]) + box_center[1]
    g1z = np.linspace(-box_size[2] / 2, box_size[2] / 2, n_bins[2]) + box_center[2]
    gx, gy, gz = np.meshgrid(g1x, g1y, g1z, indexing="ij")
    return np.stack([gx.ravel(), gy.ravel(), gz.ravel()], axis=1).astype(np.float32)


GRID_NP = compute_grid_np(SPACE_SIZE, SPACE_CENTER, CUBE)        # (NBINS, 3) host constant
GRIDT_NP = np.ascontiguousarray(GRID_NP.T)                       # (3, NBINS)


# ----------------------------- kernel ----------------------------------------
def project_kernel(cam_ref, hm_ref, gridT_ref, out_ref):
    """Single step: all batch elements / joints / cameras in one shot.

    hm_ref:    (B*J*H, N_CAMS*W) bf16, rows ordered (b, j, h), lanes (cam, w)
    gridT_ref: (3, NBINS) f32 world coordinates (lane-dense)
    out_ref:   (B*J, NBINS) f32
    """
    gx = gridT_ref[0:1, :]          # (1, NBINS) world x
    gy = gridT_ref[1:2, :]
    gz = gridT_ref[2:3, :]

    # One-hot row-index iotas for the separable bilinear weights.
    hio = lax.broadcasted_iota(jnp.int32, (HHM, NBINS), 0)   # (H, NBINS)
    wio = lax.broadcasted_iota(jnp.int32, (WHM, NBINS), 0)   # (W, NBINS)
    zero_pad = jnp.zeros((WHM, NBINS), jnp.float32)

    sx_blocks = []                  # per-camera (W, NBINS)
    syb_blocks = []                 # per-camera (H, NBINS), bound folded in
    den = jnp.zeros((1, NBINS), jnp.float32)

    for c in range(N_CAMS):
        o = c * CAM_STRIDE
        # ---- camera scalars (1-D SMEM) ----
        r00 = cam_ref[o + 0]; r01 = cam_ref[o + 1]; r02 = cam_ref[o + 2]
        r10 = cam_ref[o + 3]; r11 = cam_ref[o + 4]; r12 = cam_ref[o + 5]
        r20 = cam_ref[o + 6]; r21 = cam_ref[o + 7]; r22 = cam_ref[o + 8]
        tx = cam_ref[o + 9]; ty = cam_ref[o + 10]; tz = cam_ref[o + 11]
        fx = cam_ref[o + 12]; fy = cam_ref[o + 13]
        cx = cam_ref[o + 14]; cy = cam_ref[o + 15]
        width = cam_ref[o + 16]; height = cam_ref[o + 17]

        # ---- project_pose: xcam = R @ (x^T - T), pixel = f * xy/z + c ----
        # TODO(synk): radial/tangential distortion (k, p) omitted; cameras here
        #             are constructed with zero distortion so semantics match.
        dx = gx - tx; dy = gy - ty; dz = gz - tz
        xc = r00 * dx + r01 * dy + r02 * dz
        yc = r10 * dx + r11 * dy + r12 * dz
        zc = r20 * dx + r21 * dy + r22 * dz
        inv_z = 1.0 / (zc + 1e-5)          # exact divide: px/py cross hard
        px = fx * xc * inv_z + cx          # bound/floor boundaries, keep exact
        py = fy * yc * inv_z + cy

        # ---- bounding mask (un-clamped pixel coords, as in torch) ----
        bound = ((px >= 0.0) & (py >= 0.0) & (px < width) & (py < height)
                 ).astype(jnp.float32)     # (1, NBINS)

        # ---- clamp + normalize to grid_sample coords (same assoc. as torch) --
        mx = jnp.maximum(width, height)
        pxc = jnp.clip(px, -1.0, mx)
        pyc = jnp.clip(py, -1.0, mx)
        sgx = jnp.clip(pxc / (width - 1.0) * 2.0 - 1.0, -1.1, 1.1)
        sgy = jnp.clip(pyc / (height - 1.0) * 2.0 - 1.0, -1.1, 1.1)

        # ---- bilinear grid_sample (align_corners=True, zero padding) ----
        ix = (sgx + 1.0) * 0.5 * (WHM - 1)
        iy = (sgy + 1.0) * 0.5 * (HHM - 1)
        x0 = jnp.floor(ix); y0 = jnp.floor(iy)
        wx1 = ix - x0; wx0 = 1.0 - wx1
        wy1 = iy - y0; wy0 = 1.0 - wy1
        x0i = x0.astype(jnp.int32); x1i = x0i + 1
        y0i = y0.astype(jnp.int32); y1i = y0i + 1

        # Separable one-hot weight matrices. Out-of-range corner indices
        # (-1 / 16) never match the [0, 16) iota => zero-padding semantics.
        sx = (jnp.where(wio == x0i, wx0, 0.0) +
              jnp.where(wio == x1i, wx1, 0.0))               # (W, NBINS)
        sy = (jnp.where(hio == y0i, wy0, 0.0) +
              jnp.where(hio == y1i, wy1, 0.0))               # (H, NBINS)
        sx_blocks.append(sx)
        syb_blocks.append(sy * bound)                        # fold bound in
        den = den + bound

    # ---- fused sampling: one block-diagonal bf16 MXU matmul over all cams ----
    # S_blk: (N_CAMS*W, N_CAMS*NBINS), camera c occupies rows [cW,(c+1)W) and
    # lane block [c*NBINS,(c+1)*NBINS).
    rows = []
    for c in range(N_CAMS):
        parts = [sx_blocks[c] if cc == c else zero_pad for cc in range(N_CAMS)]
        rows.append(jnp.concatenate(parts, axis=1))          # (W, N_CAMS*NBINS)
    s_blk = jnp.concatenate(rows, axis=0)                    # (N_CAMS*W, N_CAMS*NBINS)
    sy_cat = jnp.concatenate(syb_blocks, axis=1)             # (H, N_CAMS*NBINS)

    hm = hm_ref[...]                                         # (B*J*H, N_CAMS*W) bf16
    tmp = jnp.dot(hm, s_blk.astype(jnp.bfloat16),
                  preferred_element_type=jnp.float32)        # (B*J*H, N_CAMS*NBINS)
    tmp3 = tmp.reshape(B * J, HHM, N_CAMS * NBINS)           # regroup rows (b,j | h)
    samp = jnp.sum(tmp3 * sy_cat[None, :, :], axis=1)        # (B*J, N_CAMS*NBINS)

    # Sum the per-camera lane halves (512-lane split is vreg-aligned).
    num = samp[:, 0:NBINS]
    for c in range(1, N_CAMS):
        num = num + samp[:, c * NBINS:(c + 1) * NBINS]

    # den + 1e-6 > 0 always, so no NaN is possible (torch's cubes[cubes!=cubes]=0
    # is dead code unless the inputs already contain NaNs).
    inv_den = pl.reciprocal(den + 1e-6, approx=True)
    out_ref[...] = jnp.clip(num * inv_den, 0.0, 1.0)         # project_type == 'heatmap'


# ----------------------------- wrapper ----------------------------------------
@jax.jit
def project_layer_forward(heatmaps_nbjhw, cams):
    """heatmaps_nbjhw: (N_CAMS, B, J, H, W) float32; cams: (N_CAMS, 18) float32.
    Returns (cubes (B, J, cx, cy, cz), grids (B, nbins, 3))."""
    gridT = jnp.asarray(GRIDT_NP)                                # (3, NBINS) constant
    # Lane-dense (b, j, h) x (cam, w) packing for the fused sampling matmul.
    hm_cat = jnp.transpose(heatmaps_nbjhw.astype(jnp.float32),
                           (1, 2, 3, 0, 4)).reshape(B * J * HHM, N_CAMS * WHM)
    hm_cat = hm_cat.astype(jnp.bfloat16)                         # MXU operand only
    cams_flat = cams.astype(jnp.float32).reshape(-1)             # (N_CAMS*18,) 1-D SMEM

    out_flat = pl.pallas_call(
        project_kernel,
        out_shape=jax.ShapeDtypeStruct((B * J, NBINS), jnp.float32),
        grid_spec=pltpu.PrefetchScalarGridSpec(
            num_scalar_prefetch=0,
            grid=(1,),
            in_specs=[
                pl.BlockSpec(memory_space=pltpu.MemorySpace.SMEM),               # cams (1-D)
                pl.BlockSpec((B * J * HHM, N_CAMS * WHM), lambda v: (0, 0)),     # heatmaps bf16
                pl.BlockSpec((3, NBINS), lambda v: (0, 0)),                      # grid^T
            ],
            out_specs=pl.BlockSpec((B * J, NBINS), lambda v: (0, 0)),
        ),
        compiler_params=pltpu.CompilerParams(dimension_semantics=("arbitrary",)),
    )(cams_flat, hm_cat, gridT)

    cubes = out_flat.reshape(B, J, CUBE[0], CUBE[1], CUBE[2])
    grids = jnp.broadcast_to(jnp.asarray(GRID_NP)[None], (B, NBINS, 3))
    return cubes, grids


# ----------------------------- glue ------------------------------------------
def make_camera(R, T, f, c, w, h):
    return jnp.concatenate([
        jnp.asarray(R, jnp.float32).reshape(-1),
        jnp.asarray(T, jnp.float32).reshape(-1),
        jnp.asarray(f, jnp.float32),
        jnp.asarray(c, jnp.float32),
        jnp.asarray([w, h], jnp.float32),
    ])


def reference_forward(heatmaps_nbjhw, cams):
    """Pure-JAX reference mirroring get_voxel() (used for a sanity check)."""
    grid = jnp.asarray(GRID_NP)
    gridT = grid.T
    hm_flat = jnp.transpose(heatmaps_nbjhw, (1, 0, 2, 3, 4)).reshape(B, N_CAMS, J, HW)
    num = jnp.zeros((B, J, NBINS), jnp.float32)
    den = jnp.zeros((B, 1, NBINS), jnp.float32)
    for c in range(N_CAMS):
        p = np.asarray(cams[c])
        R = jnp.asarray(p[:9].reshape(3, 3)); T = jnp.asarray(p[9:12].reshape(3, 1))
        fx, fy, cx, cy, width, height = p[12], p[13], p[14], p[15], p[16], p[17]
        xcam = R @ (gridT - T)
        px = fx * (xcam[0] / (xcam[2] + 1e-5)) + cx
        py = fy * (xcam[1] / (xcam[2] + 1e-5)) + cy
        bound = ((px >= 0) & (py >= 0) & (px < width) & (py < height)).astype(jnp.float32)
        mx = max(width, height)
        pxc = jnp.clip(px, -1.0, mx); pyc = jnp.clip(py, -1.0, mx)
        sgx = jnp.clip(pxc / (width - 1.0) * 2.0 - 1.0, -1.1, 1.1)
        sgy = jnp.clip(pyc / (height - 1.0) * 2.0 - 1.0, -1.1, 1.1)
        ix = (sgx + 1.0) * 0.5 * (WHM - 1); iy = (sgy + 1.0) * 0.5 * (HHM - 1)
        x0 = jnp.floor(ix); y0 = jnp.floor(iy); x1 = x0 + 1; y1 = y0 + 1
        wx1 = ix - x0; wx0 = 1 - wx1; wy1 = iy - y0; wy0 = 1 - wy1
        samp = jnp.zeros((B, J, NBINS), jnp.float32)
        for cxp, cyp, w in ((x0, y0, wx0 * wy0), (x1, y0, wx1 * wy0),
                            (x0, y1, wx0 * wy1), (x1, y1, wx1 * wy1)):
            valid = ((cxp >= 0) & (cxp <= WHM - 1) & (cyp >= 0) & (cyp <= HHM - 1))
            idx = jnp.clip((cyp * WHM + cxp).astype(jnp.int32), 0, HW - 1)
            vals = jnp.take(hm_flat[:, c], idx, axis=-1)           # (B, J, NBINS)
            samp = samp + jnp.where(valid, w, 0.0) * vals
        num = num + samp * bound
        den = den + bound
    cube = jnp.clip(num / (den + 1e-6), 0.0, 1.0)
    return cube.reshape(B, J, *CUBE), jnp.broadcast_to(grid[None], (B, NBINS, 3))


# ----------------------------- main ------------------------------------------
if __name__ == "__main__":
    key = jax.random.PRNGKey(0)
    heatmaps = jax.random.uniform(key, (N_CAMS, B, J, HHM, WHM), jnp.float32)

    # Deterministic cameras looking at the space center (zero distortion).
    cam0 = make_camera(np.eye(3),
                       np.array([0.0, 0.0, -3000.0]),
                       [90.0, 90.0], [32.0, 32.0], IMG_W, IMG_H)
    cam1 = make_camera(np.array([[0.0, 0.0, 1.0],
                                 [0.0, 1.0, 0.0],
                                 [-1.0, 0.0, 0.0]]),
                       np.array([4000.0, 0.0, 1000.0]),
                       [90.0, 90.0], [32.0, 32.0], IMG_W, IMG_H)
    cams = jnp.stack([cam0, cam1], axis=0)                         # (N_CAMS, 18)

    cubes, grids = project_layer_forward(heatmaps, cams)
    jax.block_until_ready((cubes, grids))

    ref_cubes, ref_grids = reference_forward(heatmaps, cams)
    np.testing.assert_allclose(np.asarray(cubes), np.asarray(ref_cubes),
                               rtol=1e-2, atol=1e-2)
    np.testing.assert_allclose(np.asarray(grids), np.asarray(ref_grids),
                               rtol=1e-5, atol=1e-5)
    assert cubes.shape == (B, J, *CUBE) and grids.shape == (B, NBINS, 3)
    print("KERNEL_OK")
</pallas_src>

<mosaic_0001>
module attributes {stable_mosaic.version = 11 : i64} {
  func.func @project_kernel(%arg0: i32, %arg1: memref<36xf32, #tpu.memory_space<smem>>, %arg2: memref<256x32xbf16, #tpu.memory_space<vmem>>, %arg3: memref<3x512xf32, #tpu.memory_space<vmem>>, %arg4: memref<16x512xf32, #tpu.memory_space<vmem>>) attributes {dimension_semantics = [#tpu.dimension_semantics<arbitrary>], iteration_bounds = array<i64: 1>, scalar_prefetch = 0 : i64, scratch_operands = 0 : i64, tpu.core_type = #tpu.core_type<tc>, window_params = [{transform_indices = @transform_0, window_bounds = array<i64: 36>}, {pipeline_mode = #tpu.pipeline_mode<synchronous>, transform_indices = @transform_1, window_bounds = array<i64: 256, 32>}, {pipeline_mode = #tpu.pipeline_mode<synchronous>, transform_indices = @transform_2, window_bounds = array<i64: 3, 512>}, {pipeline_mode = #tpu.pipeline_mode<synchronous>, transform_indices = @transform_3, window_bounds = array<i64: 16, 512>}]} {
    %c0 = arith.constant 0 : index
    %c0_0 = arith.constant 0 : index
    %0 = vector.load %arg3[%c0, %c0_0] : memref<3x512xf32, #tpu.memory_space<vmem>>, vector<1x512xf32>
    %c1 = arith.constant 1 : index
    %c0_1 = arith.constant 0 : index
    %1 = vector.load %arg3[%c1, %c0_1] : memref<3x512xf32, #tpu.memory_space<vmem>>, vector<1x512xf32>
    %c2 = arith.constant 2 : index
    %c0_2 = arith.constant 0 : index
    %2 = vector.load %arg3[%c2, %c0_2] : memref<3x512xf32, #tpu.memory_space<vmem>>, vector<1x512xf32>
    %3 = tpu.iota {dimensions = array<i32: 0>} : vector<16x512xi32>
    %4 = tpu.iota {dimensions = array<i32: 0>} : vector<16x512xi32>
    %cst = arith.constant 0.000000e+00 : f32
    %5 = vector.broadcast %cst : f32 to vector<16x512xf32>
    %cst_3 = arith.constant 0.000000e+00 : f32
    %6 = vector.broadcast %cst_3 : f32 to vector<1x512xf32>
    %c0_4 = arith.constant 0 : index
    %7 = memref.load %arg1[%c0_4] : memref<36xf32, #tpu.memory_space<smem>>
    %c1_5 = arith.constant 1 : index
    %8 = memref.load %arg1[%c1_5] : memref<36xf32, #tpu.memory_space<smem>>
    %c2_6 = arith.constant 2 : index
    %9 = memref.load %arg1[%c2_6] : memref<36xf32, #tpu.memory_space<smem>>
    %c3 = arith.constant 3 : index
    %10 = memref.load %arg1[%c3] : memref<36xf32, #tpu.memory_space<smem>>
    %c4 = arith.constant 4 : index
    %11 = memref.load %arg1[%c4] : memref<36xf32, #tpu.memory_space<smem>>
    %c5 = arith.constant 5 : index
    %12 = memref.load %arg1[%c5] : memref<36xf32, #tpu.memory_space<smem>>
    %c6 = arith.constant 6 : index
    %13 = memref.load %arg1[%c6] : memref<36xf32, #tpu.memory_space<smem>>
    %c7 = arith.constant 7 : index
    %14 = memref.load %arg1[%c7] : memref<36xf32, #tpu.memory_space<smem>>
    %c8 = arith.constant 8 : index
    %15 = memref.load %arg1[%c8] : memref<36xf32, #tpu.memory_space<smem>>
    %c9 = arith.constant 9 : index
    %16 = memref.load %arg1[%c9] : memref<36xf32, #tpu.memory_space<smem>>
    %c10 = arith.constant 10 : index
    %17 = memref.load %arg1[%c10] : memref<36xf32, #tpu.memory_space<smem>>
    %c11 = arith.constant 11 : index
    %18 = memref.load %arg1[%c11] : memref<36xf32, #tpu.memory_space<smem>>
    %c12 = arith.constant 12 : index
    %19 = memref.load %arg1[%c12] : memref<36xf32, #tpu.memory_space<smem>>
    %c13 = arith.constant 13 : index
    %20 = memref.load %arg1[%c13] : memref<36xf32, #tpu.memory_space<smem>>
    %c14 = arith.constant 14 : index
    %21 = memref.load %arg1[%c14] : memref<36xf32, #tpu.memory_space<smem>>
    %c15 = arith.constant 15 : index
    %22 = memref.load %arg1[%c15] : memref<36xf32, #tpu.memory_space<smem>>
    %c16 = arith.constant 16 : index
    %23 = memref.load %arg1[%c16] : memref<36xf32, #tpu.memory_space<smem>>
    %c17 = arith.constant 17 : index
    %24 = memref.load %arg1[%c17] : memref<36xf32, #tpu.memory_space<smem>>
    %25 = vector.broadcast %16 : f32 to vector<1x512xf32>
    %26 = arith.subf %0, %25 : vector<1x512xf32>
    %27 = vector.broadcast %17 : f32 to vector<1x512xf32>
    %28 = arith.subf %1, %27 : vector<1x512xf32>
    %29 = vector.broadcast %18 : f32 to vector<1x512xf32>
    %30 = arith.subf %2, %29 : vector<1x512xf32>
    %31 = vector.broadcast %7 : f32 to vector<1x512xf32>
    %32 = arith.mulf %31, %26 : vector<1x512xf32>
    %33 = vector.broadcast %8 : f32 to vector<1x512xf32>
    %34 = arith.mulf %33, %28 : vector<1x512xf32>
    %35 = arith.addf %32, %34 : vector<1x512xf32>
    %36 = vector.broadcast %9 : f32 to vector<1x512xf32>
    %37 = arith.mulf %36, %30 : vector<1x512xf32>
    %38 = arith.addf %35, %37 : vector<1x512xf32>
    %39 = vector.broadcast %10 : f32 to vector<1x512xf32>
    %40 = arith.mulf %39, %26 : vector<1x512xf32>
    %41 = vector.broadcast %11 : f32 to vector<1x512xf32>
    %42 = arith.mulf %41, %28 : vector<1x512xf32>
    %43 = arith.addf %40, %42 : vector<1x512xf32>
    %44 = vector.broadcast %12 : f32 to vector<1x512xf32>
    %45 = arith.mulf %44, %30 : vector<1x512xf32>
    %46 = arith.addf %43, %45 : vector<1x512xf32>
    %47 = vector.broadcast %13 : f32 to vector<1x512xf32>
    %48 = arith.mulf %47, %26 : vector<1x512xf32>
    %49 = vector.broadcast %14 : f32 to vector<1x512xf32>
    %50 = arith.mulf %49, %28 : vector<1x512xf32>
    %51 = arith.addf %48, %50 : vector<1x512xf32>
    %52 = vector.broadcast %15 : f32 to vector<1x512xf32>
    %53 = arith.mulf %52, %30 : vector<1x512xf32>
    %54 = arith.addf %51, %53 : vector<1x512xf32>
    %cst_7 = arith.constant 9.99999974E-6 : f32
    %55 = vector.broadcast %cst_7 : f32 to vector<1x512xf32>
    %56 = arith.addf %54, %55 : vector<1x512xf32>
    %cst_8 = arith.constant 1.000000e+00 : f32
    %57 = vector.broadcast %cst_8 : f32 to vector<1x512xf32>
    %58 = arith.divf %57, %56 : vector<1x512xf32>
    %59 = vector.broadcast %19 : f32 to vector<1x512xf32>
    %60 = arith.mulf %59, %38 : vector<1x512xf32>
    %61 = arith.mulf %60, %58 : vector<1x512xf32>
    %62 = vector.broadcast %21 : f32 to vector<1x512xf32>
    %63 = arith.addf %61, %62 : vector<1x512xf32>
    %64 = vector.broadcast %20 : f32 to vector<1x512xf32>
    %65 = arith.mulf %64, %46 : vector<1x512xf32>
    %66 = arith.mulf %65, %58 : vector<1x512xf32>
    %67 = vector.broadcast %22 : f32 to vector<1x512xf32>
    %68 = arith.addf %66, %67 : vector<1x512xf32>
    %cst_9 = arith.constant 0.000000e+00 : f32
    %69 = vector.broadcast %cst_9 : f32 to vector<1x512xf32>
    %70 = arith.cmpf oge, %63, %69 : vector<1x512xf32>
    %cst_10 = arith.constant 0.000000e+00 : f32
    %71 = vector.broadcast %cst_10 : f32 to vector<1x512xf32>
    %72 = arith.cmpf oge, %68, %71 : vector<1x512xf32>
    %73 = arith.andi %70, %72 : vector<1x512xi1>
    %74 = vector.broadcast %23 : f32 to vector<1x512xf32>
    %75 = arith.cmpf olt, %63, %74 : vector<1x512xf32>
    %76 = arith.andi %73, %75 : vector<1x512xi1>
    %77 = vector.broadcast %24 : f32 to vector<1x512xf32>
    %78 = arith.cmpf olt, %68, %77 : vector<1x512xf32>
    %79 = arith.andi %76, %78 : vector<1x512xi1>
    %80 = arith.extui %79 : vector<1x512xi1> to vector<1x512xi32>
    %81 = arith.sitofp %80 : vector<1x512xi32> to vector<1x512xf32>
    %82 = arith.maximumf %23, %24 : f32
    %cst_11 = arith.constant -1.000000e+00 : f32
    %83 = vector.broadcast %cst_11 : f32 to vector<1x512xf32>
    %84 = arith.maximumf %83, %63 : vector<1x512xf32>
    %85 = vector.broadcast %82 : f32 to vector<1x512xf32>
    %86 = arith.minimumf %85, %84 : vector<1x512xf32>
    %cst_12 = arith.constant -1.000000e+00 : f32
    %87 = vector.broadcast %cst_12 : f32 to vector<1x512xf32>
    %88 = arith.maximumf %87, %68 : vector<1x512xf32>
    %89 = vector.broadcast %82 : f32 to vector<1x512xf32>
    %90 = arith.minimumf %89, %88 : vector<1x512xf32>
    %cst_13 = arith.constant 1.000000e+00 : f32
    %91 = arith.subf %23, %cst_13 : f32
    %92 = vector.broadcast %91 : f32 to vector<1x512xf32>
    %93 = arith.divf %86, %92 : vector<1x512xf32>
    %cst_14 = arith.constant 2.000000e+00 : f32
    %94 = vector.broadcast %cst_14 : f32 to vector<1x512xf32>
    %95 = arith.mulf %93, %94 : vector<1x512xf32>
    %cst_15 = arith.constant 1.000000e+00 : f32
    %96 = vector.broadcast %cst_15 : f32 to vector<1x512xf32>
    %97 = arith.subf %95, %96 : vector<1x512xf32>
    %cst_16 = arith.constant -1.100000e+00 : f32
    %cst_17 = arith.constant 1.100000e+00 : f32
    %98 = vector.broadcast %cst_16 : f32 to vector<1x512xf32>
    %99 = arith.maximumf %98, %97 : vector<1x512xf32>
    %100 = vector.broadcast %cst_17 : f32 to vector<1x512xf32>
    %101 = arith.minimumf %100, %99 : vector<1x512xf32>
    %cst_18 = arith.constant 1.000000e+00 : f32
    %102 = arith.subf %24, %cst_18 : f32
    %103 = vector.broadcast %102 : f32 to vector<1x512xf32>
    %104 = arith.divf %90, %103 : vector<1x512xf32>
    %cst_19 = arith.constant 2.000000e+00 : f32
    %105 = vector.broadcast %cst_19 : f32 to vector<1x512xf32>
    %106 = arith.mulf %104, %105 : vector<1x512xf32>
    %cst_20 = arith.constant 1.000000e+00 : f32
    %107 = vector.broadcast %cst_20 : f32 to vector<1x512xf32>
    %108 = arith.subf %106, %107 : vector<1x512xf32>
    %cst_21 = arith.constant -1.100000e+00 : f32
    %cst_22 = arith.constant 1.100000e+00 : f32
    %109 = vector.broadcast %cst_21 : f32 to vector<1x512xf32>
    %110 = arith.maximumf %109, %108 : vector<1x512xf32>
    %111 = vector.broadcast %cst_22 : f32 to vector<1x512xf32>
    %112 = arith.minimumf %111, %110 : vector<1x512xf32>
    %cst_23 = arith.constant 1.000000e+00 : f32
    %113 = vector.broadcast %cst_23 : f32 to vector<1x512xf32>
    %114 = arith.addf %101, %113 : vector<1x512xf32>
    %cst_24 = arith.constant 5.000000e-01 : f32
    %115 = vector.broadcast %cst_24 : f32 to vector<1x512xf32>
    %116 = arith.mulf %114, %115 : vector<1x512xf32>
    %cst_25 = arith.constant 1.500000e+01 : f32
    %117 = vector.broadcast %cst_25 : f32 to vector<1x512xf32>
    %118 = arith.mulf %116, %117 : vector<1x512xf32>
    %cst_26 = arith.constant 1.000000e+00 : f32
    %119 = vector.broadcast %cst_26 : f32 to vector<1x512xf32>
    %120 = arith.addf %112, %119 : vector<1x512xf32>
    %cst_27 = arith.constant 5.000000e-01 : f32
    %121 = vector.broadcast %cst_27 : f32 to vector<1x512xf32>
    %122 = arith.mulf %120, %121 : vector<1x512xf32>
    %cst_28 = arith.constant 1.500000e+01 : f32
    %123 = vector.broadcast %cst_28 : f32 to vector<1x512xf32>
    %124 = arith.mulf %122, %123 : vector<1x512xf32>
    %125 = math.floor %118 : vector<1x512xf32>
    %126 = math.floor %124 : vector<1x512xf32>
    %127 = arith.subf %118, %125 : vector<1x512xf32>
    %cst_29 = arith.constant 1.000000e+00 : f32
    %128 = vector.broadcast %cst_29 : f32 to vector<1x512xf32>
    %129 = arith.subf %128, %127 : vector<1x512xf32>
    %130 = arith.subf %124, %126 : vector<1x512xf32>
    %cst_30 = arith.constant 1.000000e+00 : f32
    %131 = vector.broadcast %cst_30 : f32 to vector<1x512xf32>
    %132 = arith.subf %131, %130 : vector<1x512xf32>
    %133 = arith.fptosi %125 : vector<1x512xf32> to vector<1x512xi32>
    %c1_i32 = arith.constant 1 : i32
    %134 = vector.broadcast %c1_i32 : i32 to vector<1x512xi32>
    %135 = arith.addi %133, %134 : vector<1x512xi32>
    %136 = arith.fptosi %126 : vector<1x512xf32> to vector<1x512xi32>
    %c1_i32_31 = arith.constant 1 : i32
    %137 = vector.broadcast %c1_i32_31 : i32 to vector<1x512xi32>
    %138 = arith.addi %136, %137 : vector<1x512xi32>
    %139 = vector.broadcast %133 : vector<1x512xi32> to vector<16x512xi32>
    %140 = arith.cmpi eq, %4, %139 : vector<16x512xi32>
    %cst_32 = arith.constant 0.000000e+00 : f32
    %141 = vector.shape_cast %129 : vector<1x512xf32> to vector<1x512xf32>
    %142 = vector.broadcast %141 : vector<1x512xf32> to vector<16x512xf32>
    %143 = vector.broadcast %cst_32 : f32 to vector<16x512xf32>
    %144 = arith.select %140, %142, %143 : vector<16x512xi1>, vector<16x512xf32>
    %145 = vector.broadcast %135 : vector<1x512xi32> to vector<16x512xi32>
    %146 = arith.cmpi eq, %4, %145 : vector<16x512xi32>
    %cst_33 = arith.constant 0.000000e+00 : f32
    %147 = vector.shape_cast %127 : vector<1x512xf32> to vector<1x512xf32>
    %148 = vector.broadcast %147 : vector<1x512xf32> to vector<16x512xf32>
    %149 = vector.broadcast %cst_33 : f32 to vector<16x512xf32>
    %150 = arith.select %146, %148, %149 : vector<16x512xi1>, vector<16x512xf32>
    %151 = arith.addf %144, %150 : vector<16x512xf32>
    %152 = vector.broadcast %136 : vector<1x512xi32> to vector<16x512xi32>
    %153 = arith.cmpi eq, %3, %152 : vector<16x512xi32>
    %cst_34 = arith.constant 0.000000e+00 : f32
    %154 = vector.shape_cast %132 : vector<1x512xf32> to vector<1x512xf32>
    %155 = vector.broadcast %154 : vector<1x512xf32> to vector<16x512xf32>
    %156 = vector.broadcast %cst_34 : f32 to vector<16x512xf32>
    %157 = arith.select %153, %155, %156 : vector<16x512xi1>, vector<16x512xf32>
    %158 = vector.broadcast %138 : vector<1x512xi32> to vector<16x512xi32>
    %159 = arith.cmpi eq, %3, %158 : vector<16x512xi32>
    %cst_35 = arith.constant 0.000000e+00 : f32
    %160 = vector.shape_cast %130 : vector<1x512xf32> to vector<1x512xf32>
    %161 = vector.broadcast %160 : vector<1x512xf32> to vector<16x512xf32>
    %162 = vector.broadcast %cst_35 : f32 to vector<16x512xf32>
    %163 = arith.select %159, %161, %162 : vector<16x512xi1>, vector<16x512xf32>
    %164 = arith.addf %157, %163 : vector<16x512xf32>
    %165 = vector.broadcast %81 : vector<1x512xf32> to vector<16x512xf32>
    %166 = arith.mulf %164, %165 : vector<16x512xf32>
    %167 = arith.addf %6, %81 : vector<1x512xf32>
    %c18 = arith.constant 18 : index
    %168 = memref.load %arg1[%c18] : memref<36xf32, #tpu.memory_space<smem>>
    %c19 = arith.constant 19 : index
    %169 = memref.load %arg1[%c19] : memref<36xf32, #tpu.memory_space<smem>>
    %c20 = arith.constant 20 : index
    %170 = memref.load %arg1[%c20] : memref<36xf32, #tpu.memory_space<smem>>
    %c21 = arith.constant 21 : index
    %171 = memref.load %arg1[%c21] : memref<36xf32, #tpu.memory_space<smem>>
    %c22 = arith.constant 22 : index
    %172 = memref.load %arg1[%c22] : memref<36xf32, #tpu.memory_space<smem>>
    %c23 = arith.constant 23 : index
    %173 = memref.load %arg1[%c23] : memref<36xf32, #tpu.memory_space<smem>>
    %c24 = arith.constant 24 : index
    %174 = memref.load %arg1[%c24] : memref<36xf32, #tpu.memory_space<smem>>
    %c25 = arith.constant 25 : index
    %175 = memref.load %arg1[%c25] : memref<36xf32, #tpu.memory_space<smem>>
    %c26 = arith.constant 26 : index
    %176 = memref.load %arg1[%c26] : memref<36xf32, #tpu.memory_space<smem>>
    %c27 = arith.constant 27 : index
    %177 = memref.load %arg1[%c27] : memref<36xf32, #tpu.memory_space<smem>>
    %c28 = arith.constant 28 : index
    %178 = memref.load %arg1[%c28] : memref<36xf32, #tpu.memory_space<smem>>
    %c29 = arith.constant 29 : index
    %179 = memref.load %arg1[%c29] : memref<36xf32, #tpu.memory_space<smem>>
    %c30 = arith.constant 30 : index
    %180 = memref.load %arg1[%c30] : memref<36xf32, #tpu.memory_space<smem>>
    %c31 = arith.constant 31 : index
    %181 = memref.load %arg1[%c31] : memref<36xf32, #tpu.memory_space<smem>>
    %c32 = arith.constant 32 : index
    %182 = memref.load %arg1[%c32] : memref<36xf32, #tpu.memory_space<smem>>
    %c33 = arith.constant 33 : index
    %183 = memref.load %arg1[%c33] : memref<36xf32, #tpu.memory_space<smem>>
    %c34 = arith.constant 34 : index
    %184 = memref.load %arg1[%c34] : memref<36xf32, #tpu.memory_space<smem>>
    %c35 = arith.constant 35 : index
    %185 = memref.load %arg1[%c35] : memref<36xf32, #tpu.memory_space<smem>>
    %186 = vector.broadcast %177 : f32 to vector<1x512xf32>
    %187 = arith.subf %0, %186 : vector<1x512xf32>
    %188 = vector.broadcast %178 : f32 to vector<1x512xf32>
    %189 = arith.subf %1, %188 : vector<1x512xf32>
    %190 = vector.broadcast %179 : f32 to vector<1x512xf32>
    %191 = arith.subf %2, %190 : vector<1x512xf32>
    %192 = vector.broadcast %168 : f32 to vector<1x512xf32>
    %193 = arith.mulf %192, %187 : vector<1x512xf32>
    %194 = vector.broadcast %169 : f32 to vector<1x512xf32>
    %195 = arith.mulf %194, %189 : vector<1x512xf32>
    %196 = arith.addf %193, %195 : vector<1x512xf32>
    %197 = vector.broadcast %170 : f32 to vector<1x512xf32>
    %198 = arith.mulf %197, %191 : vector<1x512xf32>
    %199 = arith.addf %196, %198 : vector<1x512xf32>
    %200 = vector.broadcast %171 : f32 to vector<1x512xf32>
    %201 = arith.mulf %200, %187 : vector<1x512xf32>
    %202 = vector.broadcast %172 : f32 to vector<1x512xf32>
    %203 = arith.mulf %202, %189 : vector<1x512xf32>
    %204 = arith.addf %201, %203 : vector<1x512xf32>
    %205 = vector.broadcast %173 : f32 to vector<1x512xf32>
    %206 = arith.mulf %205, %191 : vector<1x512xf32>
    %207 = arith.addf %204, %206 : vector<1x512xf32>
    %208 = vector.broadcast %174 : f32 to vector<1x512xf32>
    %209 = arith.mulf %208, %187 : vector<1x512xf32>
    %210 = vector.broadcast %175 : f32 to vector<1x512xf32>
    %211 = arith.mulf %210, %189 : vector<1x512xf32>
    %212 = arith.addf %209, %211 : vector<1x512xf32>
    %213 = vector.broadcast %176 : f32 to vector<1x512xf32>
    %214 = arith.mulf %213, %191 : vector<1x512xf32>
    %215 = arith.addf %212, %214 : vector<1x512xf32>
    %cst_36 = arith.constant 9.99999974E-6 : f32
    %216 = vector.broadcast %cst_36 : f32 to vector<1x512xf32>
    %217 = arith.addf %215, %216 : vector<1x512xf32>
    %cst_37 = arith.constant 1.000000e+00 : f32
    %218 = vector.broadcast %cst_37 : f32 to vector<1x512xf32>
    %219 = arith.divf %218, %217 : vector<1x512xf32>
    %220 = vector.broadcast %180 : f32 to vector<1x512xf32>
    %221 = arith.mulf %220, %199 : vector<1x512xf32>
    %222 = arith.mulf %221, %219 : vector<1x512xf32>
    %223 = vector.broadcast %182 : f32 to vector<1x512xf32>
    %224 = arith.addf %222, %223 : vector<1x512xf32>
    %225 = vector.broadcast %181 : f32 to vector<1x512xf32>
    %226 = arith.mulf %225, %207 : vector<1x512xf32>
    %227 = arith.mulf %226, %219 : vector<1x512xf32>
    %228 = vector.broadcast %183 : f32 to vector<1x512xf32>
    %229 = arith.addf %227, %228 : vector<1x512xf32>
    %cst_38 = arith.constant 0.000000e+00 : f32
    %230 = vector.broadcast %cst_38 : f32 to vector<1x512xf32>
    %231 = arith.cmpf oge, %224, %230 : vector<1x512xf32>
    %cst_39 = arith.constant 0.000000e+00 : f32
    %232 = vector.broadcast %cst_39 : f32 to vector<1x512xf32>
    %233 = arith.cmpf oge, %229, %232 : vector<1x512xf32>
    %234 = arith.andi %231, %233 : vector<1x512xi1>
    %235 = vector.broadcast %184 : f32 to vector<1x512xf32>
    %236 = arith.cmpf olt, %224, %235 : vector<1x512xf32>
    %237 = arith.andi %234, %236 : vector<1x512xi1>
    %238 = vector.broadcast %185 : f32 to vector<1x512xf32>
    %239 = arith.cmpf olt, %229, %238 : vector<1x512xf32>
    %240 = arith.andi %237, %239 : vector<1x512xi1>
    %241 = arith.extui %240 : vector<1x512xi1> to vector<1x512xi32>
    %242 = arith.sitofp %241 : vector<1x512xi32> to vector<1x512xf32>
    %243 = arith.maximumf %184, %185 : f32
    %cst_40 = arith.constant -1.000000e+00 : f32
    %244 = vector.broadcast %cst_40 : f32 to vector<1x512xf32>
    %245 = arith.maximumf %244, %224 : vector<1x512xf32>
    %246 = vector.broadcast %243 : f32 to vector<1x512xf32>
    %247 = arith.minimumf %246, %245 : vector<1x512xf32>
    %cst_41 = arith.constant -1.000000e+00 : f32
    %248 = vector.broadcast %cst_41 : f32 to vector<1x512xf32>
    %249 = arith.maximumf %248, %229 : vector<1x512xf32>
    %250 = vector.broadcast %243 : f32 to vector<1x512xf32>
    %251 = arith.minimumf %250, %249 : vector<1x512xf32>
    %cst_42 = arith.constant 1.000000e+00 : f32
    %252 = arith.subf %184, %cst_42 : f32
    %253 = vector.broadcast %252 : f32 to vector<1x512xf32>
    %254 = arith.divf %247, %253 : vector<1x512xf32>
    %cst_43 = arith.constant 2.000000e+00 : f32
    %255 = vector.broadcast %cst_43 : f32 to vector<1x512xf32>
    %256 = arith.mulf %254, %255 : vector<1x512xf32>
    %cst_44 = arith.constant 1.000000e+00 : f32
    %257 = vector.broadcast %cst_44 : f32 to vector<1x512xf32>
    %258 = arith.subf %256, %257 : vector<1x512xf32>
    %cst_45 = arith.constant -1.100000e+00 : f32
    %cst_46 = arith.constant 1.100000e+00 : f32
    %259 = vector.broadcast %cst_45 : f32 to vector<1x512xf32>
    %260 = arith.maximumf %259, %258 : vector<1x512xf32>
    %261 = vector.broadcast %cst_46 : f32 to vector<1x512xf32>
    %262 = arith.minimumf %261, %260 : vector<1x512xf32>
    %cst_47 = arith.constant 1.000000e+00 : f32
    %263 = arith.subf %185, %cst_47 : f32
    %264 = vector.broadcast %263 : f32 to vector<1x512xf32>
    %265 = arith.divf %251, %264 : vector<1x512xf32>
    %cst_48 = arith.constant 2.000000e+00 : f32
    %266 = vector.broadcast %cst_48 : f32 to vector<1x512xf32>
    %267 = arith.mulf %265, %266 : vector<1x512xf32>
    %cst_49 = arith.constant 1.000000e+00 : f32
    %268 = vector.broadcast %cst_49 : f32 to vector<1x512xf32>
    %269 = arith.subf %267, %268 : vector<1x512xf32>
    %cst_50 = arith.constant -1.100000e+00 : f32
    %cst_51 = arith.constant 1.100000e+00 : f32
    %270 = vector.broadcast %cst_50 : f32 to vector<1x512xf32>
    %271 = arith.maximumf %270, %269 : vector<1x512xf32>
    %272 = vector.broadcast %cst_51 : f32 to vector<1x512xf32>
    %273 = arith.minimumf %272, %271 : vector<1x512xf32>
    %cst_52 = arith.constant 1.000000e+00 : f32
    %274 = vector.broadcast %cst_52 : f32 to vector<1x512xf32>
    %275 = arith.addf %262, %274 : vector<1x512xf32>
    %cst_53 = arith.constant 5.000000e-01 : f32
    %276 = vector.broadcast %cst_53 : f32 to vector<1x512xf32>
    %277 = arith.mulf %275, %276 : vector<1x512xf32>
    %cst_54 = arith.constant 1.500000e+01 : f32
    %278 = vector.broadcast %cst_54 : f32 to vector<1x512xf32>
    %279 = arith.mulf %277, %278 : vector<1x512xf32>
    %cst_55 = arith.constant 1.000000e+00 : f32
    %280 = vector.broadcast %cst_55 : f32 to vector<1x512xf32>
    %281 = arith.addf %273, %280 : vector<1x512xf32>
    %cst_56 = arith.constant 5.000000e-01 : f32
    %282 = vector.broadcast %cst_56 : f32 to vector<1x512xf32>
    %283 = arith.mulf %281, %282 : vector<1x512xf32>
    %cst_57 = arith.constant 1.500000e+01 : f32
    %284 = vector.broadcast %cst_57 : f32 to vector<1x512xf32>
    %285 = arith.mulf %283, %284 : vector<1x512xf32>
    %286 = math.floor %279 : vector<1x512xf32>
    %287 = math.floor %285 : vector<1x512xf32>
    %288 = arith.subf %279, %286 : vector<1x512xf32>
    %cst_58 = arith.constant 1.000000e+00 : f32
    %289 = vector.broadcast %cst_58 : f32 to vector<1x512xf32>
    %290 = arith.subf %289, %288 : vector<1x512xf32>
    %291 = arith.subf %285, %287 : vector<1x512xf32>
    %cst_59 = arith.constant 1.000000e+00 : f32
    %292 = vector.broadcast %cst_59 : f32 to vector<1x512xf32>
    %293 = arith.subf %292, %291 : vector<1x512xf32>
    %294 = arith.fptosi %286 : vector<1x512xf32> to vector<1x512xi32>
    %c1_i32_60 = arith.constant 1 : i32
    %295 = vector.broadcast %c1_i32_60 : i32 to vector<1x512xi32>
    %296 = arith.addi %294, %295 : vector<1x512xi32>
    %297 = arith.fptosi %287 : vector<1x512xf32> to vector<1x512xi32>
    %c1_i32_61 = arith.constant 1 : i32
    %298 = vector.broadcast %c1_i32_61 : i32 to vector<1x512xi32>
    %299 = arith.addi %297, %298 : vector<1x512xi32>
    %300 = vector.broadcast %294 : vector<1x512xi32> to vector<16x512xi32>
    %301 = arith.cmpi eq, %4, %300 : vector<16x512xi32>
    %cst_62 = arith.constant 0.000000e+00 : f32
    %302 = vector.shape_cast %290 : vector<1x512xf32> to vector<1x512xf32>
    %303 = vector.broadcast %302 : vector<1x512xf32> to vector<16x512xf32>
    %304 = vector.broadcast %cst_62 : f32 to vector<16x512xf32>
    %305 = arith.select %301, %303, %304 : vector<16x512xi1>, vector<16x512xf32>
    %306 = vector.broadcast %296 : vector<1x512xi32> to vector<16x512xi32>
    %307 = arith.cmpi eq, %4, %306 : vector<16x512xi32>
    %cst_63 = arith.constant 0.000000e+00 : f32
    %308 = vector.shape_cast %288 : vector<1x512xf32> to vector<1x512xf32>
    %309 = vector.broadcast %308 : vector<1x512xf32> to vector<16x512xf32>
    %310 = vector.broadcast %cst_63 : f32 to vector<16x512xf32>
    %311 = arith.select %307, %309, %310 : vector<16x512xi1>, vector<16x512xf32>
    %312 = arith.addf %305, %311 : vector<16x512xf32>
    %313 = vector.broadcast %297 : vector<1x512xi32> to vector<16x512xi32>
    %314 = arith.cmpi eq, %3, %313 : vector<16x512xi32>
    %cst_64 = arith.constant 0.000000e+00 : f32
    %315 = vector.shape_cast %293 : vector<1x512xf32> to vector<1x512xf32>
    %316 = vector.broadcast %315 : vector<1x512xf32> to vector<16x512xf32>
    %317 = vector.broadcast %cst_64 : f32 to vector<16x512xf32>
    %318 = arith.select %314, %316, %317 : vector<16x512xi1>, vector<16x512xf32>
    %319 = vector.broadcast %299 : vector<1x512xi32> to vector<16x512xi32>
    %320 = arith.cmpi eq, %3, %319 : vector<16x512xi32>
    %cst_65 = arith.constant 0.000000e+00 : f32
    %321 = vector.shape_cast %291 : vector<1x512xf32> to vector<1x512xf32>
    %322 = vector.broadcast %321 : vector<1x512xf32> to vector<16x512xf32>
    %323 = vector.broadcast %cst_65 : f32 to vector<16x512xf32>
    %324 = arith.select %320, %322, %323 : vector<16x512xi1>, vector<16x512xf32>
    %325 = arith.addf %318, %324 : vector<16x512xf32>
    %326 = vector.broadcast %242 : vector<1x512xf32> to vector<16x512xf32>
    %327 = arith.mulf %325, %326 : vector<16x512xf32>
    %328 = arith.addf %167, %242 : vector<1x512xf32>
    %329 = tpu.concatenate %151, %5 in 1 : vector<16x512xf32>, vector<16x512xf32> -> vector<16x1024xf32>
    %330 = tpu.concatenate %5, %312 in 1 : vector<16x512xf32>, vector<16x512xf32> -> vector<16x1024xf32>
    %331 = tpu.concatenate %329, %330 in 0 : vector<16x1024xf32>, vector<16x1024xf32> -> vector<32x1024xf32>
    %332 = tpu.concatenate %166, %327 in 1 : vector<16x512xf32>, vector<16x512xf32> -> vector<16x1024xf32>
    %c0_66 = arith.constant 0 : index
    %c0_67 = arith.constant 0 : index
    %333 = vector.load %arg2[%c0_66, %c0_67] : memref<256x32xbf16, #tpu.memory_space<vmem>>, vector<256x32xbf16>
    %334 = arith.truncf %331 : vector<32x1024xf32> to vector<32x1024xbf16>
    %cst_68 = arith.constant dense<0.000000e+00> : vector<256x1024xf32>
    %335 = tpu.matmul %333, %334, %cst_68 {dimension_numbers = #tpu.dot_dimension_numbers<[1], [0], [0], [1], [0, 0, 1, 1], [], []>} : vector<256x32xbf16>, vector<32x1024xbf16>, vector<256x1024xf32> -> vector<256x1024xf32>
    %336 = vector.shape_cast %335 : vector<256x1024xf32> to vector<16x16x1024xf32>
    %337 = vector.shape_cast %332 : vector<16x1024xf32> to vector<1x16x1024xf32>
    %338 = vector.broadcast %337 : vector<1x16x1024xf32> to vector<16x16x1024xf32>
    %339 = arith.mulf %336, %338 : vector<16x16x1024xf32>
    %cst_69 = arith.constant dense<0.000000e+00> : vector<16x1024xf32>
    %340 = vector.multi_reduction <add>, %339, %cst_69 [1] : vector<16x16x1024xf32> to vector<16x1024xf32>
    %341 = vector.extract_strided_slice %340 {offsets = [0, 0], sizes = [16, 512], strides = [1, 1]} : vector<16x1024xf32> to vector<16x512xf32>
    %342 = vector.extract_strided_slice %340 {offsets = [0, 512], sizes = [16, 512], strides = [1, 1]} : vector<16x1024xf32> to vector<16x512xf32>
    %343 = arith.addf %341, %342 : vector<16x512xf32>
    %cst_70 = arith.constant 9.99999997E-7 : f32
    %344 = vector.broadcast %cst_70 : f32 to vector<1x512xf32>
    %345 = arith.addf %328, %344 : vector<1x512xf32>
    %346 = tpu.reciprocal %345 {approx = true} : vector<1x512xf32> -> vector<1x512xf32>
    %347 = vector.broadcast %346 : vector<1x512xf32> to vector<16x512xf32>
    %348 = arith.mulf %343, %347 : vector<16x512xf32>
    %cst_71 = arith.constant 0.000000e+00 : f32
    %cst_72 = arith.constant 1.000000e+00 : f32
    %349 = vector.broadcast %cst_71 : f32 to vector<16x512xf32>
    %350 = arith.maximumf %349, %348 : vector<16x512xf32>
    %351 = vector.broadcast %cst_72 : f32 to vector<16x512xf32>
    %352 = arith.minimumf %351, %350 : vector<16x512xf32>
    %c0_73 = arith.constant 0 : index
    %c0_74 = arith.constant 0 : index
    %353 = vector.load %arg4[%c0_73, %c0_74] : memref<16x512xf32, #tpu.memory_space<vmem>>, vector<16x512xf32>
    tpu.vector_store %arg4[%c0_73, %c0_74], %352 {strides = array<i32>} : memref<16x512xf32, #tpu.memory_space<vmem>>, vector<16x512xf32>,
    return
  }
  func.func @transform_0(%arg0: i32) -> i32 {
    %c0_i32 = arith.constant 0 : i32
    %c0_i32_0 = arith.constant 0 : i32
    return %c0_i32 : i32
  }
  func.func @transform_1(%arg0: i32) -> (i32, i32) {
    %c0_i32 = arith.constant 0 : i32
    %c0_i32_0 = arith.constant 0 : i32
    %c0_i32_1 = arith.constant 0 : i32
    return %c0_i32, %c0_i32_0 : i32, i32
  }
  func.func @transform_2(%arg0: i32) -> (i32, i32) {
    %c0_i32 = arith.constant 0 : i32
    %c0_i32_0 = arith.constant 0 : i32
    %c0_i32_1 = arith.constant 0 : i32
    return %c0_i32, %c0_i32_0 : i32, i32
  }
  func.func @transform_3(%arg0: i32) -> (i32, i32) {
    %c0_i32 = arith.constant 0 : i32
    %c0_i32_0 = arith.constant 0 : i32
    %c0_i32_1 = arith.constant 0 : i32
    return %c0_i32, %c0_i32_0 : i32, i32
  }
}

</mosaic_0001>

<bundles_post_ra>
// kernel: project_layer_forward.1
= control target key start
LH: loop header
LB: loop body
LE: loop exit
PB: predicated region body
PF: predicated region fallthrough
CT: control target
= control target key end

     0   :  { %8 = vsyncpa [#allocation3], 0  ;;  %s5390_s0 = inlined_call_operand.vmem [shape: f32[36], index: 0, kind: input, shape index: {}]   ;;  %s5391_s1 = inlined_call_operand.vmem [shape: bf16[256,32], index: 1, kind: input, shape index: {}]   ;;  %s5392_s2 = inlined_call_operand.vmem [shape: f32[3,512], index: 2, kind: input, shape index: {}]   ;;  %s5393_s3 = inlined_call_operand.vmem [shape: f32[16,512], index: 3, kind: output, shape index: {}]  }
   0x1   :  { %s15_s14 = sshll.u32 %s5390_s0, 4  ;;  %s16_s14 = int_to_ptr.vmem [resolvable:$true] %s15_s14 }
   0x2   :  { %s3522_s15 = scalar_lea.vmem %s16_s14, 16  ;;  %p3527_p1 = scmp.lt.s32.totalorder %s16_s14, %s16_s14 }
   0x3   :  { %p3523_p0 = scmp.ne.s32.totalorder %s16_s14, %s3522_s15  ;;  %p3528_p2 = scmp.lt.s32.totalorder %s3522_s15, %s3522_s15 }
   0x5   :  { %p3529_p3 = por %p3528_p2, %p3527_p1 }
   0x7   :  { %p3530_p4 = pnand %p3529_p3, %p3523_p0 }
   0x9   :  { %3533 = shalt.err (!%p3530_p4)
}
   0xa   :  { %s3536_s16 = smov [#allocation2]  }
   0xb   :  { %18 = dma.vmem_to_smem %s16_s14, 16, %s3536_s16, [#allocation3]  }
   0xc   :  { %3534 = dma.done.wait [#allocation3], 16  }
   0xd   :  { %3535 = vsyncadd [#allocation3], 4294967280 }
   0xe   :  { %26 = sfence }
   0xf   :  { %s3563_s17 = sld [smem:[#allocation2]]  ;;  %s3565_s18 = sld [smem:[#allocation2 + $0x1]]  ;;  %v3537_v0 = vmov 0   ;;  %v28_v1 = vld [vmem:[%s5392_s2] ss:$4 sm:$0xf] }
  0x10   :  { %s3567_s19 = sld [smem:[#allocation2 + $0x3]]  ;;  %s3569_s0 = sld [smem:[#allocation2 + $0x4]]  ;;  %974 = vmatprep.mubr.bf16.mxu0 %v3537_v0  ;;  %1167 = vmatprep.mubr.bf16.mxu1 %v3537_v0  ;;  %v3349_v2 = vld [vmem:[%s5392_s2 + $0x1] ss:$4 sm:$0xf] }
  0x11   :  { %s3573_s20 = sld [smem:[#allocation2 + $0x5]]  ;;  %s3575_s21 = sld [smem:[#allocation2 + $0x6]]  ;;  %v3350_v3 = vld [vmem:[%s5392_s2 + $0x2] ss:$4 sm:$0xf] }
  0x12   :  { %s3577_s22 = sld [smem:[#allocation2 + $0x7]]  ;;  %s3579_s23 = sld [smem:[#allocation2 + $0x8]] }
  0x13   :  { %s3359_s24 = sld [smem:[#allocation2 + $0x9]]  ;;  %s3360_s25 = sld [smem:[#allocation2 + $0xa]] }
  0x14   :  { %s3361_s26 = sld [smem:[#allocation2 + $0xb]]  ;;  %s3590_s6 = sld [smem:[#allocation2 + $0x2]] }
  0x15   :  { %s3592_s7 = sld [smem:[#allocation2 + $0xc]]  ;;  %s3594_s8 = sld [smem:[#allocation2 + $0x10]]  ;;  %v60_v15 = vstv %s3563_s17  ;;  %v62_v16 = vstv %s3565_s18 }
  0x16   :  { %v68_v4 = vstv %s3567_s19  ;;  %v70_v5 = vstv %s3569_s0  ;;  %s3599_s9 = sld [smem:[#allocation2 + $0x11]]  ;;  %s3602_s10 = sld [smem:[#allocation2 + $0x15]] }
  0x17   :  { %v73_v6 = vstv %s3573_s20  ;;  %v76_v9 = vstv %s3575_s21  ;;  %s3605_s2 = sld [smem:[#allocation2 + $0x16]]  ;;  %s3607_s11 = sld [smem:[#allocation2 + $0x1b]] }
  0x18   :  { %v78_v13 = vstv %s3577_s22  ;;  %v81_v17 = vstv %s3579_s23  ;;  %s3385_s12 = sld [smem:[#allocation2 + $0x1c]]  ;;  %s3612_s13 = sld [smem:[#allocation2 + $0x1d]] }
  0x19   :  { %v54_v7 = vstv %s3359_s24  ;;  %v56_v8 = vstv %s3360_s25  ;;  %s3614_s14 = sld [smem:[#allocation2 + $0x17]]  ;;  %s3616_s15 = sld [smem:[#allocation2 + $0x18]] }
  0x1a   :  { %v55_v10 = vsub.f32 %v28_v1, %v54_v7  ;;  %v57_v11 = vsub.f32 %v3349_v2, %v56_v8  ;;  %v58_v12 = vstv %s3361_s26  ;;  %s3618_s16 = sld [smem:[#allocation2 + $0x19]]  ;;  %s3620_s17 = sld [smem:[#allocation2 + $0x1a]]  ;;  %v65_v27 = vstv %s3590_s6 }
  0x1b   :  { %v59_v14 = vsub.f32 %v3350_v3, %v58_v12  ;;  %s3622_s18 = sld [smem:[#allocation2 + $0xd]]  ;;  %v87_v35 = vstv %s3592_s7  ;;  %s3369_s19 = sadd.f32 -1.0, %s3594_s8 }
  0x1c   :  { %v69_v18 = vmul.f32 %v68_v4, %v55_v10  ;;  %v71_v19 = vmul.f32 %v70_v5, %v57_v11  ;;  %v77_v21 = vmul.f32 %v76_v9, %v55_v10  ;;  %v79_v22 = vmul.f32 %v78_v13, %v57_v11  ;;  %s3372_s0 = sadd.f32 -1.0, %s3599_s9  ;;  %s3375_s20 = sld [smem:[#allocation2 + $0x12]] }
  0x1d   :  { %v74_v20 = vmul.f32 %v73_v6, %v59_v14  ;;  %v61_v23 = vmul.f32 %v60_v15, %v55_v10  ;;  %v63_v24 = vmul.f32 %v62_v16, %v57_v11  ;;  %v82_v26 = vmul.f32 %v81_v17, %v59_v14  ;;  %s3376_s21 = sld [smem:[#allocation2 + $0x13]]  ;;  %s3633_s22 = sld [smem:[#allocation2 + $0x14]] }
  0x1e   :  { %v72_v25 = vadd.f32 %v71_v19, %v69_v18  ;;  %v80_v28 = vadd.f32 %v79_v22, %v77_v21  ;;  %v422_v31 = vstv %s3607_s11  ;;  %v424_v32 = vstv %s3385_s12  ;;  %s3635_s23 = sld [smem:[#allocation2 + $0xe]]  ;;  %s3637_s24 = sld [smem:[#allocation2 + $0xf]] }
  0x1f   :  { %v64_v33 = vadd.f32 %v63_v24, %v61_v23  ;;  %v66_v34 = vmul.f32 %v65_v27, %v59_v14  ;;  %v423_v36 = vsub.f32 %v28_v1, %v422_v31  ;;  %v425_v38 = vsub.f32 %v3349_v2, %v424_v32  ;;  %s3641_s25 = sld [smem:[#allocation2 + $0x1f]]  ;;  %s3644_s26 = sld [smem:[#allocation2 + $0x22]] }
  0x20   :  { %v75_v29 = vadd.f32 %v74_v20, %v72_v25  ;;  %v83_v30 = vadd.f32 %v82_v26, %v80_v28  ;;  %v426_v39 = vstv %s3612_s13  ;;  %v436_v40 = vstv %s3602_s10  ;;  %s3647_s27 = sld [smem:[#allocation2 + $0x23]]  ;;  %s3649_s28 = sld [smem:[#allocation2 + $0x1e]] }
  0x21   :  { %v427_v41 = vsub.f32 %v3350_v3, %v426_v39  ;;  %v437_v42 = vmul.f32 %v436_v40, %v423_v36  ;;  %v438_v43 = vstv %s3605_s2  ;;  %v441_v44 = vstv %s3614_s14  ;;  %s108_s4 = smax.f32 %s3599_s9, %s3594_s8  ;;  %s3659_s5 = sld [smem:[#allocation2 + $0x20]] }
  0x22   :  { %v84_v37 = vadd.f32 1e-05, %v83_v30  ;;  %v439_v45 = vmul.f32 %v438_v43, %v425_v38  ;;  %v444_v46 = vstv %s3616_s15  ;;  %v446_v47 = vstv %s3618_s16  ;;  %s3661_s6 = sld [smem:[#allocation2 + $0x21]] }
  0x23   :  { %v442_v48 = vmul.f32 %v441_v44, %v427_v41  ;;  %v445_v49 = vmul.f32 %v444_v46, %v423_v36  ;;  %v447_v50 = vmul.f32 %v446_v47, %v425_v38  ;;  %v449_v51 = vstv %s3620_s17 }
  0x24   :  { %3508 = vrcp.f32 %v84_v37  ;;  %v92_v52 = vstv %s3622_s18  ;;  %v115_v53 = vstv %s3369_s19  ;;  %v440_v54 = vadd.f32 %v439_v45, %v437_v42 }
  0x25   :  { %v450_v55 = vmul.f32 %v449_v51, %v427_v41  ;;  %v67_v56 = vadd.f32 %v66_v34, %v64_v33  ;;  %v123_v57 = vstv %s3372_s0  ;;  %v448_v58 = vadd.f32 %v447_v50, %v445_v49  ;;  %s3394_s29 = sadd.f32 -1.0, %s3644_s26 }
  0x26   :  { %v443_v59 = vadd.f32 %v442_v48, %v440_v54  ;;  %v428_v60 = vstv %s3375_s20  ;;  %v430_v62 = vstv %s3376_s21  ;;  %v433_v63 = vstv %s3633_s22  ;;  %s3397_s30 = sadd.f32 -1.0, %s3647_s27  ;;  %s476_s7 = smax.f32 %s3647_s27, %s3644_s26 }
  0x27   :  { %v429_v61 = vmul.f32 %v428_v60, %v423_v36  ;;  %v451_v1 = vadd.f32 %v450_v55, %v448_v58  ;;  %3510 = vrcp.f32 %v115_v53  ;;  %v431_v2 = vmul.f32 %v430_v62, %v425_v38 }
  0x28   :  { %v88_v3 = vmul.f32 %v87_v35, %v67_v56  ;;  %v93_v4 = vmul.f32 %v92_v52, %v75_v29  ;;  %3512 = vrcp.f32 %v123_v57  ;;  %v434_v7 = vmul.f32 %v433_v63, %v427_v41 }
  0x29   :  { %v452_v5 = vadd.f32 1e-05, %v451_v1  ;;  %v432_v6 = vadd.f32 %v431_v2, %v429_v61  ;;  %v90_v9 = vstv %s3635_s23  ;;  %v95_v10 = vstv %s3637_s24 }
  0x2a   :  { %v460_v13 = vstv %s3641_s25  ;;  %v483_v14 = vstv %s3394_s29  ;;  %v100_v15 = vstv %s3594_s8  ;;  %v103_v16 = vstv %s3599_s9 }
  0x2b   :  { %3514 = vrcp.f32 %v452_v5  ;;  %v435_v17 = vadd.f32 %v434_v7, %v432_v6  ;;  %v455_v20 = vstv %s3649_s28  ;;  %v491_v21 = vstv %s3397_s30 }
  0x2c   :  { %v110_v22 = vstv %s108_s4  ;;  %v461_v23 = vmul.f32 %v460_v13, %v443_v59  ;;  %3516 = vrcp.f32 %v483_v14  ;;  %v458_v33 = vstv %s3659_s5 }
  0x2d   :  { %v456_v27 = vmul.f32 %v455_v20, %v435_v17  ;;  %3518 = vrcp.f32 %v491_v21  ;;  %v463_v34 = vstv %s3661_s6  ;;  %v468_v39 = vstv %s3644_s26 }
  0x2e   :  { %v3509_v8 = vpop.eup %3508  ;;  %v471_v43 = vstv %s3647_s27  ;;  %v478_v46 = vstv %s476_s7  ;;  %v33_v50 = vlaneseq }
  0x2f   :  { %v89_v11 = vmul.f32 %v3509_v8, %v88_v3  ;;  %v94_v12 = vmul.f32 %v3509_v8, %v93_v4 }
  0x30   :  { %v3684_v58 = vshrl.u32 %v33_v50, 7 }
  0x31   :  { %v91_v18 = vadd.f32 %v90_v9, %v89_v11  ;;  %v96_v19 = vadd.f32 %v95_v10, %v94_v12  ;;  %v3511_v24 = vpop.eup %3510 }
  0x32   :  { %v3513_v28 = vpop.eup %3512  ;;  %v3687_v1 = vsub.s32 1, %v3684_v58  ;;  %v3690_v2 = vsub.s32 3, %v3684_v58  ;;  %v3693_v3 = vsub.s32 0, %v3684_v58  ;;  %v3696_v4 = vsub.s32 2, %v3684_v58 }
  0x33   :  { %vm97_vm0 = vcmp.ge.f32.partialorder %v91_v18, 0.0  ;;  %vm98_vm1 = vcmp.ge.f32.partialorder %v96_v19, 0.0  ;;  %vm101_vm2 = vcmp.lt.f32.partialorder %v91_v18, %v100_v15  ;;  %vm104_vm3 = vcmp.lt.f32.partialorder %v96_v19, %v103_v16 }
  0x34   :  { %vm99_vm4 = vmand %vm97_vm0, %vm98_vm1  ;;  %v109_v25 = vmax.f32 %v91_v18, -1.0  ;;  %v112_v26 = vmax.f32 %v96_v19, -1.0  ;;  %5413 = vst [vmem:[#allocation5_spill] sm:$0xff] %v3687_v1  ;;  %v3699_v9 = vadd.s32 8, %v3684_v58 }
  0x35   :  { %vm102_vm5 = vmand %vm99_vm4, %vm101_vm2  ;;  %v3515_v32 = vpop.eup %3514  ;;  %5414 = vst [vmem:[#allocation6_spill] sm:$0xff] %v3690_v2 }
  0x36   :  { %vm3666_vm6 = vmand %vm102_vm5, %vm104_vm3  ;;  %v111_v30 = vmin.f32 %v110_v22, %v109_v25  ;;  %v113_v31 = vmin.f32 %v110_v22, %v112_v26  ;;  %v457_v37 = vmul.f32 %v3515_v32, %v456_v27  ;;  %v462_v38 = vmul.f32 %v3515_v32, %v461_v23  ;;  %v3517_v44 = vpop.eup %3516  ;;  %5415 = vst [vmem:[#allocation7_spill] sm:$0xff] %v3699_v9 }
  0x37   :  { %v3519_v49 = vpop.eup %3518 }
  0x38   :  { %v117_v35 = vmul.f32 %v3511_v24, %v111_v30  ;;  %v3672_v36 = vmul.f32 %v3513_v28, %v113_v31  ;;  %v459_v41 = vadd.f32 %v458_v33, %v457_v37  ;;  %v464_v42 = vadd.f32 %v463_v34, %v462_v38 }
  0x3a   :  { %v118_v40 = vmul.f32 2.0, %v117_v35  ;;  %vm465_vm7 = vcmp.ge.f32.partialorder %v459_v41, 0.0  ;;  %vm466_vm8 = vcmp.ge.f32.partialorder %v464_v42, 0.0  ;;  %vm469_vm10 = vcmp.lt.f32.partialorder %v459_v41, %v468_v39 }
  0x3b   :  { %vm467_vm9 = vmand %vm465_vm7, %vm466_vm8  ;;  %vm472_vm11 = vcmp.lt.f32.partialorder %v464_v42, %v471_v43  ;;  %v477_v47 = vmax.f32 %v459_v41, -1.0  ;;  %v480_v48 = vmax.f32 %v464_v42, -1.0 }
  0x3c   :  { %v3370_v45 = vadd.f32 -1.0, %v118_v40  ;;  %vm470_vm12 = vmand %vm467_vm9, %vm469_vm10 }
  0x3d   :  { %vm3678_vm13 = vmand %vm470_vm12, %vm472_vm11  ;;  %v479_v53 = vmin.f32 %v478_v46, %v477_v47  ;;  %v481_v54 = vmin.f32 %v478_v46, %v480_v48 }
  0x3e   :  { %v3371_v51 = vclamps-f32 %v3370_v45, 1.1 }
  0x3f   :  { %v485_v56 = vmul.f32 %v3517_v44, %v479_v53  ;;  %v3682_v57 = vmul.f32 %v3519_v49, %v481_v54 }
  0x40   :  { %v130_v55 = vadd.f32 1.0, %v3371_v51 }
  0x41   :  { %v486_v60 = vmul.f32 2.0, %v485_v56 }
  0x42   :  { %v131_v59 = vmul.f32 0.5, %v130_v55 }
  0x43   :  { %v3395_v62 = vadd.f32 -1.0, %v486_v60 }
  0x44   :  { %v132_v61 = vmul.f32 15.0, %v131_v59 }
  0x45   :  { %v3396_v5 = vclamps-f32 %v3395_v62, 1.1 }
  0x46   :  { %v136_v63 = vfloor.f32 %v132_v61 }
  0x47   :  { %v498_v8 = vadd.f32 1.0, %v3396_v5  ;;  %v3736_v5 = vld [vmem:[%s5391_s1] sm:$0xff]  }
  0x48   :  { %v138_v6 = vsub.f32 %v132_v61, %v136_v63  ;;  %v3480_v7 = vtrunc.f32 %v136_v63 }
  0x49   :  { %v499_v16 = vmul.f32 0.5, %v498_v8 }
  0x4a   :  { %v139_v10 = vsub.f32 1.0, %v138_v6  ;;  %v3481_v11 = vcvt.f32.s32 %v3480_v7  ;;  %v231_v12 = vrot.slane %v138_v6, %v3687_v1  ;;  %v239_v13 = vrot.slane %v138_v6, %v3690_v2 }
  0x4b   :  { %v227_v14 = vrot.slane %v138_v6, %v3693_v3  ;;  %v235_v15 = vrot.slane %v138_v6, %v3696_v4  ;;  %v500_v48 = vmul.f32 15.0, %v499_v16 }
  0x4c   :  { %v143_v17 = vadd.s32 1, %v3481_v11  ;;  %v153_v18 = vrot.slane %v3481_v11, %v3687_v1  ;;  %v178_v19 = vrot.slane %v139_v10, %v3687_v1  ;;  %v161_v20 = vrot.slane %v3481_v11, %v3690_v2 }
  0x4d   :  { %v186_v21 = vrot.slane %v139_v10, %v3690_v2  ;;  %v149_v22 = vrot.slane %v3481_v11, %v3693_v3  ;;  %v174_v23 = vrot.slane %v139_v10, %v3693_v3  ;;  %v157_v24 = vrot.slane %v3481_v11, %v3696_v4 }
  0x4e   :  { %vm163_vm14 = vcmp.eq.s32.totalorder %v3684_v58, %v153_v18  ;;  %vm167_vm15 = vcmp.eq.s32.totalorder %v3699_v9, %v153_v18  ;;  %v206_v25 = vrot.slane %v143_v17, %v3687_v1  ;;  %vm165_vm0 = vcmp.eq.s32.totalorder %v3684_v58, %v161_v20 }
  0x4f   :  { %v192_v26 = vsel %vm163_vm14, %v178_v19, 0.0  ;;  %v196_v27 = vsel %vm167_vm15, %v178_v19, 0.0  ;;  %vm169_vm1 = vcmp.eq.s32.totalorder %v3699_v9, %v161_v20  ;;  %v194_v28 = vsel %vm165_vm0, %v186_v21, 0.0 }
  0x50   :  { %vm216_vm2 = vcmp.eq.s32.totalorder %v3684_v58, %v206_v25  ;;  %vm220_vm3 = vcmp.eq.s32.totalorder %v3699_v9, %v206_v25  ;;  %v198_v30 = vsel %vm169_vm1, %v186_v21, 0.0  ;;  %v214_v31 = vrot.slane %v143_v17, %v3690_v2  ;;  %v3760_v25 = vld [vmem:[%s5391_s1 + $0x8] sm:$0xff]  }
  0x51   :  { %v245_v32 = vsel %vm216_vm2, %v231_v12, 0.0  ;;  %v249_v33 = vsel %vm220_vm3, %v231_v12, 0.0  ;;  %vm162_vm4 = vcmp.eq.s32.totalorder %v3684_v58, %v149_v22  ;;  %vm166_vm5 = vcmp.eq.s32.totalorder %v3699_v9, %v149_v22 }
  0x52   :  { %v253_v34 = vadd.f32 %v245_v32, %v192_v26  ;;  %v257_v35 = vadd.f32 %v249_v33, %v196_v27  ;;  %vm218_vm7 = vcmp.eq.s32.totalorder %v3684_v58, %v214_v31  ;;  %vm222_vm8 = vcmp.eq.s32.totalorder %v3699_v9, %v214_v31 }
  0x53   :  { %v247_v37 = vsel %vm218_vm7, %v239_v13, 0.0  ;;  %v251_v38 = vsel %vm222_vm8, %v239_v13, 0.0  ;;  %v191_v39 = vsel %vm162_vm4, %v174_v23, 0.0  ;;  %v195_v40 = vsel %vm166_vm5, %v174_v23, 0.0 }
  0x54   :  { %v805_v41 = vpack.c.bf16 %v257_v35, %v253_v34  ;;  %v255_v42 = vadd.f32 %v247_v37, %v194_v28  ;;  %v259_v43 = vadd.f32 %v251_v38, %v198_v30  ;;  %v202_v44 = vrot.slane %v143_v17, %v3693_v3 }
  0x55   :  { %vm164_vm9 = vcmp.eq.s32.totalorder %v3684_v58, %v157_v24  ;;  %vm168_vm10 = vcmp.eq.s32.totalorder %v3699_v9, %v157_v24  ;;  %v182_v45 = vrot.slane %v139_v10, %v3696_v4  ;;  %v210_v46 = vrot.slane %v143_v17, %v3696_v4 }
  0x56   :  { %942 = vmatprep.subr.bf16.mxu0 %v805_v41  ;;  %v807_v47 = vpack.c.bf16 %v259_v43, %v255_v42  ;;  %vm215_vm11 = vcmp.eq.s32.totalorder %v3684_v58, %v202_v44  ;;  %vm219_vm12 = vcmp.eq.s32.totalorder %v3699_v9, %v202_v44  ;;  %v504_v60 = vfloor.f32 %v500_v48 }
  0x57   :  { %v244_v49 = vsel %vm215_vm11, %v227_v14, 0.0  ;;  %v248_v50 = vsel %vm219_vm12, %v227_v14, 0.0  ;;  %v193_v51 = vsel %vm164_vm9, %v182_v45, 0.0  ;;  %v197_v53 = vsel %vm168_vm10, %v182_v45, 0.0 }
  0x58   :  { %1135 = vmatprep.subr.bf16.mxu1 %v807_v47  ;;  %v252_v54 = vadd.f32 %v244_v49, %v191_v39  ;;  %v256_v55 = vadd.f32 %v248_v50, %v195_v40  ;;  %vm217_vm14 = vcmp.eq.s32.totalorder %v3684_v58, %v210_v46  ;;  %vm221_vm15 = vcmp.eq.s32.totalorder %v3699_v9, %v210_v46 }
  0x59   :  { %v246_v56 = vsel %vm217_vm14, %v235_v15, 0.0  ;;  %v250_v59 = vsel %vm221_vm15, %v235_v15, 0.0  ;;  %v506_v6 = vsub.f32 %v500_v48, %v504_v60  ;;  %v3484_v7 = vtrunc.f32 %v504_v60 }
  0x5a   :  { %v804_v61 = vpack.c.bf16 %v256_v55, %v252_v54  ;;  %v254_v62 = vadd.f32 %v246_v56, %v193_v51  ;;  %v258_v63 = vadd.f32 %v250_v59, %v197_v53  ;;  %vm893_vm0 = vcmask 261120   ;;  %v3786_v53 = vld [vmem:[%s5391_s1 + $0x10] sm:$0xff]  }
  0x5b   :  { %v3538_v10 = vmov 0.0|0.0   ;;  %v507_v11 = vsub.f32 1.0, %v506_v6  ;;  %v3485_v12 = vcvt.f32.s32 %v3484_v7  ;;  %v599_v13 = vrot.slane %v506_v6, %v3687_v1  ;;  %v3801_v7 = vld [vmem:[%s5391_s1 + $0x18] sm:$0xff]  }
  0x5c   :  { %943 = vmatpush1.bf16.msra.mxu0 %v804_v61  ;;  %v806_v8 = vpack.c.bf16 %v258_v63, %v254_v62  ;;  %v607_v16 = vrot.slane %v506_v6, %v3690_v2  ;;  %v595_v17 = vrot.slane %v506_v6, %v3693_v3  ;;  %v603_v22 = vrot.slane %v506_v6, %v3696_v4 }
  0x5d   :  { %1328 = vmatprep.subr.bf16.mxu0 %v3538_v10  ;;  %v511_v14 = vadd.s32 1, %v3485_v12  ;;  %v521_v15 = vrot.slane %v3485_v12, %v3687_v1  ;;  %v546_v18 = vrot.slane %v507_v11, %v3687_v1  ;;  %v529_v19 = vrot.slane %v3485_v12, %v3690_v2 }
  0x5e   :  { %1136 = vmatpush1.bf16.msra.mxu1 %v806_v8  ;;  %v554_v20 = vrot.slane %v507_v11, %v3690_v2  ;;  %v517_v32 = vrot.slane %v3485_v12, %v3693_v3  ;;  %v542_v35 = vrot.slane %v507_v11, %v3693_v3  ;;  %v525_v46 = vrot.slane %v3485_v12, %v3696_v4  ;;  %v3812_v8 = vld [vmem:[%s5391_s1 + $0x20] sm:$0xff]  }
  0x5f   :  { %3416 = vmatmul.mubr.msk.bf16.vlgmr.msra.gmra.mrb[0].mxu0 %vm893_vm0, %v3736_v5  ;;  %1521 = vmatprep.subr.bf16.mxu1 %v3538_v10  ;;  %vm531_vm1 = vcmp.eq.s32.totalorder %v3684_v58, %v521_v15  ;;  %vm535_vm2 = vcmp.eq.s32.totalorder %v3699_v9, %v521_v15  ;;  %v574_v21 = vrot.slane %v511_v14, %v3687_v1  ;;  %v3846_v15 = vld [vmem:[%s5391_s1 + $0x38] sm:$0xff]  }
  0x60   :  { %1329 = vmatpush1.bf16.msra.mxu0 %v3538_v10  ;;  %984 = vmatprep.mubr.bf16.mxu0 %v3537_v0  ;;  %v560_v23 = vsel %vm531_vm1, %v546_v18, 0.0  ;;  %v564_v24 = vsel %vm535_vm2, %v546_v18, 0.0  ;;  %vm533_vm3 = vcmp.eq.s32.totalorder %v3684_v58, %v529_v19  ;;  %vm537_vm4 = vcmp.eq.s32.totalorder %v3699_v9, %v529_v19  ;;  %v3857_v18 = vld [vmem:[%s5391_s1 + $0x40] sm:$0xff]  }
  0x61   :  { %3432 = vmatmul.mubr.msk.bf16.vlgmr.msra.gmra.mrb[0].mxu1 %vm893_vm0, %v3736_v5  ;;  %vm584_vm5 = vcmp.eq.s32.totalorder %v3684_v58, %v574_v21  ;;  %vm588_vm7 = vcmp.eq.s32.totalorder %v3699_v9, %v574_v21  ;;  %v562_v26 = vsel %vm533_vm3, %v554_v20, 0.0  ;;  %v566_v27 = vsel %vm537_vm4, %v554_v20, 0.0  ;;  %v3868_v21 = vld [vmem:[%s5391_s1 + $0x48] sm:$0xff]  }
  0x62   :  { %1522 = vmatpush1.bf16.msra.mxu1 %v3538_v10  ;;  %1177 = vmatprep.mubr.bf16.mxu1 %v3537_v0  ;;  %v613_v28 = vsel %vm584_vm5, %v599_v13, 0.0  ;;  %v617_v30 = vsel %vm588_vm7, %v599_v13, 0.0  ;;  %v582_v31 = vrot.slane %v511_v14, %v3690_v2  ;;  %v570_v37 = vrot.slane %v511_v14, %v3693_v3  ;;  %v3823_v10 = vld [vmem:[%s5391_s1 + $0x28] sm:$0xff]   ;;  %v3835_v13 = vld [vmem:[%s5391_s1 + $0x30] sm:$0xff]  }
  0x63   :  { %v621_v33 = vadd.f32 %v613_v28, %v560_v23  ;;  %v625_v34 = vadd.f32 %v617_v30, %v564_v24  ;;  %vm530_vm10 = vcmp.eq.s32.totalorder %v3684_v58, %v517_v32  ;;  %vm534_vm11 = vcmp.eq.s32.totalorder %v3699_v9, %v517_v32  ;;  %v3879_v24 = vld [vmem:[%s5391_s1 + $0x50] sm:$0xff]  }
  0x64   :  { %vm586_vm8 = vcmp.eq.s32.totalorder %v3684_v58, %v582_v31  ;;  %vm590_vm9 = vcmp.eq.s32.totalorder %v3699_v9, %v582_v31  ;;  %v559_v41 = vsel %vm530_vm10, %v542_v35, 0.0  ;;  %v563_v44 = vsel %vm534_vm11, %v542_v35, 0.0 }
  0x65   :  { %v810_v38 = vpack.c.bf16 %v625_v34, %v621_v33  ;;  %v615_v39 = vsel %vm586_vm8, %v607_v16, 0.0  ;;  %v619_v40 = vsel %vm590_vm9, %v607_v16, 0.0  ;;  %vm583_vm12 = vcmp.eq.s32.totalorder %v3684_v58, %v570_v37 }
  0x66   :  { %v623_v42 = vadd.f32 %v615_v39, %v562_v26  ;;  %v627_v43 = vadd.f32 %v619_v40, %v566_v27  ;;  %vm587_vm14 = vcmp.eq.s32.totalorder %v3699_v9, %v570_v37  ;;  %v612_v45 = vsel %vm583_vm12, %v595_v17, 0.0 }
  0x67   :  { %3417 = vmatmul.mubr.msk.bf16.gmra.mrb[4].mxu0 %vm893_vm0, %v3760_v25  ;;  %1330 = vmatprep.subr.bf16.mxu0 %v810_v38  ;;  %v550_v47 = vrot.slane %v507_v11, %v3696_v4  ;;  %v616_v49 = vsel %vm587_vm14, %v595_v17, 0.0  ;;  %v620_v50 = vadd.f32 %v612_v45, %v559_v41  ;;  %v578_v51 = vrot.slane %v511_v14, %v3696_v4 }
  0x68   :  { %994 = vmatprep.mubr.bf16.mxu0 %v3537_v0  ;;  %v812_v48 = vpack.c.bf16 %v627_v43, %v623_v42  ;;  %v624_v54 = vadd.f32 %v616_v49, %v563_v44  ;;  %vm532_vm15 = vcmp.eq.s32.totalorder %v3684_v58, %v525_v46  ;;  %vm536_vm1 = vcmp.eq.s32.totalorder %v3699_v9, %v525_v46 }
  0x69   :  { %3433 = vmatmul.mubr.msk.bf16.gmra.mrb[4].mxu1 %vm893_vm0, %v3760_v25  ;;  %v561_v55 = vsel %vm532_vm15, %v550_v47, 0.0  ;;  %v565_v56 = vsel %vm536_vm1, %v550_v47, 0.0  ;;  %vm585_vm2 = vcmp.eq.s32.totalorder %v3684_v58, %v578_v51  ;;  %vm589_vm3 = vcmp.eq.s32.totalorder %v3699_v9, %v578_v51  ;;  %v3915_v51 = vld [vmem:[%s5391_s1 + $0x58] sm:$0xff]  }
  0x6a   :  { %1187 = vmatprep.mubr.bf16.mxu1 %v3537_v0  ;;  %1523 = vmatprep.subr.bf16.mxu1 %v812_v48  ;;  %v809_v59 = vpack.c.bf16 %v624_v54, %v620_v50  ;;  %v614_v60 = vsel %vm585_vm2, %v603_v22, 0.0  ;;  %v618_v61 = vsel %vm589_vm3, %v603_v22, 0.0  ;;  %v126_v11 = vmul.f32 2.0, %v3672_v36 }
  0x6b   :  { %v622_v62 = vadd.f32 %v614_v60, %v561_v55  ;;  %v626_v63 = vadd.f32 %v618_v61, %v565_v56  ;;  %v3539_v27 = vmov 0.0  }
  0x6c   :  { %1331 = vmatpush1.bf16.msra.mxu0 %v809_v59  ;;  %v3373_v12 = vadd.f32 -1.0, %v126_v11  ;;  %v3884_v28 = vsel %vm3666_vm6, 1.0, %v3539_v27 }
  0x6d   :  { %v811_v6 = vpack.c.bf16 %v626_v63, %v622_v62  ;;  %5416 = vst [vmem:[#allocation8_spill] sm:$0xff] %v3884_v28  ;;  %v378_v44 = vrot.slane %v3884_v28, %v3693_v3  ;;  %v386_v46 = vrot.slane %v3884_v28, %v3696_v4  ;;  %v382_v56 = vrot.slane %v3884_v28, %v3687_v1 }
  0x6e   :  { %v3374_v14 = vclamps-f32 %v3373_v12, 1.1 }
  0x6f   :  { %3418 = vmatmul.mubr.msk.bf16.gmra.mrb[8].mxu0 %vm893_vm0, %v3786_v53  ;;  %1524 = vmatpush1.bf16.msra.mxu1 %v811_v6 }
  0x70   :  { %1004 = vmatprep.mubr.bf16.mxu0 %v3537_v0  ;;  %v133_v36 = vadd.f32 1.0, %v3374_v14  ;;  %v390_v14 = vrot.slane %v3884_v28, %v3690_v2 }
  0x71   :  { %3434 = vmatmul.mubr.msk.bf16.gmra.mrb[8].mxu1 %vm893_vm0, %v3786_v53 }
  0x72   :  { %1197 = vmatprep.mubr.bf16.mxu1 %v3537_v0  ;;  %v134_v16 = vmul.f32 0.5, %v133_v36 }
  0x74   :  { %v135_v17 = vmul.f32 15.0, %v134_v16 }
  0x76   :  { %v137_v19 = vfloor.f32 %v135_v17 }
  0x77   :  { %3419 = vmatmul.mubr.msk.bf16.gmra.mrb[12].mxu0 %vm893_vm0, %v3801_v7 }
  0x78   :  { %1014 = vmatprep.mubr.bf16.mxu0 %v3537_v0  ;;  %v3482_v20 = vtrunc.f32 %v137_v19  ;;  %v140_v23 = vsub.f32 %v135_v17, %v137_v19 }
  0x79   :  { %3435 = vmatmul.mubr.msk.bf16.gmra.mrb[12].mxu1 %vm893_vm0, %v3801_v7 }
  0x7a   :  { %1207 = vmatprep.mubr.bf16.mxu1 %v3537_v0  ;;  %v3483_v22 = vcvt.f32.s32 %v3482_v20  ;;  %v141_v30 = vsub.f32 1.0, %v140_v23  ;;  %v341_v37 = vrot.slane %v140_v23, %v3693_v3  ;;  %v349_v39 = vrot.slane %v140_v23, %v3696_v4 }
  0x7b   :  { %v345_v50 = vrot.slane %v140_v23, %v3687_v1  ;;  %v353_v6 = vrot.slane %v140_v23, %v3690_v2 }
  0x7c   :  { %v145_v26 = vadd.s32 1, %v3483_v22  ;;  %v263_v31 = vrot.slane %v3483_v22, %v3693_v3  ;;  %v271_v33 = vrot.slane %v3483_v22, %v3696_v4  ;;  %v288_v35 = vrot.slane %v141_v30, %v3693_v3 }
  0x7d   :  { %v296_v38 = vrot.slane %v141_v30, %v3696_v4  ;;  %v267_v47 = vrot.slane %v3483_v22, %v3687_v1  ;;  %v292_v48 = vrot.slane %v141_v30, %v3687_v1  ;;  %v275_v59 = vrot.slane %v3483_v22, %v3690_v2 }
  0x7e   :  { %v316_v32 = vrot.slane %v145_v26, %v3693_v3  ;;  %v324_v34 = vrot.slane %v145_v26, %v3696_v4  ;;  %vm276_vm6 = vcmp.eq.s32.totalorder %v3684_v58, %v263_v31  ;;  %vm278_vm5 = vcmp.eq.s32.totalorder %v3684_v58, %v271_v33 }
  0x7f   :  { %3420 = vmatmul.mubr.msk.bf16.gmra.mrb[16].mxu0 %vm893_vm0, %v3812_v8  ;;  %v305_v29 = vsel %vm276_vm6, %v288_v35, 0.0  ;;  %v307_v41 = vsel %vm278_vm5, %v296_v38, 0.0  ;;  %v320_v49 = vrot.slane %v145_v26, %v3687_v1  ;;  %vm277_vm8 = vcmp.eq.s32.totalorder %v3684_v58, %v267_v47 }
  0x80   :  { %1024 = vmatprep.mubr.bf16.mxu0 %v3537_v0  ;;  %vm329_vm4 = vcmp.eq.s32.totalorder %v3684_v58, %v316_v32  ;;  %vm331_vm7 = vcmp.eq.s32.totalorder %v3684_v58, %v324_v34  ;;  %v300_v60 = vrot.slane %v141_v30, %v3690_v2  ;;  %v328_v61 = vrot.slane %v145_v26, %v3690_v2 }
  0x81   :  { %3436 = vmatmul.mubr.msk.bf16.gmra.mrb[16].mxu1 %vm893_vm0, %v3812_v8  ;;  %v358_v40 = vsel %vm329_vm4, %v341_v37, 0.0  ;;  %v360_v42 = vsel %vm331_vm7, %v349_v39, 0.0  ;;  %vm330_vm9 = vcmp.eq.s32.totalorder %v3684_v58, %v320_v49  ;;  %v306_v62 = vsel %vm277_vm8, %v292_v48, 0.0 }
  0x82   :  { %1217 = vmatprep.mubr.bf16.mxu1 %v3537_v0  ;;  %v366_v43 = vadd.f32 %v358_v40, %v305_v29  ;;  %v368_v45 = vadd.f32 %v360_v42, %v307_v41  ;;  %v359_v63 = vsel %vm330_vm9, %v345_v50, 0.0  ;;  %vm279_vm10 = vcmp.eq.s32.totalorder %v3684_v58, %v275_v59 }
  0x83   :  { %v367_v11 = vadd.f32 %v359_v63, %v306_v62  ;;  %v308_v12 = vsel %vm279_vm10, %v300_v60, 0.0  ;;  %vm332_vm11 = vcmp.eq.s32.totalorder %v3684_v58, %v328_v61  ;;  %vm280_vm12 = vcmp.eq.s32.totalorder %v3699_v9, %v263_v31 }
  0x84   :  { %v3917_v54 = vmul.f32 %v378_v44, %v366_v43  ;;  %v3919_v55 = vmul.f32 %v386_v46, %v368_v45  ;;  %v361_v36 = vsel %vm332_vm11, %v353_v6, 0.0  ;;  %vm333_vm14 = vcmp.eq.s32.totalorder %v3699_v9, %v316_v32  ;;  %v3952_v32 = vld [vmem:[%s5391_s1 + $0x60] sm:$0xff]   ;;  %v3973_v43 = vld [vmem:[%s5391_s1 + $0x68] sm:$0xff]   ;;  %v3995_v45 = vld [vmem:[%s5391_s1 + $0x78] sm:$0xff]  }
  0x85   :  { %vm282_vm15 = vcmp.eq.s32.totalorder %v3699_v9, %v271_v33  ;;  %v3939_v16 = vmul.f32 %v382_v56, %v367_v11  ;;  %v369_v17 = vadd.f32 %v361_v36, %v308_v12  ;;  %v309_v19 = vsel %vm280_vm12, %v288_v35, 0.0 }
  0x86   :  { %v362_v20 = vsel %vm333_vm14, %v341_v37, 0.0  ;;  %v311_v23 = vsel %vm282_vm15, %v296_v38, 0.0  ;;  %vm335_vm1 = vcmp.eq.s32.totalorder %v3699_v9, %v324_v34  ;;  %vm281_vm2 = vcmp.eq.s32.totalorder %v3699_v9, %v267_v47 }
  0x87   :  { %3421 = vmatmul.mubr.msk.bf16.gmra.mrb[20].mxu0 %vm893_vm0, %v3823_v10  ;;  %v370_v22 = vadd.f32 %v362_v20, %v309_v19  ;;  %v3946_v26 = vmul.f32 %v390_v14, %v369_v17  ;;  %v364_v30 = vsel %vm335_vm1, %v349_v39, 0.0  ;;  %v310_v31 = vsel %vm281_vm2, %v292_v48, 0.0 }
  0x88   :  { %1034 = vmatprep.mubr.bf16.mxu0 %v3537_v0  ;;  %vm334_vm3 = vcmp.eq.s32.totalorder %v3699_v9, %v320_v49  ;;  %v372_v35 = vadd.f32 %v364_v30, %v311_v23  ;;  %vm283_vm6 = vcmp.eq.s32.totalorder %v3699_v9, %v275_v59  ;;  %vm336_vm4 = vcmp.eq.s32.totalorder %v3699_v9, %v328_v61 }
  0x89   :  { %3437 = vmatmul.mubr.msk.bf16.gmra.mrb[20].mxu1 %vm893_vm0, %v3823_v10  ;;  %v3954_v33 = vmul.f32 %v378_v44, %v370_v22  ;;  %v363_v37 = vsel %vm334_vm3, %v345_v50, 0.0  ;;  %v312_v38 = vsel %vm283_vm6, %v300_v60, 0.0  ;;  %v365_v39 = vsel %vm336_vm4, %v353_v6, 0.0  ;;  %v3984_v44 = vld [vmem:[%s5391_s1 + $0x70] sm:$0xff]  }
  0x8a   :  { %1227 = vmatprep.mubr.bf16.mxu1 %v3537_v0  ;;  %v371_v34 = vadd.f32 %v363_v37, %v310_v31  ;;  %v3958_v29 = vmul.f32 %v386_v46, %v372_v35  ;;  %v373_v41 = vadd.f32 %v365_v39, %v312_v38 }
  0x8c   :  { %v3960_v40 = vmul.f32 %v382_v56, %v371_v34  ;;  %v3965_v42 = vmul.f32 %v390_v14, %v373_v41 }
  0x8f   :  { %3422 = vmatmul.mubr.msk.bf16.gmra.mrb[24].mxu0 %vm893_vm0, %v3835_v13 }
  0x90   :  { %1044 = vmatprep.mubr.bf16.mxu0 %v3537_v0 }
  0x91   :  { %3438 = vmatmul.mubr.msk.bf16.gmra.mrb[24].mxu1 %vm893_vm0, %v3835_v13 }
  0x92   :  { %1237 = vmatprep.mubr.bf16.mxu1 %v3537_v0 }
  0x97   :  { %3423 = vmatmul.mubr.msk.bf16.gmra.mrb[28].mxu0 %vm893_vm0, %v3846_v15 }
  0x98   :  { %1054 = vmatprep.mubr.bf16.mxu0 %v3537_v0 }
  0x99   :  { %3439 = vmatmul.mubr.msk.bf16.gmra.mrb[28].mxu1 %vm893_vm0, %v3846_v15 }
  0x9a   :  { %1247 = vmatprep.mubr.bf16.mxu1 %v3537_v0 }
  0x9f   :  { %3424 = vmatmul.mubr.msk.bf16.gmra.mrb[32].mxu0 %vm893_vm0, %v3857_v18 }
  0xa0   :  { %1064 = vmatprep.mubr.bf16.mxu0 %v3537_v0 }
  0xa1   :  { %3440 = vmatmul.mubr.msk.bf16.gmra.mrb[32].mxu1 %vm893_vm0, %v3857_v18 }
  0xa2   :  { %1257 = vmatprep.mubr.bf16.mxu1 %v3537_v0 }
  0xa7   :  { %3425 = vmatmul.mubr.msk.bf16.gmra.mrb[36].mxu0 %vm893_vm0, %v3868_v21 }
  0xa8   :  { %1074 = vmatprep.mubr.bf16.mxu0 %v3537_v0 }
  0xa9   :  { %3441 = vmatmul.mubr.msk.bf16.gmra.mrb[36].mxu1 %vm893_vm0, %v3868_v21 }
  0xaa   :  { %1267 = vmatprep.mubr.bf16.mxu1 %v3537_v0 }
  0xaf   :  { %3426 = vmatmul.mubr.msk.bf16.gmra.mrb[40].mxu0 %vm893_vm0, %v3879_v24 }
  0xb0   :  { %1084 = vmatprep.mubr.bf16.mxu0 %v3537_v0 }
  0xb1   :  { %3442 = vmatmul.mubr.msk.bf16.gmra.mrb[40].mxu1 %vm893_vm0, %v3879_v24 }
  0xb2   :  { %1277 = vmatprep.mubr.bf16.mxu1 %v3537_v0 }
  0xb7   :  { %3427 = vmatmul.mubr.msk.bf16.gmra.mrb[44].mxu0 %vm893_vm0, %v3915_v51 }
  0xb8   :  { %1094 = vmatprep.mubr.bf16.mxu0 %v3537_v0 }
  0xb9   :  { %3443 = vmatmul.mubr.msk.bf16.gmra.mrb[44].mxu1 %vm893_vm0, %v3915_v51 }
  0xba   :  { %1287 = vmatprep.mubr.bf16.mxu1 %v3537_v0 }
  0xbf   :  { %3428 = vmatmul.mubr.msk.bf16.gmra.mrb[48].mxu0 %vm893_vm0, %v3952_v32 }
  0xc0   :  { %1104 = vmatprep.mubr.bf16.mxu0 %v3537_v0 }
  0xc1   :  { %3444 = vmatmul.mubr.msk.bf16.gmra.mrb[48].mxu1 %vm893_vm0, %v3952_v32 }
  0xc2   :  { %1297 = vmatprep.mubr.bf16.mxu1 %v3537_v0 }
  0xc7   :  { %3429 = vmatmul.mubr.msk.bf16.gmra.mrb[52].mxu0 %vm893_vm0, %v3973_v43 }
  0xc8   :  { %1114 = vmatprep.mubr.bf16.mxu0 %v3537_v0 }
  0xc9   :  { %3445 = vmatmul.mubr.msk.bf16.gmra.mrb[52].mxu1 %vm893_vm0, %v3973_v43 }
  0xca   :  { %1307 = vmatprep.mubr.bf16.mxu1 %v3537_v0 }
  0xcf   :  { %3430 = vmatmul.mubr.msk.bf16.gmra.mrb[56].mxu0 %vm893_vm0, %v3984_v44 }
  0xd0   :  { %1124 = vmatprep.mubr.bf16.mxu0 %v3537_v0 }
  0xd1   :  { %3446 = vmatmul.mubr.msk.bf16.gmra.mrb[56].mxu1 %vm893_vm0, %v3984_v44 }
  0xd2   :  { %1317 = vmatprep.mubr.bf16.mxu1 %v3537_v0 }
  0xd7   :  { %3431 = vmatmul.mubr.msk.bf16.gmra.mrb[60].mxu0 %vm893_vm0, %v3995_v45 }
  0xd8   :  { %1360 = vmatprep.mubr.bf16.mxu0 %v3537_v0 }
  0xd9   :  { %3447 = vmatmul.mubr.msk.bf16.gmra.mrb[60].mxu1 %vm893_vm0, %v3995_v45 }
  0xda   :  { %1553 = vmatprep.mubr.bf16.mxu1 %v3537_v0 }
  0xdf   :  { %3448 = vmatmul.mubr.msk.bf16.vlgmr.msra.gmra.mrb[64].mxu0 %vm893_vm0, %v3736_v5 }
  0xe0   :  { %1370 = vmatprep.mubr.bf16.mxu0 %v3537_v0 }
  0xe1   :  { %3464 = vmatmul.mubr.msk.bf16.vlgmr.msra.gmra.mrb[64].mxu1 %vm893_vm0, %v3736_v5  ;;  %v494_v5 = vmul.f32 2.0, %v3682_v57 }
  0xe2   :  { %1563 = vmatprep.mubr.bf16.mxu1 %v3537_v0 }
  0xe7   :  { %3449 = vmatmul.mubr.msk.bf16.gmra.mrb[68].mxu0 %vm893_vm0, %v3760_v25 }
  0xe8   :  { %1380 = vmatprep.mubr.bf16.mxu0 %v3537_v0 }
  0xe9   :  { %3465 = vmatmul.mubr.msk.bf16.gmra.mrb[68].mxu1 %vm893_vm0, %v3760_v25  ;;  %v3398_v25 = vadd.f32 -1.0, %v494_v5 }
  0xea   :  { %1573 = vmatprep.mubr.bf16.mxu1 %v3537_v0 }
  0xef   :  { %3450 = vmatmul.mubr.msk.bf16.gmra.mrb[72].mxu0 %vm893_vm0, %v3786_v53 }
  0xf0   :  { %1390 = vmatprep.mubr.bf16.mxu0 %v3537_v0 }
  0xf1   :  { %3466 = vmatmul.mubr.msk.bf16.gmra.mrb[72].mxu1 %vm893_vm0, %v3786_v53  ;;  %v3399_v53 = vclamps-f32 %v3398_v25, 1.1 }
  0xf2   :  { %1583 = vmatprep.mubr.bf16.mxu1 %v3537_v0 }
  0xf7   :  { %3451 = vmatmul.mubr.msk.bf16.gmra.mrb[76].mxu0 %vm893_vm0, %v3801_v7 }
  0xf8   :  { %1400 = vmatprep.mubr.bf16.mxu0 %v3537_v0 }
  0xf9   :  { %3467 = vmatmul.mubr.msk.bf16.gmra.mrb[76].mxu1 %vm893_vm0, %v3801_v7  ;;  %v501_v7 = vadd.f32 1.0, %v3399_v53 }
  0xfa   :  { %1593 = vmatprep.mubr.bf16.mxu1 %v3537_v0 }
  0xfb   :  { %v502_v57 = vmul.f32 0.5, %v501_v7 }
  0xff   :  { %3452 = vmatmul.mubr.msk.bf16.gmra.mrb[80].mxu0 %vm893_vm0, %v3812_v8 }
 0x100   :  { %1410 = vmatprep.mubr.bf16.mxu0 %v3537_v0 }
 0x101   :  { %3468 = vmatmul.mubr.msk.bf16.gmra.mrb[80].mxu1 %vm893_vm0, %v3812_v8  ;;  %v503_v8 = vmul.f32 15.0, %v502_v57 }
 0x102   :  { %1603 = vmatprep.mubr.bf16.mxu1 %v3537_v0 }
 0x107   :  { %3453 = vmatmul.mubr.msk.bf16.gmra.mrb[84].mxu0 %vm893_vm0, %v3823_v10 }
 0x108   :  { %1420 = vmatprep.mubr.bf16.mxu0 %v3537_v0 }
 0x109   :  { %3469 = vmatmul.mubr.msk.bf16.gmra.mrb[84].mxu1 %vm893_vm0, %v3823_v10 }
 0x10a   :  { %1613 = vmatprep.mubr.bf16.mxu1 %v3537_v0 }
 0x10f   :  { %3454 = vmatmul.mubr.msk.bf16.gmra.mrb[88].mxu0 %vm893_vm0, %v3835_v13 }
 0x110   :  { %1430 = vmatprep.mubr.bf16.mxu0 %v3537_v0 }
 0x111   :  { %3470 = vmatmul.mubr.msk.bf16.gmra.mrb[88].mxu1 %vm893_vm0, %v3835_v13  ;;  %v505_v13 = vfloor.f32 %v503_v8 }
 0x112   :  { %1623 = vmatprep.mubr.bf16.mxu1 %v3537_v0 }
 0x113   :  { %v4072_v50 = vsub.f32 %v503_v8, %v505_v13  ;;  %v3486_v60 = vtrunc.f32 %v505_v13 }
 0x115   :  { %v4086_v23 = vcvt.f32.s32 %v3486_v60  ;;  %v4089_v37 = vsub.f32 1.0, %v4072_v50 }
 0x117   :  { %3455 = vmatmul.mubr.msk.bf16.gmra.mrb[92].mxu0 %vm893_vm0, %v3846_v15  ;;  %5417 = vst [vmem:[#allocation9_spill] sm:$0xff] %v4086_v23  ;;  %5418 = vst [vmem:[#allocation10_spill] sm:$0xff] %v4089_v37 }
 0x118   :  { %1440 = vmatprep.mubr.bf16.mxu0 %v3537_v0 }
 0x119   :  { %3471 = vmatmul.mubr.msk.bf16.gmra.mrb[92].mxu1 %vm893_vm0, %v3846_v15 }
 0x11a   :  { %1633 = vmatprep.mubr.bf16.mxu1 %v3537_v0 }
 0x11f   :  { %3456 = vmatmul.mubr.msk.bf16.gmra.mrb[96].mxu0 %vm893_vm0, %v3857_v18 }
 0x120   :  { %1450 = vmatprep.mubr.bf16.mxu0 %v3537_v0 }
 0x121   :  { %3472 = vmatmul.mubr.msk.bf16.gmra.mrb[96].mxu1 %vm893_vm0, %v3857_v18 }
 0x122   :  { %1643 = vmatprep.mubr.bf16.mxu1 %v3537_v0 }
 0x127   :  { %3457 = vmatmul.mubr.msk.bf16.gmra.mrb[100].mxu0 %vm893_vm0, %v3868_v21 }
 0x128   :  { %1460 = vmatprep.mubr.bf16.mxu0 %v3537_v0 }
 0x129   :  { %3473 = vmatmul.mubr.msk.bf16.gmra.mrb[100].mxu1 %vm893_vm0, %v3868_v21 }
 0x12a   :  { %1653 = vmatprep.mubr.bf16.mxu1 %v3537_v0 }
 0x12f   :  { %3458 = vmatmul.mubr.msk.bf16.gmra.mrb[104].mxu0 %vm893_vm0, %v3879_v24 }
 0x130   :  { %1470 = vmatprep.mubr.bf16.mxu0 %v3537_v0 }
 0x131   :  { %3474 = vmatmul.mubr.msk.bf16.gmra.mrb[104].mxu1 %vm893_vm0, %v3879_v24 }
 0x132   :  { %v976_v10 = vpop.f32.mrb[0].mxu0  ;;  %1663 = vmatprep.mubr.bf16.mxu1 %v3537_v0 }
 0x133   :  { %v978_v15 = vpop.f32.mrb[1].mxu0  ;;  %v1714_v21 = vmul.f32 %v976_v10, %v3917_v54 }
 0x134   :  { %v1169_v18 = vpop.f32.mrb[0].mxu1  ;;  %v980_v46 = vpop.f32.mrb[2].mxu0  ;;  %v1715_v56 = vmul.f32 %v978_v15, %v3939_v16 }
 0x135   :  { %v1171_v47 = vpop.f32.mrb[1].mxu1  ;;  %v1722_v48 = vmul.f32 %v980_v46, %v3954_v33  ;;  %v982_v49 = vpop.f32.mrb[3].mxu0  ;;  %v1716_v61 = vmul.f32 %v1169_v18, %v3919_v55 }
 0x136   :  { %v1173_v59 = vpop.f32.mrb[2].mxu1  ;;  %v1723_v24 = vmul.f32 %v982_v49, %v3960_v40  ;;  %v1717_v11 = vmul.f32 %v1171_v47, %v3946_v26 }
 0x137   :  { %v1970_v62 = vadd.f32 %v1722_v48, %v1714_v21  ;;  %v1724_v63 = vmul.f32 %v1173_v59, %v3958_v29  ;;  %v1175_v6 = vpop.f32.mrb[3].mxu1  ;;  %3459 = vmatmul.mubr.msk.bf16.gmra.mrb[108].mxu0 %vm893_vm0, %v3915_v51 }
 0x138   :  { %v1977_v12 = vadd.f32 %v1723_v24, %v1715_v56  ;;  %v1725_v14 = vmul.f32 %v1175_v6, %v3965_v42  ;;  %1480 = vmatprep.mubr.bf16.mxu0 %v3537_v0 }
 0x139   :  { %v1971_v36 = vrot.slane %v1970_v62, 4  ;;  %v1984_v17 = vadd.f32 %v1724_v63, %v1716_v61  ;;  %3475 = vmatmul.mubr.msk.bf16.gmra.mrb[108].mxu1 %vm893_vm0, %v3915_v51 }
 0x13a   :  { %v1978_v19 = vrot.slane %v1977_v12, 4  ;;  %v1991_v20 = vadd.f32 %v1725_v14, %v1717_v11  ;;  %v986_v22 = vpop.f32.mrb[4].mxu0  ;;  %1673 = vmatprep.mubr.bf16.mxu1 %v3537_v0  ;;  %v4107_v14 = vsel %vm3678_vm13, 1.0, %v3539_v27 }
 0x13b   :  { %v1972_v30 = vadd.f32 %v1971_v36, %v1970_v62  ;;  %v1985_v31 = vrot.slane %v1984_v17, 4  ;;  %v988_v35 = vpop.f32.mrb[5].mxu0  ;;  %v1730_v39 = vmul.f32 %v986_v22, %v3917_v54 }
 0x13c   :  { %v1979_v34 = vadd.f32 %v1978_v19, %v1977_v12  ;;  %v1992_v38 = vrot.slane %v1991_v20, 4  ;;  %v1179_v41 = vpop.f32.mrb[4].mxu1  ;;  %v1731_v51 = vmul.f32 %v988_v35, %v3939_v16  ;;  %v990_v5 = vpop.f32.mrb[6].mxu0  ;;  %v4111_v35 = vadd.s32 1, %v4086_v23 }
 0x13d   :  { %v1973_v25 = vrot.slane %v1972_v30, 2  ;;  %v1986_v53 = vadd.f32 %v1985_v31, %v1984_v17  ;;  %v1732_v7 = vmul.f32 %v1179_v41, %v3919_v55  ;;  %v1181_v57 = vpop.f32.mrb[5].mxu1  ;;  %v1738_v8 = vmul.f32 %v990_v5, %v3954_v33  ;;  %v992_v10 = vpop.f32.mrb[7].mxu0 }
 0x13e   :  { %v1980_v13 = vrot.slane %v1979_v34, 2  ;;  %v1993_v15 = vadd.f32 %v1992_v38, %v1991_v20  ;;  %v1733_v18 = vmul.f32 %v1181_v57, %v3946_v26  ;;  %v1183_v46 = vpop.f32.mrb[6].mxu1  ;;  %v1739_v21 = vmul.f32 %v992_v10, %v3960_v40 }
 0x13f   :  { %v1974_v47 = vadd.f32 %v1973_v25, %v1972_v30  ;;  %v1987_v48 = vrot.slane %v1986_v53, 2  ;;  %v2026_v49 = vadd.f32 %v1738_v8, %v1730_v39  ;;  %v1740_v56 = vmul.f32 %v1183_v46, %v3958_v29  ;;  %v1185_v59 = vpop.f32.mrb[7].mxu1  ;;  %3460 = vmatmul.mubr.msk.bf16.gmra.mrb[112].mxu0 %vm893_vm0, %v3952_v32 }
 0x140   :  { %v1981_v24 = vadd.f32 %v1980_v13, %v1979_v34  ;;  %v1994_v60 = vrot.slane %v1993_v15, 2  ;;  %v2033_v61 = vadd.f32 %v1739_v21, %v1731_v51  ;;  %v1741_v62 = vmul.f32 %v1185_v59, %v3965_v42  ;;  %1490 = vmatprep.mubr.bf16.mxu0 %v3537_v0 }
 0x141   :  { %v1975_v63 = vrot.slane %v1974_v47, 1  ;;  %v1988_v6 = vadd.f32 %v1987_v48, %v1986_v53  ;;  %v2027_v11 = vrot.slane %v2026_v49, 4  ;;  %v2040_v12 = vadd.f32 %v1740_v56, %v1732_v7  ;;  %3476 = vmatmul.mubr.msk.bf16.gmra.mrb[112].mxu1 %vm893_vm0, %v3952_v32 }
 0x142   :  { %v1995_v36 = vadd.f32 %v1994_v60, %v1993_v15  ;;  %v2034_v17 = vrot.slane %v2033_v61, 4  ;;  %v2047_v19 = vadd.f32 %v1741_v62, %v1733_v18  ;;  %v996_v20 = vpop.f32.mrb[8].mxu0  ;;  %1683 = vmatprep.mubr.bf16.mxu1 %v3537_v0  ;;  %v4115_v32 = vrot.slane %v4086_v23, %v3693_v3 }
 0x143   :  { %v2028_v22 = vadd.f32 %v2027_v11, %v2026_v49  ;;  %v2041_v30 = vrot.slane %v2040_v12, 4  ;;  %v998_v31 = vpop.f32.mrb[9].mxu0  ;;  %v1982_v34 = vrot.slane %v1981_v24, 1  ;;  %v4119_v41 = vrot.slane %v4089_v37, %v3693_v3 }
 0x144   :  { %v2035_v52 = vadd.f32 %v2034_v17, %v2033_v61  ;;  %v2048_v27 = vrot.slane %v2047_v19, 4  ;;  %v1189_v38 = vpop.f32.mrb[8].mxu1  ;;  %v1000_v39 = vpop.f32.mrb[10].mxu0  ;;  %v4121_v51 = vadd.f32 %v1975_v63, %v1974_v47  ;;  %v1989_v5 = vrot.slane %v1988_v6, 1 }
 0x145   :  { %v2029_v25 = vrot.slane %v2028_v22, 2  ;;  %v2042_v53 = vadd.f32 %v2041_v30, %v2040_v12  ;;  %v1191_v7 = vpop.f32.mrb[9].mxu1  ;;  %v1002_v57 = vpop.f32.mrb[11].mxu0  ;;  %v1996_v8 = vrot.slane %v1995_v36, 1  ;;  %v1746_v15 = vmul.f32 %v996_v20, %v3917_v54 }
 0x146   :  { %5419 = vst [vmem:[#allocation11_spill] sm:$0xff] %v4121_v51  ;;  %v2036_v10 = vrot.slane %v2035_v52, 2  ;;  %v2049_v13 = vadd.f32 %v2048_v27, %v2047_v19  ;;  %v1193_v18 = vpop.f32.mrb[10].mxu1  ;;  %v1748_v48 = vmul.f32 %v1189_v38, %v3919_v55  ;;  %v1747_v49 = vmul.f32 %v998_v31, %v3939_v16 }
 0x147   :  { %v4124_v46 = vadd.f32 %v2029_v25, %v2028_v22  ;;  %v2043_v21 = vrot.slane %v2042_v53, 2  ;;  %v1195_v47 = vpop.f32.mrb[11].mxu1  ;;  %3461 = vmatmul.mubr.msk.bf16.gmra.mrb[116].mxu0 %vm893_vm0, %v3973_v43  ;;  %v1754_v60 = vmul.f32 %v1000_v39, %v3954_v33  ;;  %v1756_v61 = vmul.f32 %v1193_v18, %v3958_v29 }
 0x148   :  { %v4130_v56 = vadd.f32 %v2036_v10, %v2035_v52  ;;  %v2050_v59 = vrot.slane %v2049_v13, 2  ;;  %1500 = vmatprep.mubr.bf16.mxu0 %v3537_v0  ;;  %v1749_v63 = vmul.f32 %v1191_v7, %v3946_v26  ;;  %v1755_v11 = vmul.f32 %v1002_v57, %v3960_v40 }
 0x149   :  { %v4135_v62 = vadd.f32 %v2043_v21, %v2042_v53  ;;  %v1757_v12 = vmul.f32 %v1195_v47, %v3965_v42  ;;  %3477 = vmatmul.mubr.msk.bf16.gmra.mrb[116].mxu1 %vm893_vm0, %v3973_v43  ;;  %v4142_v17 = vadd.f32 %v1982_v34, %v1981_v24  ;;  %v2082_v20 = vadd.f32 %v1754_v60, %v1746_v15 }
 0x14a   :  { %v2051_v19 = vadd.f32 %v2050_v59, %v2049_v13  ;;  %v2096_v22 = vadd.f32 %v1756_v61, %v1748_v48  ;;  %v1006_v30 = vpop.f32.mrb[12].mxu0  ;;  %1693 = vmatprep.mubr.bf16.mxu1 %v3537_v0  ;;  %v4145_v31 = vadd.f32 %v1989_v5, %v1988_v6  ;;  %v4147_v52 = vadd.f32 %v1996_v8, %v1995_v36 }
 0x14b   :  { %5420 = vst [vmem:[#allocation12_spill] sm:$0xff] %v4142_v17  ;;  %v2089_v27 = vadd.f32 %v1755_v11, %v1747_v49  ;;  %v2103_v38 = vadd.f32 %v1757_v12, %v1749_v63  ;;  %v1008_v39 = vpop.f32.mrb[13].mxu0  ;;  %v2031_v25 = vrot.slane %v4124_v46, 1  ;;  %v2038_v53 = vrot.slane %v4130_v56, 1 }
 0x14c   :  { %5421 = vst [vmem:[#allocation13_spill] sm:$0xff] %v4145_v31  ;;  %5422 = vst [vmem:[#allocation14_spill] sm:$0xff] %v4147_v52  ;;  %v2083_v43 = vrot.slane %v2082_v20, 4  ;;  %v2097_v24 = vrot.slane %v2096_v22, 4  ;;  %v1199_v34 = vpop.f32.mrb[12].mxu1  ;;  %v1010_v7 = vpop.f32.mrb[14].mxu0  ;;  %v1762_v18 = vmul.f32 %v1006_v30, %v3917_v54  ;;  %v1763_v59 = vmul.f32 %v1008_v39, %v3939_v16 }
 0x14d   :  { %v2045_v57 = vrot.slane %v4135_v62, 1  ;;  %v2052_v10 = vrot.slane %v2051_v19, 1  ;;  %v2090_v13 = vrot.slane %v2089_v27, 4  ;;  %v2104_v15 = vrot.slane %v2103_v38, 4  ;;  %v1201_v6 = vpop.f32.mrb[13].mxu1  ;;  %v1012_v5 = vpop.f32.mrb[15].mxu0 }
 0x14e   :  { %v2084_v36 = vadd.f32 %v2083_v43, %v2082_v20  ;;  %v2098_v8 = vadd.f32 %v2097_v24, %v2096_v22  ;;  %v1764_v21 = vmul.f32 %v1199_v34, %v3919_v55  ;;  %v1203_v48 = vpop.f32.mrb[14].mxu1  ;;  %v1765_v60 = vmul.f32 %v1201_v6, %v3946_v26 }
 0x14f   :  { %v2091_v49 = vadd.f32 %v2090_v13, %v2089_v27  ;;  %v2105_v47 = vadd.f32 %v2104_v15, %v2103_v38  ;;  %v1205_v61 = vpop.f32.mrb[15].mxu1  ;;  %3462 = vmatmul.mubr.msk.bf16.gmra.mrb[120].mxu0 %vm893_vm0, %v3984_v44  ;;  %v1770_v12 = vmul.f32 %v1010_v7, %v3954_v33  ;;  %v1772_v20 = vmul.f32 %v1203_v48, %v3958_v29 }
 0x150   :  { %v2085_v63 = vrot.slane %v2084_v36, 2  ;;  %v2099_v11 = vrot.slane %v2098_v8, 2  ;;  %1510 = vmatprep.mubr.bf16.mxu0 %v3537_v0  ;;  %v1771_v27 = vmul.f32 %v1012_v5, %v3960_v40  ;;  %v1773_v38 = vmul.f32 %v1205_v61, %v3965_v42 }
 0x151   :  { %v2092_v22 = vrot.slane %v2091_v49, 2  ;;  %v2106_v30 = vrot.slane %v2105_v47, 2  ;;  %3478 = vmatmul.mubr.msk.bf16.gmra.mrb[120].mxu1 %vm893_vm0, %v3984_v44  ;;  %v2138_v24 = vadd.f32 %v1770_v12, %v1762_v18  ;;  %v2152_v34 = vadd.f32 %v1772_v20, %v1764_v21 }
 0x152   :  { %v2086_v39 = vadd.f32 %v2085_v63, %v2084_v36  ;;  %v2100_v43 = vadd.f32 %v2099_v11, %v2098_v8  ;;  %v1016_v13 = vpop.f32.mrb[16].mxu0  ;;  %1703 = vmatprep.mubr.bf16.mxu1 %v3537_v0  ;;  %v2145_v6 = vadd.f32 %v1771_v27, %v1763_v59  ;;  %v2159_v48 = vadd.f32 %v1773_v38, %v1765_v60 }
 0x153   :  { %v2093_v7 = vadd.f32 %v2092_v22, %v2091_v49  ;;  %v2107_v15 = vadd.f32 %v2106_v30, %v2105_v47  ;;  %v1018_v52 = vpop.f32.mrb[17].mxu0  ;;  %v4167_v17 = vadd.f32 %v2031_v25, %v4124_v46  ;;  %v4170_v5 = vadd.f32 %v2038_v53, %v4130_v56 }
 0x154   :  { %v2139_v61 = vrot.slane %v2138_v24, 4  ;;  %v2153_v44 = vrot.slane %v2152_v34, 4  ;;  %v1209_v36 = vpop.f32.mrb[16].mxu1  ;;  %v1020_v8 = vpop.f32.mrb[18].mxu0  ;;  %v4173_v18 = vadd.f32 %v2045_v57, %v4135_v62  ;;  %v4175_v21 = vadd.f32 %v2052_v10, %v2051_v19 }
 0x155   :  { %5423 = vst [vmem:[#allocation15_spill] sm:$0xff] %v4167_v17  ;;  %5424 = vst [vmem:[#allocation16_spill] sm:$0xff] %v4170_v5  ;;  %v2146_v0 = vrot.slane %v2145_v6, 4  ;;  %v2160_v49 = vrot.slane %v2159_v48, 4  ;;  %v1211_v47 = vpop.f32.mrb[17].mxu1  ;;  %v1022_v59 = vpop.f32.mrb[19].mxu0  ;;  %v1778_v57 = vmul.f32 %v1016_v13, %v3917_v54  ;;  %v1780_v10 = vmul.f32 %v1209_v36, %v3919_v55 }
 0x156   :  { %5425 = vst [vmem:[#allocation17_spill] sm:$0xff] %v4173_v18  ;;  %5426 = vst [vmem:[#allocation18_spill] sm:$0xff] %v4175_v21  ;;  %v2087_v60 = vrot.slane %v2086_v39, 1  ;;  %v2101_v63 = vrot.slane %v2100_v43, 1  ;;  %v2140_v46 = vadd.f32 %v2139_v61, %v2138_v24  ;;  %v2154_v25 = vadd.f32 %v2153_v44, %v2152_v34  ;;  %v1213_v11 = vpop.f32.mrb[18].mxu1 }
 0x157   :  { %v2094_v56 = vrot.slane %v2093_v7, 1  ;;  %v2108_v53 = vrot.slane %v2107_v15, 1  ;;  %v2147_v12 = vadd.f32 %v2146_v0, %v2145_v6  ;;  %v2161_v20 = vadd.f32 %v2160_v49, %v2159_v48  ;;  %v1215_v22 = vpop.f32.mrb[19].mxu1  ;;  %3463 = vmatmul.mubr.msk.bf16.gmra.mrb[124].mxu0 %vm893_vm0, %v3995_v45 }
 0x158   :  { %v2141_v62 = vrot.slane %v2140_v46, 2  ;;  %v2155_v19 = vrot.slane %v2154_v25, 2  ;;  %v1779_v38 = vmul.f32 %v1018_v52, %v3939_v16  ;;  %v1781_v24 = vmul.f32 %v1211_v47, %v3946_v26 }
 0x159   :  { %v2148_v30 = vrot.slane %v2147_v12, 2  ;;  %v2162_v27 = vrot.slane %v2161_v20, 2  ;;  %3479 = vmatmul.mubr.msk.bf16.gmra.mrb[124].mxu1 %vm893_vm0, %v3995_v45  ;;  %v1786_v48 = vmul.f32 %v1020_v8, %v3954_v33  ;;  %v1788_v61 = vmul.f32 %v1213_v11, %v3958_v29 }
 0x15a   :  { %v2142_v34 = vadd.f32 %v2141_v62, %v2140_v46  ;;  %v2156_v6 = vadd.f32 %v2155_v19, %v2154_v25  ;;  %v1026_v44 = vpop.f32.mrb[20].mxu0  ;;  %v1787_v36 = vmul.f32 %v1022_v59, %v3960_v40  ;;  %v1789_v49 = vmul.f32 %v1215_v22, %v3965_v42 }
 0x15b   :  { %v2149_v0 = vadd.f32 %v2148_v30, %v2147_v12  ;;  %v2163_v13 = vadd.f32 %v2162_v27, %v2161_v20  ;;  %v1028_v21 = vpop.f32.mrb[21].mxu0  ;;  %v4189_v52 = vadd.f32 %v2087_v60, %v2086_v39  ;;  %v4191_v47 = vadd.f32 %v2101_v63, %v2100_v43 }
 0x15c   :  { %v2194_v5 = vadd.f32 %v1786_v48, %v1778_v57  ;;  %v2208_v45 = vadd.f32 %v1788_v61, %v1780_v10  ;;  %v1219_v46 = vpop.f32.mrb[20].mxu1  ;;  %v1030_v25 = vpop.f32.mrb[22].mxu0  ;;  %v4193_v62 = vadd.f32 %v2094_v56, %v2093_v7  ;;  %v4195_v8 = vadd.f32 %v2108_v53, %v2107_v15 }
 0x15d   :  { %5427 = vst [vmem:[#allocation19_spill] sm:$0xff] %v4189_v52  ;;  %5428 = vst [vmem:[#allocation20_spill] sm:$0xff] %v4191_v47  ;;  %v2201_v11 = vadd.f32 %v1787_v36, %v1779_v38  ;;  %v2215_v12 = vadd.f32 %v1789_v49, %v1781_v24  ;;  %v1221_v20 = vpop.f32.mrb[21].mxu1  ;;  %v1032_v19 = vpop.f32.mrb[23].mxu0  ;;  %v2143_v59 = vrot.slane %v2142_v34, 1  ;;  %v2157_v30 = vrot.slane %v2156_v6, 1 }
 0x15e   :  { %5429 = vst [vmem:[#allocation21_spill] sm:$0xff] %v4193_v62  ;;  %5430 = vst [vmem:[#allocation22_spill] sm:$0xff] %v4195_v8  ;;  %v2195_v22 = vrot.slane %v2194_v5, 4  ;;  %v2209_v27 = vrot.slane %v2208_v45, 4  ;;  %v1223_v39 = vpop.f32.mrb[22].mxu1  ;;  %v2150_v60 = vrot.slane %v2149_v0, 1  ;;  %v1794_v7 = vmul.f32 %v1026_v44, %v3917_v54 }
 0x15f   :  { %v2164_v43 = vrot.slane %v2163_v13, 1  ;;  %v2202_v63 = vrot.slane %v2201_v11, 4  ;;  %v2216_v57 = vrot.slane %v2215_v12, 4  ;;  %v1225_v10 = vpop.f32.mrb[23].mxu1  ;;  %v1796_v15 = vmul.f32 %v1219_v46, %v3919_v55 }
 0x160   :  { %v2196_v48 = vadd.f32 %v2195_v22, %v2194_v5  ;;  %v2210_v61 = vadd.f32 %v2209_v27, %v2208_v45  ;;  %v1795_v38 = vmul.f32 %v1028_v21, %v3939_v16  ;;  %v1797_v24 = vmul.f32 %v1221_v20, %v3946_v26 }
 0x161   :  { %v2203_v56 = vadd.f32 %v2202_v63, %v2201_v11  ;;  %v2217_v53 = vadd.f32 %v2216_v57, %v2215_v12  ;;  %v1802_v8 = vmul.f32 %v1030_v25, %v3954_v33  ;;  %v1804_v62 = vmul.f32 %v1223_v39, %v3958_v29 }
 0x162   :  { %v2197_v36 = vrot.slane %v2196_v48, 2  ;;  %v2211_v49 = vrot.slane %v2210_v61, 2  ;;  %v1036_v47 = vpop.f32.mrb[24].mxu0  ;;  %v1803_v45 = vmul.f32 %v1032_v19, %v3960_v40  ;;  %v1805_v44 = vmul.f32 %v1225_v10, %v3965_v42 }
 0x163   :  { %v2204_v52 = vrot.slane %v2203_v56, 2  ;;  %v2218_v5 = vrot.slane %v2217_v53, 2  ;;  %v1038_v46 = vpop.f32.mrb[25].mxu0  ;;  %v2250_v22 = vadd.f32 %v1802_v8, %v1794_v7  ;;  %v2264_v21 = vadd.f32 %v1804_v62, %v1796_v15 }
 0x164   :  { %v2198_v11 = vadd.f32 %v2197_v36, %v2196_v48  ;;  %v2212_v12 = vadd.f32 %v2211_v49, %v2210_v61  ;;  %v1229_v27 = vpop.f32.mrb[24].mxu1  ;;  %v1040_v20 = vpop.f32.mrb[26].mxu0  ;;  %v2257_v18 = vadd.f32 %v1803_v45, %v1795_v38  ;;  %v2271_v25 = vadd.f32 %v1805_v44, %v1797_v24 }
 0x165   :  { %v2205_v63 = vadd.f32 %v2204_v52, %v2203_v56  ;;  %v2219_v57 = vadd.f32 %v2218_v5, %v2217_v53  ;;  %v1231_v17 = vpop.f32.mrb[25].mxu1  ;;  %v1042_v39 = vpop.f32.mrb[27].mxu0  ;;  %v4205_v31 = vadd.f32 %v2143_v59, %v2142_v34  ;;  %v4207_v51 = vadd.f32 %v2157_v30, %v2156_v6 }
 0x166   :  { %v2251_v19 = vrot.slane %v2250_v22, 4  ;;  %v2265_v28 = vrot.slane %v2264_v21, 4  ;;  %v1233_v10 = vpop.f32.mrb[26].mxu1  ;;  %v4209_v9 = vadd.f32 %v2150_v60, %v2149_v0  ;;  %v4211_v48 = vadd.f32 %v2164_v43, %v2163_v13 }
 0x167   :  { %5431 = vst [vmem:[#allocation23_spill] sm:$0xff] %v4205_v31  ;;  %5432 = vst [vmem:[#allocation24_spill] sm:$0xff] %v4207_v51  ;;  %v2258_v62 = vrot.slane %v2257_v18, 4  ;;  %v2272_v8 = vrot.slane %v2271_v25, 4  ;;  %v1235_v61 = vpop.f32.mrb[27].mxu1  ;;  %v2199_v52 = vrot.slane %v2198_v11, 1  ;;  %v1810_v24 = vmul.f32 %v1036_v47, %v3917_v54 }
 0x168   :  { %5433 = vst [vmem:[#allocation25_spill] sm:$0xff] %v4209_v9  ;;  %5434 = vst [vmem:[#allocation26_spill] sm:$0xff] %v4211_v48  ;;  %v2213_v7 = vrot.slane %v2212_v12, 1  ;;  %v2252_v15 = vadd.f32 %v2251_v19, %v2250_v22  ;;  %v2266_v56 = vadd.f32 %v2265_v28, %v2264_v21  ;;  %v2206_v53 = vrot.slane %v2205_v63, 1 }
 0x169   :  { %v2220_v38 = vrot.slane %v2219_v57, 1  ;;  %v2259_v34 = vadd.f32 %v2258_v62, %v2257_v18  ;;  %v2273_v59 = vadd.f32 %v2272_v8, %v2271_v25  ;;  %v1812_v0 = vmul.f32 %v1229_v27, %v3919_v55 }
 0x16a   :  { %v2253_v6 = vrot.slane %v2252_v15, 2  ;;  %v2267_v30 = vrot.slane %v2266_v56, 2  ;;  %v1046_v60 = vpop.f32.mrb[28].mxu0  ;;  %v1811_v36 = vmul.f32 %v1038_v46, %v3939_v16  ;;  %v1813_v49 = vmul.f32 %v1231_v17, %v3946_v26 }
 0x16b   :  { %v2260_v13 = vrot.slane %v2259_v34, 2  ;;  %v2274_v43 = vrot.slane %v2273_v59, 2  ;;  %v1048_v5 = vpop.f32.mrb[29].mxu0  ;;  %v1818_v44 = vmul.f32 %v1040_v20, %v3954_v33  ;;  %v1820_v18 = vmul.f32 %v1233_v10, %v3958_v29 }
 0x16c   :  { %v2254_v45 = vadd.f32 %v2253_v6, %v2252_v15  ;;  %v2268_v28 = vadd.f32 %v2267_v30, %v2266_v56  ;;  %v1239_v22 = vpop.f32.mrb[28].mxu1  ;;  %v1050_v21 = vpop.f32.mrb[30].mxu0  ;;  %v1819_v27 = vmul.f32 %v1042_v39, %v3960_v40  ;;  %v1821_v19 = vmul.f32 %v1235_v61, %v3965_v42 }
 0x16d   :  { %v2261_v25 = vadd.f32 %v2260_v13, %v2259_v34  ;;  %v2275_v47 = vadd.f32 %v2274_v43, %v2273_v59  ;;  %v1241_v62 = vpop.f32.mrb[29].mxu1  ;;  %v1052_v8 = vpop.f32.mrb[31].mxu0  ;;  %v4221_v46 = vadd.f32 %v2199_v52, %v2198_v11  ;;  %v4223_v17 = vadd.f32 %v2213_v7, %v2212_v12 }
 0x16e   :  { %v2306_v15 = vadd.f32 %v1818_v44, %v1810_v24  ;;  %v2320_v56 = vadd.f32 %v1820_v18, %v1812_v0  ;;  %v1243_v6 = vpop.f32.mrb[30].mxu1  ;;  %v4225_v20 = vadd.f32 %v2206_v53, %v2205_v63  ;;  %v4227_v10 = vadd.f32 %v2220_v38, %v2219_v57 }
 0x16f   :  { %5435 = vst [vmem:[#allocation27_spill] sm:$0xff] %v4221_v46  ;;  %5436 = vst [vmem:[#allocation28_spill] sm:$0xff] %v4223_v17  ;;  %v2313_v30 = vadd.f32 %v1819_v27, %v1811_v36  ;;  %v2327_v34 = vadd.f32 %v1821_v19, %v1813_v49  ;;  %v1245_v59 = vpop.f32.mrb[31].mxu1  ;;  %v2255_v13 = vrot.slane %v2254_v45, 1  ;;  %v2269_v39 = vrot.slane %v2268_v28, 1 }
 0x170   :  { %5437 = vst [vmem:[#allocation29_spill] sm:$0xff] %v4225_v20  ;;  %5438 = vst [vmem:[#allocation30_spill] sm:$0xff] %v4227_v10  ;;  %v2307_v43 = vrot.slane %v2306_v15, 4  ;;  %v2321_v61 = vrot.slane %v2320_v56, 4  ;;  %v2262_v48 = vrot.slane %v2261_v25, 1  ;;  %v2276_v9 = vrot.slane %v2275_v47, 1 }
 0x171   :  { %v2314_v11 = vrot.slane %v2313_v30, 4  ;;  %v2328_v52 = vrot.slane %v2327_v34, 4  ;;  %v1826_v24 = vmul.f32 %v1046_v60, %v3917_v54  ;;  %v1828_v63 = vmul.f32 %v1239_v22, %v3919_v55 }
 0x172   :  { %v2308_v12 = vadd.f32 %v2307_v43, %v2306_v15  ;;  %v2322_v7 = vadd.f32 %v2321_v61, %v2320_v56  ;;  %v1056_v53 = vpop.f32.mrb[32].mxu0  ;;  %v1827_v0 = vmul.f32 %v1048_v5, %v3939_v16  ;;  %v1829_v36 = vmul.f32 %v1241_v62, %v3946_v26 }
 0x173   :  { %v2315_v57 = vadd.f32 %v2314_v11, %v2313_v30  ;;  %v2329_v38 = vadd.f32 %v2328_v52, %v2327_v34  ;;  %v1058_v49 = vpop.f32.mrb[33].mxu0  ;;  %v1834_v27 = vmul.f32 %v1050_v21, %v3954_v33  ;;  %v1836_v19 = vmul.f32 %v1243_v6, %v3958_v29 }
 0x174   :  { %v2309_v44 = vrot.slane %v2308_v12, 2  ;;  %v2323_v18 = vrot.slane %v2322_v7, 2  ;;  %v1249_v15 = vpop.f32.mrb[32].mxu1  ;;  %v1060_v56 = vpop.f32.mrb[34].mxu0  ;;  %v1835_v22 = vmul.f32 %v1052_v8, %v3960_v40  ;;  %v1837_v30 = vmul.f32 %v1245_v59, %v3965_v42 }
 0x175   :  { %v2316_v43 = vrot.slane %v2315_v57, 2  ;;  %v2330_v60 = vrot.slane %v2329_v38, 2  ;;  %v1251_v34 = vpop.f32.mrb[33].mxu1  ;;  %v1062_v61 = vpop.f32.mrb[35].mxu0  ;;  %v2362_v62 = vadd.f32 %v1834_v27, %v1826_v24  ;;  %v2376_v52 = vadd.f32 %v1836_v19, %v1828_v63 }
 0x176   :  { %v2310_v5 = vadd.f32 %v2309_v44, %v2308_v12  ;;  %v2324_v11 = vadd.f32 %v2323_v18, %v2322_v7  ;;  %v1253_v10 = vpop.f32.mrb[34].mxu1  ;;  %v2369_v21 = vadd.f32 %v1835_v22, %v1827_v0  ;;  %v2383_v46 = vadd.f32 %v1837_v30, %v1829_v36 }
 0x177   :  { %v2317_v20 = vadd.f32 %v2316_v43, %v2315_v57  ;;  %v2331_v17 = vadd.f32 %v2330_v60, %v2329_v38  ;;  %v1255_v6 = vpop.f32.mrb[35].mxu1  ;;  %v4237_v51 = vadd.f32 %v2255_v13, %v2254_v45  ;;  %v4239_v31 = vadd.f32 %v2269_v39, %v2268_v28 }
 0x178   :  { %v2363_v2 = vrot.slane %v2362_v62, 4  ;;  %v2377_v8 = vrot.slane %v2376_v52, 4  ;;  %v4241_v1 = vadd.f32 %v2262_v48, %v2261_v25  ;;  %v4243_v59 = vadd.f32 %v2276_v9, %v2275_v47 }
 0x179   :  { %5439 = vst [vmem:[#allocation31_spill] sm:$0xff] %v4237_v51  ;;  %5440 = vst [vmem:[#allocation32_spill] sm:$0xff] %v4239_v31  ;;  %v2370_v12 = vrot.slane %v2369_v21, 4  ;;  %v2384_v7 = vrot.slane %v2383_v46, 4  ;;  %v2311_v24 = vrot.slane %v2310_v5, 1  ;;  %v2325_v63 = vrot.slane %v2324_v11, 1 }
 0x17a   :  { %5441 = vst [vmem:[#allocation33_spill] sm:$0xff] %v4241_v1  ;;  %5442 = vst [vmem:[#allocation34_spill] sm:$0xff] %v4243_v59  ;;  %v2364_v44 = vadd.f32 %v2363_v2, %v2362_v62  ;;  %v2378_v57 = vadd.f32 %v2377_v8, %v2376_v52  ;;  %v1066_v38 = vpop.f32.mrb[36].mxu0  ;;  %v2318_v0 = vrot.slane %v2317_v20, 1  ;;  %v2332_v36 = vrot.slane %v2331_v17, 1 }
 0x17b   :  { %v2371_v18 = vadd.f32 %v2370_v12, %v2369_v21  ;;  %v2385_v45 = vadd.f32 %v2384_v7, %v2383_v46  ;;  %v1068_v13 = vpop.f32.mrb[37].mxu0  ;;  %v1842_v27 = vmul.f32 %v1056_v53, %v3917_v54  ;;  %v1844_v48 = vmul.f32 %v1249_v15, %v3919_v55 }
 0x17c   :  { %v2365_v28 = vrot.slane %v2364_v44, 2  ;;  %v2379_v39 = vrot.slane %v2378_v57, 2  ;;  %v1259_v9 = vpop.f32.mrb[36].mxu1  ;;  %v1070_v25 = vpop.f32.mrb[38].mxu0  ;;  %v1843_v43 = vmul.f32 %v1058_v49, %v3939_v16  ;;  %v1845_v2 = vmul.f32 %v1251_v34, %v3946_v26 }
 0x17d   :  { %v2372_v47 = vrot.slane %v2371_v18, 2  ;;  %v2386_v19 = vrot.slane %v2385_v45, 2  ;;  %v1261_v60 = vpop.f32.mrb[37].mxu1  ;;  %v1072_v22 = vpop.f32.mrb[39].mxu0  ;;  %v1850_v46 = vmul.f32 %v1060_v56, %v3954_v33  ;;  %v1852_v52 = vmul.f32 %v1253_v10, %v3958_v29 }
 0x17e   :  { %v2366_v30 = vadd.f32 %v2365_v28, %v2364_v44  ;;  %v2380_v62 = vadd.f32 %v2379_v39, %v2378_v57  ;;  %v1263_v21 = vpop.f32.mrb[38].mxu1  ;;  %v1851_v15 = vmul.f32 %v1062_v61, %v3960_v40  ;;  %v1853_v12 = vmul.f32 %v1255_v6, %v3965_v42 }
 0x17f   :  { %v2373_v53 = vadd.f32 %v2372_v47, %v2371_v18  ;;  %v2387_v8 = vadd.f32 %v2386_v19, %v2385_v45  ;;  %v1265_v7 = vpop.f32.mrb[39].mxu1  ;;  %v4253_v59 = vadd.f32 %v2311_v24, %v2310_v5  ;;  %v4255_v49 = vadd.f32 %v2325_v63, %v2324_v11 }
 0x180   :  { %v2418_v34 = vadd.f32 %v1850_v46, %v1842_v27  ;;  %v2432_v1 = vadd.f32 %v1852_v52, %v1844_v48  ;;  %v4257_v44 = vadd.f32 %v2318_v0, %v2317_v20  ;;  %v4259_v57 = vadd.f32 %v2332_v36, %v2331_v17 }
 0x181   :  { %5443 = vst [vmem:[#allocation35_spill] sm:$0xff] %v4253_v59  ;;  %5444 = vst [vmem:[#allocation36_spill] sm:$0xff] %v4255_v49  ;;  %v2425_v56 = vadd.f32 %v1851_v15, %v1843_v43  ;;  %v2439_v10 = vadd.f32 %v1853_v12, %v1845_v2  ;;  %v2367_v28 = vrot.slane %v2366_v30, 1  ;;  %v2381_v18 = vrot.slane %v2380_v62, 1 }
 0x182   :  { %5445 = vst [vmem:[#allocation37_spill] sm:$0xff] %v4257_v44  ;;  %5446 = vst [vmem:[#allocation38_spill] sm:$0xff] %v4259_v57  ;;  %v2419_v45 = vrot.slane %v2418_v34, 4  ;;  %v2433_v39 = vrot.slane %v2432_v1, 4  ;;  %v1076_v61 = vpop.f32.mrb[40].mxu0  ;;  %v2374_v47 = vrot.slane %v2373_v53, 1  ;;  %v1858_v27 = vmul.f32 %v1066_v38, %v3917_v54 }
 0x183   :  { %v2388_v6 = vrot.slane %v2387_v8, 1  ;;  %v2426_v19 = vrot.slane %v2425_v56, 4  ;;  %v2440_v5 = vrot.slane %v2439_v10, 4  ;;  %v1078_v24 = vpop.f32.mrb[41].mxu0  ;;  %v1860_v20 = vmul.f32 %v1259_v9, %v3919_v55 }
 0x184   :  { %v2420_v11 = vadd.f32 %v2419_v45, %v2418_v34  ;;  %v2434_v63 = vadd.f32 %v2433_v39, %v2432_v1  ;;  %v1269_v17 = vpop.f32.mrb[40].mxu1  ;;  %v1080_v0 = vpop.f32.mrb[42].mxu0  ;;  %v1859_v43 = vmul.f32 %v1068_v13, %v3939_v16  ;;  %v1861_v2 = vmul.f32 %v1261_v60, %v3946_v26 }
 0x185   :  { %v2427_v36 = vadd.f32 %v2426_v19, %v2425_v56  ;;  %v2441_v48 = vadd.f32 %v2440_v5, %v2439_v10  ;;  %v1271_v46 = vpop.f32.mrb[41].mxu1  ;;  %v1082_v52 = vpop.f32.mrb[43].mxu0  ;;  %v1866_v57 = vmul.f32 %v1070_v25, %v3954_v33  ;;  %v1868_v1 = vmul.f32 %v1263_v21, %v3958_v29 }
 0x186   :  { %v2421_v15 = vrot.slane %v2420_v11, 2  ;;  %v2435_v12 = vrot.slane %v2434_v63, 2  ;;  %v1273_v34 = vpop.f32.mrb[42].mxu1  ;;  %v1867_v9 = vmul.f32 %v1072_v22, %v3960_v40  ;;  %v1869_v56 = vmul.f32 %v1265_v7, %v3965_v42 }
 0x187   :  { %v2428_v38 = vrot.slane %v2427_v36, 2  ;;  %v2442_v45 = vrot.slane %v2441_v48, 2  ;;  %v1275_v10 = vpop.f32.mrb[43].mxu1  ;;  %v2474_v19 = vadd.f32 %v1866_v57, %v1858_v27  ;;  %v2488_v60 = vadd.f32 %v1868_v1, %v1860_v20 }
 0x188   :  { %v2422_v39 = vadd.f32 %v2421_v15, %v2420_v11  ;;  %v2436_v13 = vadd.f32 %v2435_v12, %v2434_v63  ;;  %v2481_v49 = vadd.f32 %v1867_v9, %v1859_v43  ;;  %v2495_v59 = vadd.f32 %v1869_v56, %v1861_v2 }
 0x189   :  { %v2429_v5 = vadd.f32 %v2428_v38, %v2427_v36  ;;  %v2443_v44 = vadd.f32 %v2442_v45, %v2441_v48  ;;  %v4269_v31 = vadd.f32 %v2367_v28, %v2366_v30  ;;  %v4271_v25 = vadd.f32 %v2381_v18, %v2380_v62 }
 0x18a   :  { %v2475_v21 = vrot.slane %v2474_v19, 4  ;;  %v2489_v51 = vrot.slane %v2488_v60, 4  ;;  %v1086_v37 = vpop.f32.mrb[44].mxu0  ;;  %v4273_v23 = vadd.f32 %v2374_v47, %v2373_v53  ;;  %v4275_v22 = vadd.f32 %v2388_v6, %v2387_v8 }
 0x18b   :  { %5447 = vst [vmem:[#allocation39_spill] sm:$0xff] %v4269_v31  ;;  %5448 = vst [vmem:[#allocation40_spill] sm:$0xff] %v4271_v25  ;;  %v2482_v7 = vrot.slane %v2481_v49, 4  ;;  %v2496_v11 = vrot.slane %v2495_v59, 4  ;;  %v1088_v63 = vpop.f32.mrb[45].mxu0  ;;  %v2423_v57 = vrot.slane %v2422_v39, 1  ;;  %v1874_v8 = vmul.f32 %v1076_v61, %v3917_v54 }
 0x18c   :  { %5449 = vst [vmem:[#allocation41_spill] sm:$0xff] %v4273_v23  ;;  %5450 = vst [vmem:[#allocation42_spill] sm:$0xff] %v4275_v22  ;;  %v2437_v27 = vrot.slane %v2436_v13, 1  ;;  %v2476_v20 = vadd.f32 %v2475_v21, %v2474_v19  ;;  %v2490_v36 = vadd.f32 %v2489_v51, %v2488_v60  ;;  %v1279_v48 = vpop.f32.mrb[44].mxu1  ;;  %v1090_v43 = vpop.f32.mrb[46].mxu0  ;;  %v2430_v30 = vrot.slane %v2429_v5, 1 }
 0x18d   :  { %v2444_v28 = vrot.slane %v2443_v44, 1  ;;  %v2483_v62 = vadd.f32 %v2482_v7, %v2481_v49  ;;  %v2497_v18 = vadd.f32 %v2496_v11, %v2495_v59  ;;  %v1281_v2 = vpop.f32.mrb[45].mxu1  ;;  %v1092_v15 = vpop.f32.mrb[47].mxu0  ;;  %v1876_v47 = vmul.f32 %v1269_v17, %v3919_v55 }
 0x18e   :  { %v2477_v12 = vrot.slane %v2476_v20, 2  ;;  %v2491_v53 = vrot.slane %v2490_v36, 2  ;;  %v1283_v6 = vpop.f32.mrb[46].mxu1  ;;  %v1875_v45 = vmul.f32 %v1078_v24, %v3939_v16  ;;  %v1877_v51 = vmul.f32 %v1271_v46, %v3946_v26 }
 0x18f   :  { %v2484_v1 = vrot.slane %v2483_v62, 2  ;;  %v2498_v38 = vrot.slane %v2497_v18, 2  ;;  %v1285_v9 = vpop.f32.mrb[47].mxu1  ;;  %v1882_v59 = vmul.f32 %v1080_v0, %v3954_v33  ;;  %v1884_v49 = vmul.f32 %v1273_v34, %v3958_v29 }
 0x190   :  { %v2478_v56 = vadd.f32 %v2477_v12, %v2476_v20  ;;  %v2492_v19 = vadd.f32 %v2491_v53, %v2490_v36  ;;  %v1883_v61 = vmul.f32 %v1082_v52, %v3960_v40  ;;  %v1885_v17 = vmul.f32 %v1275_v10, %v3965_v42 }
 0x191   :  { %v2485_v60 = vadd.f32 %v2484_v1, %v2483_v62  ;;  %v2499_v21 = vadd.f32 %v2498_v38, %v2497_v18  ;;  %v4285_v7 = vadd.f32 %v2423_v57, %v2422_v39  ;;  %v4287_v11 = vadd.f32 %v2437_v27, %v2436_v13 }
 0x192   :  { %v2530_v24 = vadd.f32 %v1882_v59, %v1874_v8  ;;  %v2544_v22 = vadd.f32 %v1884_v49, %v1876_v47  ;;  %v4289_v46 = vpop.f32.mrb[48].mxu0  ;;  %v4291_v20 = vadd.f32 %v2430_v30, %v2429_v5  ;;  %v4293_v36 = vadd.f32 %v2444_v28, %v2443_v44 }
 0x193   :  { %5451 = vst [vmem:[#allocation43_spill] sm:$0xff] %v4285_v7  ;;  %5452 = vst [vmem:[#allocation44_spill] sm:$0xff] %v4287_v11  ;;  %v2537_v0 = vadd.f32 %v1883_v61, %v1875_v45  ;;  %v2551_v34 = vadd.f32 %v1885_v17, %v1877_v51  ;;  %v4295_v62 = vpop.f32.mrb[49].mxu0  ;;  %v2479_v18 = vrot.slane %v2478_v56, 1  ;;  %v2493_v52 = vrot.slane %v2492_v19, 1 }
 0x194   :  { %5453 = vst [vmem:[#allocation45_spill] sm:$0xff] %v4291_v20  ;;  %5454 = vst [vmem:[#allocation46_spill] sm:$0xff] %v4293_v36  ;;  %v2531_v12 = vrot.slane %v2530_v24, 4  ;;  %v2545_v10 = vrot.slane %v2544_v22, 4  ;;  %v1289_v39 = vpop.f32.mrb[48].mxu1  ;;  %v4297_v57 = vpop.f32.mrb[50].mxu0  ;;  %v1890_v28 = vmul.f32 %v1086_v37, %v3917_v54  ;;  %v1892_v1 = vmul.f32 %v1279_v48, %v3919_v55 }
 0x195   :  { %v2486_v13 = vrot.slane %v2485_v60, 1  ;;  %v2500_v27 = vrot.slane %v2499_v21, 1  ;;  %v2538_v53 = vrot.slane %v2537_v0, 4  ;;  %v2552_v8 = vrot.slane %v2551_v34, 4  ;;  %v1291_v47 = vpop.f32.mrb[49].mxu1  ;;  %v4299_v5 = vpop.f32.mrb[51].mxu0 }
 0x196   :  { %v2532_v44 = vadd.f32 %v2531_v12, %v2530_v24  ;;  %v2546_v30 = vadd.f32 %v2545_v10, %v2544_v22  ;;  %v1293_v38 = vpop.f32.mrb[50].mxu1  ;;  %v1891_v59 = vmul.f32 %v1088_v63, %v3939_v16  ;;  %v1893_v49 = vmul.f32 %v1281_v2, %v3946_v26 }
 0x197   :  { %v2539_v45 = vadd.f32 %v2538_v53, %v2537_v0  ;;  %v2553_v51 = vadd.f32 %v2552_v8, %v2551_v34  ;;  %v1295_v61 = vpop.f32.mrb[51].mxu1  ;;  %v1898_v20 = vmul.f32 %v1090_v43, %v3954_v33  ;;  %v1900_v11 = vmul.f32 %v1283_v6, %v3958_v29 }
 0x198   :  { %v2533_v17 = vrot.slane %v2532_v44, 2  ;;  %v2547_v36 = vrot.slane %v2546_v30, 2  ;;  %v1899_v37 = vmul.f32 %v1092_v15, %v3960_v40  ;;  %v1901_v48 = vmul.f32 %v1285_v9, %v3965_v42 }
 0x199   :  { %v2540_v24 = vrot.slane %v2539_v45, 2  ;;  %v2554_v22 = vrot.slane %v2553_v51, 2  ;;  %v2586_v34 = vadd.f32 %v1898_v20, %v1890_v28  ;;  %v2600_v10 = vadd.f32 %v1900_v11, %v1892_v1 }
 0x19a   :  { %v2534_v12 = vadd.f32 %v2533_v17, %v2532_v44  ;;  %v2548_v0 = vadd.f32 %v2547_v36, %v2546_v30  ;;  %v4309_v63 = vpop.f32.mrb[52].mxu0  ;;  %v2593_v8 = vadd.f32 %v1899_v37, %v1891_v59  ;;  %v2607_v7 = vadd.f32 %v1901_v48, %v1893_v49 }
 0x19b   :  { %v2541_v2 = vadd.f32 %v2540_v24, %v2539_v45  ;;  %v2555_v53 = vadd.f32 %v2554_v22, %v2553_v51  ;;  %v4311_v23 = vpop.f32.mrb[53].mxu0  ;;  %v4313_v43 = vadd.f32 %v2479_v18, %v2478_v56  ;;  %v4315_v6 = vadd.f32 %v2493_v52, %v2492_v19 }
 0x19c   :  { %v2587_v25 = vrot.slane %v2586_v34, 4  ;;  %v2601_v15 = vrot.slane %v2600_v10, 4  ;;  %v1299_v31 = vpop.f32.mrb[52].mxu1  ;;  %v4317_v9 = vpop.f32.mrb[54].mxu0  ;;  %v4319_v36 = vadd.f32 %v2486_v13, %v2485_v60  ;;  %v4321_v11 = vadd.f32 %v2500_v27, %v2499_v21 }
 0x19d   :  { %5455 = vst [vmem:[#allocation47_spill] sm:$0xff] %v4313_v43  ;;  %5456 = vst [vmem:[#allocation48_spill] sm:$0xff] %v4315_v6  ;;  %v2594_v20 = vrot.slane %v2593_v8, 4  ;;  %v2608_v44 = vrot.slane %v2607_v7, 4  ;;  %v1301_v30 = vpop.f32.mrb[53].mxu1  ;;  %v4323_v28 = vpop.f32.mrb[55].mxu0  ;;  %v1906_v21 = vmul.f32 %v4289_v46, %v3917_v54  ;;  %v1908_v13 = vmul.f32 %v1289_v39, %v3919_v55 }
 0x19e   :  { %5457 = vst [vmem:[#allocation49_spill] sm:$0xff] %v4319_v36  ;;  %5458 = vst [vmem:[#allocation50_spill] sm:$0xff] %v4321_v11  ;;  %v2535_v1 = vrot.slane %v2534_v12, 1  ;;  %v2549_v45 = vrot.slane %v2548_v0, 1  ;;  %v2588_v56 = vadd.f32 %v2587_v25, %v2586_v34  ;;  %v2602_v18 = vadd.f32 %v2601_v15, %v2600_v10  ;;  %v1303_v19 = vpop.f32.mrb[54].mxu1 }
 0x19f   :  { %v2542_v52 = vrot.slane %v2541_v2, 1  ;;  %v2556_v51 = vrot.slane %v2555_v53, 1  ;;  %v2595_v59 = vadd.f32 %v2594_v20, %v2593_v8  ;;  %v2609_v49 = vadd.f32 %v2608_v44, %v2607_v7  ;;  %v1305_v17 = vpop.f32.mrb[55].mxu1 }
 0x1a0   :  { %v2589_v24 = vrot.slane %v2588_v56, 2  ;;  %v2603_v60 = vrot.slane %v2602_v18, 2  ;;  %v1907_v37 = vmul.f32 %v4295_v62, %v3939_v16  ;;  %v1909_v25 = vmul.f32 %v1291_v47, %v3946_v26 }
 0x1a1   :  { %v2596_v27 = vrot.slane %v2595_v59, 2  ;;  %v2610_v22 = vrot.slane %v2609_v49, 2  ;;  %v1914_v7 = vmul.f32 %v4297_v57, %v3954_v33  ;;  %v1916_v10 = vmul.f32 %v1293_v38, %v3958_v29 }
 0x1a2   :  { %v2590_v48 = vadd.f32 %v2589_v24, %v2588_v56  ;;  %v2604_v34 = vadd.f32 %v2603_v60, %v2602_v18  ;;  %v4334_v8 = vpop.f32.mrb[56].mxu0  ;;  %v1915_v39 = vmul.f32 %v4299_v5, %v3960_v40  ;;  %v1917_v20 = vmul.f32 %v1295_v61, %v3965_v42 }
 0x1a3   :  { %v2597_v15 = vadd.f32 %v2596_v27, %v2595_v59  ;;  %v2611_v46 = vadd.f32 %v2610_v22, %v2609_v49  ;;  %v4339_v44 = vpop.f32.mrb[57].mxu0  ;;  %v4341_v62 = vadd.f32 %v2535_v1, %v2534_v12  ;;  %v4343_v47 = vadd.f32 %v2549_v45, %v2548_v0 }
 0x1a4   :  { %v2642_v56 = vadd.f32 %v1914_v7, %v1906_v21  ;;  %v2656_v18 = vadd.f32 %v1916_v10, %v1908_v13  ;;  %v4345_v57 = vpop.f32.mrb[56].mxu1  ;;  %v4347_v38 = vpop.f32.mrb[58].mxu0  ;;  %v4349_v24 = vadd.f32 %v2542_v52, %v2541_v2  ;;  %v4351_v59 = vadd.f32 %v2556_v51, %v2555_v53 }
 0x1a5   :  { %5459 = vst [vmem:[#allocation51_spill] sm:$0xff] %v4341_v62  ;;  %5460 = vst [vmem:[#allocation52_spill] sm:$0xff] %v4343_v47  ;;  %v2649_v49 = vadd.f32 %v1915_v39, %v1907_v37  ;;  %v2663_v5 = vadd.f32 %v1917_v20, %v1909_v25  ;;  %v4353_v60 = vpop.f32.mrb[57].mxu1  ;;  %v4355_v61 = vpop.f32.mrb[59].mxu0  ;;  %v2591_v12 = vrot.slane %v2590_v48, 1  ;;  %v2605_v1 = vrot.slane %v2604_v34, 1 }
 0x1a6   :  { %5461 = vst [vmem:[#allocation53_spill] sm:$0xff] %v4349_v24  ;;  %5462 = vst [vmem:[#allocation54_spill] sm:$0xff] %v4351_v59  ;;  %v2643_v0 = vrot.slane %v2642_v56, 4  ;;  %v2657_v45 = vrot.slane %v2656_v18, 4  ;;  %v4357_v21 = vpop.f32.mrb[58].mxu1  ;;  %v2598_v13 = vrot.slane %v2597_v15, 1  ;;  %v1922_v51 = vmul.f32 %v4309_v63, %v3917_v54 }
 0x1a7   :  { %v2612_v27 = vrot.slane %v2611_v46, 1  ;;  %v2650_v22 = vrot.slane %v2649_v49, 4  ;;  %v2664_v7 = vrot.slane %v2663_v5, 4  ;;  %v4359_v2 = vpop.f32.mrb[59].mxu1  ;;  %v1924_v37 = vmul.f32 %v1299_v31, %v3919_v55 }
 0x1a8   :  { %v2644_v53 = vadd.f32 %v2643_v0, %v2642_v56  ;;  %v2658_v52 = vadd.f32 %v2657_v45, %v2656_v18  ;;  %v1923_v39 = vmul.f32 %v4311_v23, %v3939_v16  ;;  %v1925_v20 = vmul.f32 %v1301_v30, %v3946_v26 }
 0x1a9   :  { %v2651_v25 = vadd.f32 %v2650_v22, %v2649_v49  ;;  %v2665_v10 = vadd.f32 %v2664_v7, %v2663_v5  ;;  %v1930_v47 = vmul.f32 %v4317_v9, %v3954_v33  ;;  %v1932_v56 = vmul.f32 %v1303_v19, %v3958_v29 }
 0x1aa   :  { %v2645_v59 = vrot.slane %v2644_v53, 2  ;;  %v2659_v24 = vrot.slane %v2658_v52, 2  ;;  %v4370_v18 = vpop.f32.mrb[60].mxu0  ;;  %v1931_v31 = vmul.f32 %v4323_v28, %v3960_v40  ;;  %v1933_v49 = vmul.f32 %v1305_v17, %v3965_v42 }
 0x1ab   :  { %v2652_v0 = vrot.slane %v2651_v25, 2  ;;  %v2666_v63 = vrot.slane %v2665_v10, 2  ;;  %v4375_v5 = vpop.f32.mrb[61].mxu0  ;;  %v2698_v45 = vadd.f32 %v1930_v47, %v1922_v51  ;;  %v2712_v22 = vadd.f32 %v1932_v56, %v1924_v37 }
 0x1ac   :  { %v2646_v23 = vadd.f32 %v2645_v59, %v2644_v53  ;;  %v2660_v30 = vadd.f32 %v2659_v24, %v2658_v52  ;;  %v4377_v7 = vpop.f32.mrb[60].mxu1  ;;  %v4379_v9 = vpop.f32.mrb[62].mxu0  ;;  %v2705_v11 = vadd.f32 %v1931_v31, %v1923_v39  ;;  %v2719_v36 = vadd.f32 %v1933_v49, %v1925_v20 }
 0x1ad   :  { %v2653_v19 = vadd.f32 %v2652_v0, %v2651_v25  ;;  %v2667_v62 = vadd.f32 %v2666_v63, %v2665_v10  ;;  %v4381_v6 = vpop.f32.mrb[61].mxu1  ;;  %v4383_v43 = vpop.f32.mrb[63].mxu0  ;;  %v4385_v28 = vadd.f32 %v2591_v12, %v2590_v48  ;;  %v4387_v17 = vadd.f32 %v2605_v1, %v2604_v34 }
 0x1ae   :  { %v2699_v59 = vrot.slane %v2698_v45, 4  ;;  %v2713_v24 = vrot.slane %v2712_v22, 4  ;;  %v4389_v47 = vpop.f32.mrb[62].mxu1  ;;  %v4391_v53 = vadd.f32 %v2598_v13, %v2597_v15  ;;  %v4393_v52 = vadd.f32 %v2612_v27, %v2611_v46 }
 0x1af   :  { %5463 = vst [vmem:[#allocation55_spill] sm:$0xff] %v4385_v28  ;;  %5464 = vst [vmem:[#allocation56_spill] sm:$0xff] %v4387_v17  ;;  %v2706_v51 = vrot.slane %v2705_v11, 4  ;;  %v2720_v37 = vrot.slane %v2719_v36, 4  ;;  %v4395_v25 = vpop.f32.mrb[63].mxu1  ;;  %v2647_v10 = vrot.slane %v2646_v23, 1  ;;  %v1938_v15 = vmul.f32 %v4334_v8, %v3917_v54 }
 0x1b0   :  { %5465 = vst [vmem:[#allocation57_spill] sm:$0xff] %v4391_v53  ;;  %5466 = vst [vmem:[#allocation58_spill] sm:$0xff] %v4393_v52  ;;  %v2661_v39 = vrot.slane %v2660_v30, 1  ;;  %v2700_v20 = vadd.f32 %v2699_v59, %v2698_v45  ;;  %v2714_v56 = vadd.f32 %v2713_v24, %v2712_v22  ;;  %v2654_v48 = vrot.slane %v2653_v19, 1  ;;  %v5492_v17 = vld [vmem:[#allocation6_spill] sm:$0xff] }
 0x1b1   :  { %v2668_v12 = vrot.slane %v2667_v62, 1  ;;  %v2707_v34 = vadd.f32 %v2706_v51, %v2705_v11  ;;  %v2721_v1 = vadd.f32 %v2720_v37, %v2719_v36  ;;  %v1940_v46 = vmul.f32 %v4345_v57, %v3919_v55 }
 0x1b2   :  { %v2701_v0 = vrot.slane %v2700_v20, 2  ;;  %v2715_v63 = vrot.slane %v2714_v56, 2  ;;  %v4401_v13 = vpop.f32.mrb[64].mxu0  ;;  %v1939_v49 = vmul.f32 %v4339_v44, %v3939_v16  ;;  %v1941_v45 = vmul.f32 %v4353_v60, %v3946_v26 }
 0x1b3   :  { %v2708_v27 = vrot.slane %v2707_v34, 2  ;;  %v2722_v31 = vrot.slane %v2721_v1, 2  ;;  %v4407_v11 = vpop.f32.mrb[65].mxu0  ;;  %v1946_v8 = vmul.f32 %v4347_v38, %v3954_v33  ;;  %v1948_v57 = vmul.f32 %v4357_v21, %v3958_v29 }
 0x1b4   :  { %v4409_v36 = vadd.f32 %v2701_v0, %v2700_v20  ;;  %v4411_v22 = vadd.f32 %v2715_v63, %v2714_v56  ;;  %v4417_v59 = vpop.f32.mrb[64].mxu1  ;;  %v4419_v24 = vpop.f32.mrb[66].mxu0  ;;  %v1947_v60 = vmul.f32 %v4355_v61, %v3960_v40  ;;  %v1949_v37 = vmul.f32 %v4359_v2, %v3965_v42 }
 0x1b5   :  { %v2709_v44 = vadd.f32 %v2708_v27, %v2707_v34  ;;  %v2723_v51 = vadd.f32 %v2722_v31, %v2721_v1  ;;  %v4425_v20 = vpop.f32.mrb[65].mxu1  ;;  %v4427_v56 = vpop.f32.mrb[67].mxu0  ;;  %v4429_v38 = vadd.f32 %v2647_v10, %v2646_v23  ;;  %v4431_v0 = vadd.f32 %v2661_v39, %v2660_v30 }
 0x1b6   :  { %v2754_v21 = vadd.f32 %v1946_v8, %v1938_v15  ;;  %v2768_v63 = vadd.f32 %v1948_v57, %v1940_v46  ;;  %v4433_v52 = vpop.f32.mrb[66].mxu1  ;;  %v4435_v34 = vadd.f32 %v2654_v48, %v2653_v19  ;;  %v4437_v1 = vadd.f32 %v2668_v12, %v2667_v62 }
 0x1b7   :  { %5467 = vst [vmem:[#allocation59_spill] sm:$0xff] %v4429_v38  ;;  %5468 = vst [vmem:[#allocation60_spill] sm:$0xff] %v4431_v0  ;;  %v2761_v61 = vadd.f32 %v1947_v60, %v1939_v49  ;;  %v2775_v27 = vadd.f32 %v1949_v37, %v1941_v45  ;;  %v4439_v31 = vpop.f32.mrb[67].mxu1  ;;  %v2703_v2 = vrot.slane %v4409_v36, 1  ;;  %v2717_v53 = vrot.slane %v4411_v22, 1 }
 0x1b8   :  { %5469 = vst [vmem:[#allocation61_spill] sm:$0xff] %v4435_v34  ;;  %5470 = vst [vmem:[#allocation62_spill] sm:$0xff] %v4437_v1  ;;  %v2755_v23 = vrot.slane %v2754_v21, 4  ;;  %v2769_v10 = vrot.slane %v2768_v63, 4  ;;  %v2710_v30 = vrot.slane %v2709_v44, 1  ;;  %v2724_v39 = vrot.slane %v2723_v51, 1 }
 0x1b9   :  { %v2762_v15 = vrot.slane %v2761_v61, 4  ;;  %v2776_v46 = vrot.slane %v2775_v27, 4  ;;  %vm644_vm13 = vcmp.eq.s32.totalorder %v3684_v58, %v4115_v32  ;;  %v1954_v48 = vmul.f32 %v4370_v18, %v3917_v54 }
 0x1ba   :  { %v2756_v19 = vadd.f32 %v2755_v23, %v2754_v21  ;;  %v2770_v62 = vadd.f32 %v2769_v10, %v2768_v63  ;;  %v1956_v12 = vmul.f32 %v4377_v7, %v3919_v55  ;;  %v4449_v49 = vpop.f32.mrb[68].mxu0  ;;  %v1955_v57 = vmul.f32 %v4375_v5, %v3939_v16 }
 0x1bb   :  { %v2763_v45 = vadd.f32 %v2762_v15, %v2761_v61  ;;  %v2777_v8 = vadd.f32 %v2776_v46, %v2775_v27  ;;  %v1957_v60 = vmul.f32 %v4381_v6, %v3946_v26  ;;  %v4455_v37 = vpop.f32.mrb[69].mxu0  ;;  %v1962_v54 = vmul.f32 %v4379_v9, %v3954_v33 }
 0x1bc   :  { %v2757_v21 = vrot.slane %v2756_v19, 2  ;;  %v2771_v63 = vrot.slane %v2770_v62, 2  ;;  %v1964_v55 = vmul.f32 %v4389_v47, %v3958_v29  ;;  %v4461_v18 = vpop.f32.mrb[68].mxu1  ;;  %v4463_v7 = vpop.f32.mrb[70].mxu0  ;;  %v1963_v16 = vmul.f32 %v4383_v43, %v3960_v40 }
 0x1bd   :  { %v2764_v61 = vrot.slane %v2763_v45, 2  ;;  %v2778_v27 = vrot.slane %v2777_v8, 2  ;;  %v1965_v26 = vmul.f32 %v4395_v25, %v3965_v42  ;;  %v4469_v6 = vpop.f32.mrb[69].mxu1  ;;  %v4471_v5 = vpop.f32.mrb[71].mxu0  ;;  %v2810_v23 = vadd.f32 %v1962_v54, %v1954_v48 }
 0x1be   :  { %v2758_v33 = vadd.f32 %v2757_v21, %v2756_v19  ;;  %v2772_v9 = vadd.f32 %v2771_v63, %v2770_v62  ;;  %v2824_v29 = vadd.f32 %v1964_v55, %v1956_v12  ;;  %v4473_v47 = vpop.f32.mrb[70].mxu1  ;;  %v2817_v46 = vadd.f32 %v1963_v16, %v1955_v57 }
 0x1bf   :  { %v2765_v10 = vadd.f32 %v2764_v61, %v2763_v45  ;;  %v2779_v15 = vadd.f32 %v2778_v27, %v2777_v8  ;;  %v2831_v1 = vadd.f32 %v1965_v26, %v1957_v60  ;;  %v4475_v34 = vpop.f32.mrb[71].mxu1  ;;  %v4478_v40 = vadd.f32 %v2703_v2, %v4409_v36 }
 0x1c0   :  { %v4481_v42 = vadd.f32 %v2717_v53, %v4411_v22  ;;  %v2811_v43 = vrot.slane %v2810_v23, 4  ;;  %v2825_v25 = vrot.slane %v2824_v29, 4  ;;  %v4483_v19 = vadd.f32 %v2710_v30, %v2709_v44 }
 0x1c1   :  { %5471 = vst [vmem:[#allocation63_spill] sm:$0xff] %v4478_v40  ;;  %v4485_v62 = vadd.f32 %v2724_v39, %v2723_v51  ;;  %v2818_v48 = vrot.slane %v2817_v46, 4  ;;  %v2832_v12 = vrot.slane %v2831_v1, 4  ;;  %v2759_v45 = vrot.slane %v2758_v33, 1 }
 0x1c2   :  { %5472 = vst [vmem:[#allocation64_spill] sm:$0xff] %v4481_v42  ;;  %5473 = vst [vmem:[#allocation65_spill] sm:$0xff] %v4483_v19  ;;  %v2773_v8 = vrot.slane %v2772_v9, 1  ;;  %v2812_v57 = vadd.f32 %v2811_v43, %v2810_v23  ;;  %v2826_v60 = vadd.f32 %v2825_v25, %v2824_v29  ;;  %v4487_v21 = vpop.f32.mrb[72].mxu0  ;;  %v2766_v63 = vrot.slane %v2765_v10, 1  ;;  %v5475_v43 = vld [vmem:[#allocation9_spill] sm:$0xff] }
 0x1c3   :  { %5474 = vst [vmem:[#allocation66_spill] sm:$0xff] %v4485_v62  ;;  %v2780_v36 = vrot.slane %v2779_v15, 1  ;;  %v2819_v2 = vadd.f32 %v2818_v48, %v2817_v46  ;;  %v2833_v54 = vadd.f32 %v2832_v12, %v2831_v1  ;;  %v4489_v53 = vpop.f32.mrb[73].mxu0  ;;  %v673_v44 = vsel %vm644_vm13, %v4119_v41, 0.0  ;;  %v5478_v42 = vld [vmem:[#allocation10_spill] sm:$0xff] }
 0x1c4   :  { %v2813_v22 = vrot.slane %v2812_v57, 2  ;;  %v2827_v55 = vrot.slane %v2826_v60, 2  ;;  %v4497_v51 = vrot.slane %v4111_v35, %v3693_v3  ;;  %v4499_v30 = vpop.f32.mrb[72].mxu1  ;;  %v4501_v39 = vpop.f32.mrb[74].mxu0  ;;  %v4505_v1 = vrot.slane %v4072_v50, %v3693_v3 }
 0x1c5   :  { %v2820_v61 = vrot.slane %v2819_v2, 2  ;;  %v2834_v27 = vrot.slane %v2833_v54, 2  ;;  %v4509_v16 = vrot.slane %v4107_v14, %v3693_v3  ;;  %v4511_v26 = vpop.f32.mrb[73].mxu1  ;;  %v4513_v23 = vpop.f32.mrb[75].mxu0  ;;  %v4519_v25 = vrot.slane %v5475_v43, %v3696_v4 }
 0x1c6   :  { %v2814_v29 = vadd.f32 %v2813_v22, %v2812_v57  ;;  %v2828_v46 = vadd.f32 %v2827_v55, %v2826_v60  ;;  %vm697_vm0 = vcmp.eq.s32.totalorder %v3684_v58, %v4497_v51  ;;  %v4521_v48 = vpop.f32.mrb[74].mxu1  ;;  %v4530_v40 = vrot.slane %v5478_v42, %v3696_v4 }
 0x1c7   :  { %v4523_v12 = vadd.f32 %v2820_v61, %v2819_v2  ;;  %v4525_v62 = vadd.f32 %v2834_v27, %v2833_v54  ;;  %v726_v19 = vsel %vm697_vm0, %v4505_v1, 0.0  ;;  %v4532_v57 = vpop.f32.mrb[75].mxu1  ;;  %v4534_v60 = vadd.f32 %v2759_v45, %v2758_v33 }
 0x1c8   :  { %5479 = vst [vmem:[#allocation10_spill] sm:$0xff] %v4532_v57  ;;  %v2815_v22 = vrot.slane %v2814_v29, 1  ;;  %v734_v55 = vadd.f32 %v726_v19, %v673_v44  ;;  %vm646_vm5 = vcmp.eq.s32.totalorder %v3684_v58, %v4519_v25  ;;  %v4538_v0 = vadd.f32 %v2773_v8, %v2772_v9  ;;  %v5487_v44 = vld [vmem:[#allocation5_spill] sm:$0xff] }
 0x1c9   :  { %5476 = vst [vmem:[#allocation9_spill] sm:$0xff] %v4523_v12  ;;  %5477 = vst [vmem:[#allocation67_spill] sm:$0xff] %v4525_v62  ;;  %v4540_v2 = vadd.f32 %v2766_v63, %v2765_v10  ;;  %v4542_v54 = vadd.f32 %v2780_v36, %v2779_v15  ;;  %v4546_v61 = vrot.slane %v4111_v35, %v3696_v4  ;;  %v2829_v27 = vrot.slane %v2828_v46, 1 }
 0x1ca   :  { %5480 = vst [vmem:[#allocation68_spill] sm:$0xff] %v4534_v60  ;;  %5481 = vst [vmem:[#allocation69_spill] sm:$0xff] %v4538_v0  ;;  %v4549_v38 = vmul.f32 %v4509_v16, %v734_v55  ;;  %v675_v33 = vsel %vm646_vm5, %v4530_v40, 0.0  ;;  %v717_v19 = vrot.slane %v4072_v50, %v3696_v4  ;;  %v4554_v45 = vpop.f32.mrb[76].mxu0  ;;  %v4562_v15 = vrot.slane %v4107_v14, %v3696_v4 }
 0x1cb   :  { %5482 = vst [vmem:[#allocation70_spill] sm:$0xff] %v4540_v2  ;;  %5483 = vst [vmem:[#allocation71_spill] sm:$0xff] %v4542_v54  ;;  %vm699_vm7 = vcmp.eq.s32.totalorder %v3684_v58, %v4546_v61  ;;  %v4564_v8 = vpop.f32.mrb[77].mxu0  ;;  %v4566_v63 = vadd.f32 %v2815_v22, %v2814_v29  ;;  %v635_v55 = vrot.slane %v5475_v43, %v5487_v44  ;;  %vm3210_vm13 = vcmask 1041409  }
 0x1cc   :  { %5484 = vst [vmem:[#allocation72_spill] sm:$0xff] %v4554_v45  ;;  %5485 = vst [vmem:[#allocation73_spill] sm:$0xff] %v4564_v8  ;;  %v728_v36 = vsel %vm699_vm7, %v717_v19, 0.0  ;;  %v660_v9 = vrot.slane %v5478_v42, %v5487_v44  ;;  %v4572_v54 = vpop.f32.mrb[76].mxu1  ;;  %v4574_v10 = vpop.f32.mrb[78].mxu0  ;;  %v688_v0 = vrot.slane %v4111_v35, %v5487_v44  ;;  %v713_v60 = vrot.slane %v4072_v50, %v5487_v44  ;;  %v5496_v45 = vld [vmem:[#allocation7_spill] sm:$0xff] }
 0x1cd   :  { %5486 = vst [vmem:[#allocation74_spill] sm:$0xff] %v4566_v63  ;;  %5488 = vst [vmem:[#allocation5_spill] sm:$0xff] %v4572_v54  ;;  %v736_v2 = vadd.f32 %v728_v36, %v675_v33  ;;  %v750_v29 = vrot.slane %v4107_v14, %v5487_v44  ;;  %v4582_v22 = vpop.f32.mrb[77].mxu1  ;;  %v4584_v63 = vpop.f32.mrb[79].mxu0  ;;  %vm645_vm8 = vcmp.eq.s32.totalorder %v3684_v58, %v635_v55  ;;  %vm3213_vm0 = vcmask 1042434  }
 0x1ce   :  { %5489 = vst [vmem:[#allocation75_spill] sm:$0xff] %v4574_v10  ;;  %5490 = vst [vmem:[#allocation76_spill] sm:$0xff] %v4582_v22  ;;  %v643_v28 = vrot.slane %v5475_v43, %v5492_v17  ;;  %v668_v33 = vrot.slane %v5478_v42, %v5492_v17  ;;  %v696_v36 = vrot.slane %v4111_v35, %v5492_v17  ;;  %v4593_v62 = vpop.f32.mrb[78].mxu1  ;;  %v674_v10 = vsel %vm645_vm8, %v660_v9, 0.0 }
 0x1cf   :  { %5491 = vst [vmem:[#allocation77_spill] sm:$0xff] %v4584_v63  ;;  %5493 = vst [vmem:[#allocation6_spill] sm:$0xff] %v4593_v62  ;;  %v4596_v12 = vmul.f32 %v4562_v15, %v736_v2  ;;  %vm698_vm9 = vcmp.eq.s32.totalorder %v3684_v58, %v688_v0  ;;  %v721_v63 = vrot.slane %v4072_v50, %v5492_v17  ;;  %v4601_v22 = vpop.f32.mrb[79].mxu1  ;;  %v5497_v50 = vld [vmem:[#allocation8_spill] sm:$0xff]  ;;  %vm3216_vm5 = vcmask 1043459  }
 0x1d0   :  { %5494 = vst [vmem:[#allocation78_spill] sm:$0xff] %v4601_v22  ;;  %v727_v43 = vsel %vm698_vm9, %v713_v60, 0.0  ;;  %vm647_vm10 = vcmp.eq.s32.totalorder %v3684_v58, %v643_v28  ;;  %vm700_vm11 = vcmp.eq.s32.totalorder %v3684_v58, %v696_v36  ;;  %v758_v35 = vrot.slane %v4107_v14, %v5492_v17 }
 0x1d1   :  { %v4607_v42 = vadd.f32 %v2829_v27, %v2828_v46  ;;  %v735_v2 = vadd.f32 %v727_v43, %v674_v10  ;;  %v676_v62 = vsel %vm647_vm10, %v668_v33, 0.0  ;;  %v729_v8 = vsel %vm700_vm11, %v721_v63, 0.0 }
 0x1d2   :  { %v737_v54 = vadd.f32 %v729_v8, %v676_v62  ;;  %vm648_vm12 = vcmp.eq.s32.totalorder %v5496_v45, %v4115_v32  ;;  %vm701_vm14 = vcmp.eq.s32.totalorder %v5496_v45, %v4497_v51  ;;  %v771_v22 = vadd.f32 %v4107_v14, %v5497_v50  ;;  %v4615_v57 = vpop.f32.mrb[80].mxu0 }
 0x1d3   :  { %5495 = vst [vmem:[#allocation79_spill] sm:$0xff] %v4607_v42  ;;  %v4617_v58 = vmul.f32 %v750_v29, %v735_v2  ;;  %v677_v46 = vsel %vm648_vm12, %v4119_v41, 0.0  ;;  %v730_v27 = vsel %vm701_vm14, %v4505_v1, 0.0  ;;  %vm650_vm15 = vcmp.eq.s32.totalorder %v5496_v45, %v4519_v25  ;;  %v4623_v62 = vpop.f32.mrb[81].mxu0 }
 0x1d4   :  { %v4625_v32 = vmul.f32 %v758_v35, %v737_v54  ;;  %v738_v10 = vadd.f32 %v730_v27, %v677_v46  ;;  %v2930_v51 = vadd.f32 1e-06, %v771_v22  ;;  %v679_v8 = vsel %vm650_vm15, %v4530_v40, 0.0  ;;  %v4628_v14 = vpop.f32.mrb[80].mxu1  ;;  %v4630_v43 = vpop.f32.mrb[82].mxu0 }
 0x1d5   :  { %v1718_v41 = vmul.f32 %v4401_v13, %v4549_v38  ;;  %vm703_vm1 = vcmp.eq.s32.totalorder %v5496_v45, %v4546_v61  ;;  %vm649_vm2 = vcmp.eq.s32.totalorder %v5496_v45, %v635_v55  ;;  %vm702_vm3 = vcmp.eq.s32.totalorder %v5496_v45, %v688_v0  ;;  %v4638_v1 = vpop.f32.mrb[81].mxu1  ;;  %v4640_v25 = vpop.f32.mrb[83].mxu0 }
 0x1d6   :  { %v1720_v40 = vmul.f32 %v4417_v59, %v4596_v12  ;;  %v4645_v54 = vmul.f32 %v4509_v16, %v738_v10  ;;  %3520 = vrcp.f32 %v2930_v51  ;;  %v732_v22 = vsel %vm703_vm1, %v717_v19, 0.0  ;;  %v4647_v13 = vpop.f32.mrb[82].mxu1 }
 0x1d7   :  { %v740_v2 = vadd.f32 %v732_v22, %v679_v8  ;;  %v678_v61 = vsel %vm649_vm2, %v660_v9, 0.0  ;;  %v731_v50 = vsel %vm702_vm3, %v713_v60, 0.0  ;;  %vm651_vm6 = vcmp.eq.s32.totalorder %v5496_v45, %v643_v28  ;;  %v4650_v0 = vpop.f32.mrb[83].mxu1 }
 0x1d8   :  { %v1726_v55 = vmul.f32 %v4419_v24, %v4645_v54  ;;  %v739_v46 = vadd.f32 %v731_v50, %v678_v61  ;;  %v680_v27 = vsel %vm651_vm6, %v668_v33, 0.0  ;;  %vm704_vm4 = vcmp.eq.s32.totalorder %v5496_v45, %v696_v36 }
 0x1d9   :  { %v1719_v59 = vmul.f32 %v4407_v11, %v4617_v58  ;;  %v1721_v16 = vmul.f32 %v4425_v20, %v4625_v32  ;;  %v4660_v19 = vmul.f32 %v4562_v15, %v740_v2  ;;  %v733_v60 = vsel %vm704_vm4, %v721_v63, 0.0 }
 0x1da   :  { %v1998_v28 = vadd.f32 %v1726_v55, %v1718_v41  ;;  %v4662_v9 = vmul.f32 %v750_v29, %v739_v46  ;;  %v741_v10 = vadd.f32 %v733_v60, %v680_v27  ;;  %v1734_v24 = vmul.f32 %v4449_v49, %v4549_v38  ;;  %v4666_v33 = vpop.f32.mrb[84].mxu0 }
 0x1db   :  { %v1728_v45 = vmul.f32 %v4433_v52, %v4660_v19  ;;  %v1736_v11 = vmul.f32 %v4461_v18, %v4596_v12  ;;  %v1735_v20 = vmul.f32 %v4455_v37, %v4617_v58  ;;  %v1742_v15 = vmul.f32 %v4463_v7, %v4645_v54  ;;  %v4676_v63 = vpop.f32.mrb[85].mxu0 }
 0x1dc   :  { %v1999_v29 = vrot.slane %v1998_v28, 4  ;;  %v1727_v49 = vmul.f32 %v4427_v56, %v4662_v9  ;;  %v4680_v36 = vmul.f32 %v758_v35, %v741_v10  ;;  %v1744_v52 = vmul.f32 %v4473_v47, %v4660_v19  ;;  %v4684_v51 = vpop.f32.mrb[84].mxu1  ;;  %v4686_v18 = vpop.f32.mrb[86].mxu0 }
 0x1dd   :  { %v2012_v8 = vadd.f32 %v1728_v45, %v1720_v40  ;;  %v1737_v37 = vmul.f32 %v4469_v6, %v4625_v32  ;;  %v2054_v7 = vadd.f32 %v1742_v15, %v1734_v24  ;;  %v1743_v41 = vmul.f32 %v4471_v5, %v4662_v9  ;;  %v4692_v22 = vpop.f32.mrb[85].mxu1  ;;  %v4694_v56 = vpop.f32.mrb[87].mxu0 }
 0x1de   :  { %5498 = vst [vmem:[#allocation7_spill] sm:$0xff] %v4694_v56  ;;  %v2000_v35 = vadd.f32 %v1999_v29, %v1998_v28  ;;  %v2005_v2 = vadd.f32 %v1727_v49, %v1719_v59  ;;  %v1729_v47 = vmul.f32 %v4439_v31, %v4680_v36  ;;  %v2068_v61 = vadd.f32 %v1744_v52, %v1736_v11  ;;  %v4698_v50 = vpop.f32.mrb[86].mxu1 }
 0x1df   :  { %v2013_v40 = vrot.slane %v2012_v8, 4  ;;  %v2055_v55 = vrot.slane %v2054_v7, 4  ;;  %v2061_v46 = vadd.f32 %v1743_v41, %v1735_v20  ;;  %v1745_v6 = vmul.f32 %v4475_v34, %v4680_v36  ;;  %v4702_v27 = vpop.f32.mrb[87].mxu1 }
 0x1e0   :  { %5499 = vst [vmem:[#allocation8_spill] sm:$0xff] %v4702_v27  ;;  %v3521_v5 = vpop.eup %3520  ;;  %v2001_v60 = vrot.slane %v2000_v35, 2  ;;  %v2006_v10 = vrot.slane %v2005_v2, 4  ;;  %v2019_v24 = vadd.f32 %v1729_v47, %v1721_v16  ;;  %v2069_v28 = vrot.slane %v2068_v61, 4 }
 0x1e1   :  { %v4705_v59 = vrot.slane %v3521_v5, %v3693_v3  ;;  %v2014_v31 = vadd.f32 %v2013_v40, %v2012_v8  ;;  %v4708_v45 = vrot.slane %v3521_v5, %v3696_v4  ;;  %v4711_v11 = vrot.slane %v3521_v5, %v5487_v44 }
 0x1e2   :  { %v2002_v20 = vadd.f32 %v2001_v60, %v2000_v35  ;;  %v2007_v15 = vadd.f32 %v2006_v10, %v2005_v2  ;;  %v2020_v34 = vrot.slane %v2019_v24, 4  ;;  %v4714_v29 = vrot.slane %v3521_v5, %v5492_v17  ;;  %v4716_v49 = vpop.f32.mrb[88].mxu0 }
 0x1e3   :  { %5500 = vst [vmem:[#allocation80_spill] sm:$0xff] %v4716_v49  ;;  %v2015_v16 = vrot.slane %v2014_v31, 2  ;;  %v2056_v52 = vadd.f32 %v2055_v55, %v2054_v7  ;;  %v2070_v41 = vadd.f32 %v2069_v28, %v2068_v61  ;;  %v2062_v3 = vrot.slane %v2061_v46, 4  ;;  %v4718_v47 = vpop.f32.mrb[89].mxu0 }
 0x1e4   :  { %5501 = vst [vmem:[#allocation81_spill] sm:$0xff] %v4718_v47  ;;  %v2003_v8 = vrot.slane %v2002_v20, 1  ;;  %v2008_v4 = vrot.slane %v2007_v15, 2  ;;  %v2021_v40 = vadd.f32 %v2020_v34, %v2019_v24  ;;  %v2075_v42 = vadd.f32 %v1745_v6, %v1737_v37  ;;  %v4720_v44 = vpop.f32.mrb[88].mxu1  ;;  %v4722_v35 = vpop.f32.mrb[90].mxu0 }
 0x1e5   :  { %5502 = vst [vmem:[#allocation82_spill] sm:$0xff] %v4720_v44  ;;  %5503 = vst [vmem:[#allocation83_spill] sm:$0xff] %v4722_v35  ;;  %v2016_v2 = vadd.f32 %v2015_v16, %v2014_v31  ;;  %v2057_v60 = vrot.slane %v2056_v52, 2  ;;  %v2071_v17 = vrot.slane %v2070_v41, 2  ;;  %v2063_v5 = vadd.f32 %v2062_v3, %v2061_v46  ;;  %v4724_v10 = vpop.f32.mrb[89].mxu1  ;;  %v4726_v49 = vpop.f32.mrb[91].mxu0 }
 0x1e6   :  { %5504 = vst [vmem:[#allocation84_spill] sm:$0xff] %v4724_v10  ;;  %5505 = vst [vmem:[#allocation85_spill] sm:$0xff] %v4726_v49  ;;  %v2004_v7 = vadd.f32 %v2003_v8, %v2002_v20  ;;  %v2009_v61 = vadd.f32 %v2008_v4, %v2007_v15  ;;  %v2022_v55 = vrot.slane %v2021_v40, 2  ;;  %v2076_v28 = vrot.slane %v2075_v42, 4  ;;  %v4728_v47 = vpop.f32.mrb[90].mxu1  ;;  %v5508_v31 = vld [vmem:[#allocation11_spill] sm:$0xff] }
 0x1e7   :  { %5506 = vst [vmem:[#allocation86_spill] sm:$0xff] %v4728_v47  ;;  %v2017_v24 = vrot.slane %v2016_v2, 1  ;;  %v2058_v37 = vadd.f32 %v2057_v60, %v2056_v52  ;;  %v2072_v6 = vadd.f32 %v2071_v17, %v2070_v41  ;;  %v2064_v34 = vrot.slane %v2063_v5, 2  ;;  %v4730_v44 = vpop.f32.mrb[91].mxu1  ;;  %v5509_v52 = vld [vmem:[#allocation13_spill] sm:$0xff] }
 0x1e8   :  { %5507 = vst [vmem:[#allocation87_spill] sm:$0xff] %v4730_v44  ;;  %v2866_v16 = vadd.f32 %v2004_v7, %v5508_v31  ;;  %v2010_v35 = vrot.slane %v2009_v61, 1  ;;  %v2023_v46 = vadd.f32 %v2022_v55, %v2021_v40  ;;  %v2077_v3 = vadd.f32 %v2076_v28, %v2075_v42  ;;  %v5510_v42 = vld [vmem:[#allocation12_spill] sm:$0xff]  ;;  %v5513_v31 = vld [vmem:[#allocation17_spill] sm:$0xff] }
 0x1e9   :  { %v2018_v10 = vadd.f32 %v2017_v24, %v2016_v2  ;;  %v2059_v27 = vrot.slane %v2058_v37, 1  ;;  %v2073_v49 = vrot.slane %v2072_v6, 1  ;;  %v2065_v20 = vadd.f32 %v2064_v34, %v2063_v5 }
 0x1ea   :  { %v2953_v15 = vmul.f32 %v4705_v59, %v2866_v16  ;;  %v2011_v8 = vadd.f32 %v2010_v35, %v2009_v61  ;;  %v2024_v4 = vrot.slane %v2023_v46, 1  ;;  %v2078_v47 = vrot.slane %v2077_v3, 2  ;;  %v4734_v56 = vpop.f32.mrb[92].mxu0  ;;  %v5512_v61 = vld [vmem:[#allocation15_spill] sm:$0xff]  ;;  %v5516_v16 = vld [vmem:[#allocation14_spill] sm:$0xff] }
 0x1eb   :  { %v2868_v41 = vadd.f32 %v2018_v10, %v5509_v52  ;;  %v2060_v60 = vadd.f32 %v2059_v27, %v2058_v37  ;;  %v2074_v17 = vadd.f32 %v2073_v49, %v2072_v6  ;;  %v2066_v44 = vrot.slane %v2065_v20, 1  ;;  %v4737_v7 = vpop.f32.mrb[93].mxu0  ;;  %v5518_v52 = vld [vmem:[#allocation16_spill] sm:$0xff] }
 0x1ec   :  { %v3017_v40 = vmax.f32 %v2953_v15, 0.0  ;;  %v2867_v2 = vadd.f32 %v2011_v8, %v5510_v42  ;;  %v2025_v55 = vadd.f32 %v2024_v4, %v2023_v46  ;;  %v2079_v28 = vadd.f32 %v2078_v47, %v2077_v3  ;;  %v4740_v5 = vpop.f32.mrb[92].mxu1  ;;  %v4742_v24 = vpop.f32.mrb[94].mxu0 }
 0x1ed   :  { %5511 = vst [vmem:[#allocation11_spill] sm:$0xff] %v4742_v24  ;;  %v2955_v35 = vmul.f32 %v4708_v45, %v2868_v41  ;;  %v2870_v34 = vadd.f32 %v2060_v60, %v5512_v61  ;;  %v2872_v10 = vadd.f32 %v2074_v17, %v5513_v31  ;;  %v2067_v27 = vadd.f32 %v2066_v44, %v2065_v20  ;;  %v4747_v49 = vpop.f32.mrb[93].mxu1  ;;  %v4749_v37 = vpop.f32.mrb[95].mxu0 }
 0x1ee   :  { %5514 = vst [vmem:[#allocation13_spill] sm:$0xff] %v4747_v49  ;;  %5515 = vst [vmem:[#allocation12_spill] sm:$0xff] %v4749_v37  ;;  %v2954_v6 = vmul.f32 %v4711_v11, %v2867_v2  ;;  %v2869_v46 = vadd.f32 %v2025_v55, %v5516_v16  ;;  %v2080_v47 = vrot.slane %v2079_v28, 1  ;;  %v4753_v3 = vpop.f32.mrb[94].mxu1  ;;  %v1750_v42 = vmul.f32 %v4487_v21, %v4549_v38  ;;  %v5520_v16 = vld [vmem:[#allocation18_spill] sm:$0xff] }
 0x1ef   :  { %5517 = vst [vmem:[#allocation15_spill] sm:$0xff] %v4753_v3  ;;  %v3019_v15 = vmax.f32 %v2955_v35, 0.0  ;;  %v2957_v8 = vmul.f32 %v4705_v59, %v2870_v34  ;;  %v2959_v4 = vmul.f32 %v4708_v45, %v2872_v10  ;;  %v2871_v41 = vadd.f32 %v2067_v27, %v5518_v52  ;;  %v4758_v44 = vpop.f32.mrb[95].mxu1 }
 0x1f0   :  { %5519 = vst [vmem:[#allocation17_spill] sm:$0xff] %v4758_v44  ;;  %v3018_v20 = vmax.f32 %v2954_v6, 0.0  ;;  %v2956_v60 = vmul.f32 %v4714_v29, %v2869_v46  ;;  %v2081_v17 = vadd.f32 %v2080_v47, %v2079_v28  ;;  %v3081_v2 = vmin.f32 %v3017_v40, 1.0 }
 0x1f1   :  { %v3021_v55 = vmax.f32 %v2957_v8, 0.0  ;;  %v3023_v61 = vmax.f32 %v2959_v4, 0.0  ;;  %v2958_v35 = vmul.f32 %v4711_v11, %v2871_v41  ;;  %v3083_v31 = vmin.f32 %v3019_v15, 1.0 }
 0x1f2   :  { %v3082_v34 = vmin.f32 %v3018_v20, 1.0  ;;  %v2873_v10 = vadd.f32 %v2081_v17, %v5520_v16  ;;  %v1752_v27 = vmul.f32 %v4499_v30, %v4596_v12  ;;  %v4767_v52 = vpop.f32.mrb[96].mxu0  ;;  %v3020_v6 = vmax.f32 %v2956_v60, 0.0 }
 0x1f3   :  { %5521 = vst [vmem:[#allocation14_spill] sm:$0xff] %v4767_v52  ;;  %v3085_v46 = vmin.f32 %v3021_v55, 1.0  ;;  %v3087_v28 = vmin.f32 %v3023_v61, 1.0  ;;  %v3022_v47 = vmax.f32 %v2958_v35, 0.0  ;;  %v4769_v44 = vpop.f32.mrb[97].mxu0  ;;  %v1751_v40 = vmul.f32 %v4489_v53, %v4617_v58 }
 0x1f4   :  { %5522 = vst [vmem:[#allocation16_spill] sm:$0xff] %v4769_v44  ;;  %v2960_v21 = vmul.f32 %v4714_v29, %v2873_v10  ;;  %v1753_v15 = vmul.f32 %v4511_v26, %v4625_v32  ;;  %v1758_v8 = vmul.f32 %v4501_v39, %v4645_v54  ;;  %v4778_v30 = vpop.f32.mrb[96].mxu1  ;;  %v4780_v4 = vpop.f32.mrb[98].mxu0  ;;  %v1760_v17 = vmul.f32 %v4521_v48, %v4660_v19  ;;  %v5527_v39 = vld [vmem:[#allocation10_spill] sm:$0xff] }
 0x1f5   :  { %5523 = vst [vmem:[#allocation18_spill] sm:$0xff] %v4778_v30  ;;  %5524 = vst [vmem:[#allocation88_spill] sm:$0xff] %v4780_v4  ;;  %v3209_v41 = vrot.slane %v3085_v46, 7  ;;  %v3244_v20 = vrot.slane %v3087_v28, 7  ;;  %v3086_v60 = vmin.f32 %v3022_v47, 1.0  ;;  %v4784_v55 = vpop.f32.mrb[97].mxu1  ;;  %v1759_v26 = vmul.f32 %v4513_v23, %v4662_v9 }
 0x1f6   :  { %5525 = vst [vmem:[#allocation89_spill] sm:$0xff] %v4784_v55  ;;  %v4786_v61 = vpop.f32.mrb[99].mxu0  ;;  %v3024_v53 = vmax.f32 %v2960_v21, 0.0  ;;  %v2110_v35 = vadd.f32 %v1758_v8, %v1750_v42  ;;  %v1761_v16 = vmul.f32 %v5527_v39, %v4680_v36  ;;  %v4792_v10 = vpop.f32.mrb[98].mxu1  ;;  %v2124_v47 = vadd.f32 %v1760_v17, %v1752_v27  ;;  %v5532_v17 = vld [vmem:[#allocation5_spill] sm:$0xff] }
 0x1f7   :  { %5526 = vst [vmem:[#allocation90_spill] sm:$0xff] %v4786_v61  ;;  %5528 = vst [vmem:[#allocation10_spill] sm:$0xff] %v4792_v10  ;;  %v4795_v46 = vsel %vm3210_vm13, %v3209_v41, %v3081_v2  ;;  %v4798_v28 = vsel %vm3210_vm13, %v3244_v20, %v3083_v31  ;;  %v3230_v48 = vrot.slane %v3086_v60, 7  ;;  %v4800_v4 = vpop.f32.mrb[99].mxu1  ;;  %v2117_v8 = vadd.f32 %v1759_v26, %v1751_v40  ;;  %v5530_v10 = vld [vmem:[#allocation72_spill] sm:$0xff]  ;;  %v5533_v40 = vld [vmem:[#allocation73_spill] sm:$0xff] }
 0x1f8   :  { %5529 = vst [vmem:[#allocation91_spill] sm:$0xff] %v4800_v4  ;;  %v3088_v21 = vmin.f32 %v3024_v53, 1.0  ;;  %v2111_v42 = vrot.slane %v2110_v35, 4  ;;  %v2131_v61 = vadd.f32 %v1761_v16, %v1753_v15  ;;  %v3084_v23 = vmin.f32 %v3020_v6, 1.0 }
 0x1f9   :  { %v4803_v55 = vsel %vm3210_vm13, %v3230_v48, %v3082_v34  ;;  %v2125_v39 = vrot.slane %v2124_v47, 4  ;;  %v1766_v2 = vmul.f32 %v5530_v10, %v4549_v38  ;;  %v2118_v31 = vrot.slane %v2117_v8, 4  ;;  %v5534_v34 = vld [vmem:[#allocation75_spill] sm:$0xff] }
 0x1fa   :  { %v3258_v41 = vrot.slane %v3088_v21, 7  ;;  %v2112_v44 = vadd.f32 %v2111_v42, %v2110_v35  ;;  %v2132_v20 = vrot.slane %v2131_v61, 4  ;;  %v4807_v60 = vpop.f32.mrb[100].mxu0  ;;  %v1768_v53 = vmul.f32 %v5532_v17, %v4596_v12 }
 0x1fb   :  { %5531 = vst [vmem:[#allocation72_spill] sm:$0xff] %v4807_v60  ;;  %v2126_v27 = vadd.f32 %v2125_v39, %v2124_v47  ;;  %v1767_v6 = vmul.f32 %v5533_v40, %v4617_v58  ;;  %v1774_v15 = vmul.f32 %v5534_v34, %v4645_v54  ;;  %v4815_v26 = vpop.f32.mrb[101].mxu0  ;;  %v2119_v10 = vadd.f32 %v2118_v31, %v2117_v8  ;;  %v5538_v39 = vld [vmem:[#allocation76_spill] sm:$0xff]  ;;  %v5539_v60 = vld [vmem:[#allocation6_spill] sm:$0xff] }
 0x1fc   :  { %5535 = vst [vmem:[#allocation5_spill] sm:$0xff] %v4815_v26  ;;  %v4818_v16 = vsel %vm3210_vm13, %v3258_v41, %v3084_v23  ;;  %v2113_v35 = vrot.slane %v2112_v44, 2  ;;  %v2133_v48 = vadd.f32 %v2132_v20, %v2131_v61  ;;  %v4820_v21 = vpop.f32.mrb[100].mxu1  ;;  %v4822_v47 = vpop.f32.mrb[102].mxu0  ;;  %v1769_v17 = vmul.f32 %v5538_v39, %v4625_v32  ;;  %v5542_v61 = vld [vmem:[#allocation77_spill] sm:$0xff] }
 0x1fd   :  { %5536 = vst [vmem:[#allocation73_spill] sm:$0xff] %v4820_v21  ;;  %5537 = vst [vmem:[#allocation75_spill] sm:$0xff] %v4822_v47  ;;  %v2127_v42 = vrot.slane %v2126_v27, 2  ;;  %v2166_v40 = vadd.f32 %v1774_v15, %v1766_v2  ;;  %v1776_v34 = vmul.f32 %v5539_v60, %v4660_v19  ;;  %v4828_v4 = vpop.f32.mrb[101].mxu1  ;;  %v4830_v26 = vpop.f32.mrb[103].mxu0  ;;  %v2120_v41 = vrot.slane %v2119_v10, 2 }
 0x1fe   :  { %5540 = vst [vmem:[#allocation76_spill] sm:$0xff] %v4828_v4  ;;  %5541 = vst [vmem:[#allocation6_spill] sm:$0xff] %v4830_v26  ;;  %v2114_v23 = vadd.f32 %v2113_v35, %v2112_v44  ;;  %v2134_v8 = vrot.slane %v2133_v48, 2  ;;  %v1775_v31 = vmul.f32 %v5542_v61, %v4662_v9  ;;  %v4834_v20 = vpop.f32.mrb[102].mxu1  ;;  %v5544_v2 = vld [vmem:[#allocation78_spill] sm:$0xff]  ;;  %vm3219_vm7 = vcmask 1044484  }
 0x1ff   :  { %5543 = vst [vmem:[#allocation77_spill] sm:$0xff] %v4834_v20  ;;  %v2128_v47 = vadd.f32 %v2127_v42, %v2126_v27  ;;  %v2167_v21 = vrot.slane %v2166_v40, 4  ;;  %v2180_v30 = vadd.f32 %v1776_v34, %v1768_v53  ;;  %v1777_v15 = vmul.f32 %v5544_v2, %v4680_v36  ;;  %v4838_v39 = vpop.f32.mrb[103].mxu1 }
 0x200   :  { %5545 = vst [vmem:[#allocation78_spill] sm:$0xff] %v4838_v39  ;;  %v2115_v60 = vrot.slane %v2114_v23, 1  ;;  %v2121_v4 = vadd.f32 %v2120_v41, %v2119_v10  ;;  %v2135_v52 = vadd.f32 %v2134_v8, %v2133_v48  ;;  %v2173_v26 = vadd.f32 %v1775_v31, %v1767_v6  ;;  %v5547_v10 = vld [vmem:[#allocation19_spill] sm:$0xff] }
 0x201   :  { %v2129_v44 = vrot.slane %v2128_v47, 1  ;;  %v2168_v35 = vadd.f32 %v2167_v21, %v2166_v40  ;;  %v2181_v37 = vrot.slane %v2180_v30, 4  ;;  %v2187_v3 = vadd.f32 %v1777_v15, %v1769_v17 }
 0x202   :  { %v2116_v24 = vadd.f32 %v2115_v60, %v2114_v23  ;;  %v2122_v61 = vrot.slane %v2121_v4, 1  ;;  %v2136_v49 = vrot.slane %v2135_v52, 1  ;;  %v2174_v20 = vrot.slane %v2173_v26, 4  ;;  %v4840_v27 = vpop.f32.mrb[104].mxu0  ;;  %v5549_v23 = vld [vmem:[#allocation20_spill] sm:$0xff] }
 0x203   :  { %v2130_v53 = vadd.f32 %v2129_v44, %v2128_v47  ;;  %v2169_v42 = vrot.slane %v2168_v35, 2  ;;  %v2182_v34 = vadd.f32 %v2181_v37, %v2180_v30  ;;  %v2188_v2 = vrot.slane %v2187_v3, 4  ;;  %v4842_v39 = vpop.f32.mrb[105].mxu0  ;;  %v5552_v44 = vld [vmem:[#allocation21_spill] sm:$0xff] }
 0x204   :  { %5546 = vst [vmem:[#allocation92_spill] sm:$0xff] %v4842_v39  ;;  %v2874_v48 = vadd.f32 %v2116_v24, %v5547_v10  ;;  %v2123_v6 = vadd.f32 %v2122_v61, %v2121_v4  ;;  %v2137_v41 = vadd.f32 %v2136_v49, %v2135_v52  ;;  %v2175_v21 = vadd.f32 %v2174_v20, %v2173_v26  ;;  %v4845_v40 = vpop.f32.mrb[104].mxu1  ;;  %v4847_v17 = vpop.f32.mrb[106].mxu0  ;;  %v5553_v4 = vld [vmem:[#allocation22_spill] sm:$0xff] }
 0x205   :  { %5548 = vst [vmem:[#allocation19_spill] sm:$0xff] %v4847_v17  ;;  %v2876_v8 = vadd.f32 %v2130_v53, %v5549_v23  ;;  %v2170_v31 = vadd.f32 %v2169_v42, %v2168_v35  ;;  %v2183_v15 = vrot.slane %v2182_v34, 2  ;;  %v2189_v60 = vadd.f32 %v2188_v2, %v2187_v3  ;;  %v4850_v47 = vpop.f32.mrb[105].mxu1  ;;  %v4852_v37 = vpop.f32.mrb[107].mxu0 }
 0x206   :  { %5550 = vst [vmem:[#allocation20_spill] sm:$0xff] %v4850_v47  ;;  %5551 = vst [vmem:[#allocation93_spill] sm:$0xff] %v4852_v37  ;;  %v2961_v30 = vmul.f32 %v4705_v59, %v2874_v48  ;;  %v2875_v24 = vadd.f32 %v2123_v6, %v5552_v44  ;;  %v2877_v49 = vadd.f32 %v2137_v41, %v5553_v4  ;;  %v2176_v52 = vrot.slane %v2175_v21, 2  ;;  %v4857_v26 = vpop.f32.mrb[106].mxu1 }
 0x207   :  { %5554 = vst [vmem:[#allocation21_spill] sm:$0xff] %v4857_v26  ;;  %v2963_v20 = vmul.f32 %v4708_v45, %v2876_v8  ;;  %v2171_v61 = vrot.slane %v2170_v31, 1  ;;  %v2184_v53 = vadd.f32 %v2183_v15, %v2182_v34  ;;  %v2190_v35 = vrot.slane %v2189_v60, 2  ;;  %v4860_v42 = vpop.f32.mrb[107].mxu1  ;;  %v5556_v15 = vld [vmem:[#allocation23_spill] sm:$0xff] }
 0x208   :  { %5555 = vst [vmem:[#allocation22_spill] sm:$0xff] %v4860_v42  ;;  %v3025_v3 = vmax.f32 %v2961_v30, 0.0  ;;  %v2962_v2 = vmul.f32 %v4711_v11, %v2875_v24  ;;  %v2964_v10 = vmul.f32 %v4714_v29, %v2877_v49  ;;  %v2177_v48 = vadd.f32 %v2176_v52, %v2175_v21 }
 0x209   :  { %v3027_v23 = vmax.f32 %v2963_v20, 0.0  ;;  %v2172_v6 = vadd.f32 %v2171_v61, %v2170_v31  ;;  %v2185_v44 = vrot.slane %v2184_v53, 1  ;;  %v2191_v41 = vadd.f32 %v2190_v35, %v2189_v60  ;;  %v5557_v35 = vld [vmem:[#allocation24_spill] sm:$0xff] }
 0x20a   :  { %v3089_v4 = vmin.f32 %v3025_v3, 1.0  ;;  %v3026_v37 = vmax.f32 %v2962_v2, 0.0  ;;  %v3028_v26 = vmax.f32 %v2964_v10, 0.0  ;;  %v2178_v17 = vrot.slane %v2177_v48, 1  ;;  %v4864_v8 = vpop.f32.mrb[108].mxu0 }
 0x20b   :  { %v3091_v34 = vmin.f32 %v3027_v23, 1.0  ;;  %v2878_v47 = vadd.f32 %v2172_v6, %v5556_v15  ;;  %v2186_v42 = vadd.f32 %v2185_v44, %v2184_v53  ;;  %v2192_v30 = vrot.slane %v2191_v41, 1  ;;  %v4867_v39 = vpop.f32.mrb[109].mxu0 }
 0x20c   :  { %v3212_v24 = vrot.slane %v3089_v4, 6  ;;  %v3090_v49 = vmin.f32 %v3026_v37, 1.0  ;;  %v3092_v21 = vmin.f32 %v3028_v26, 1.0  ;;  %v2179_v52 = vadd.f32 %v2178_v17, %v2177_v48  ;;  %v4869_v31 = vpop.f32.mrb[108].mxu1  ;;  %v4871_v60 = vpop.f32.mrb[110].mxu0  ;;  %v5558_v17 = vld [vmem:[#allocation25_spill] sm:$0xff] }
 0x20d   :  { %v3246_v20 = vrot.slane %v3091_v34, 6  ;;  %v2965_v61 = vmul.f32 %v4705_v59, %v2878_v47  ;;  %v2880_v3 = vadd.f32 %v2186_v42, %v5557_v35  ;;  %v2193_v2 = vadd.f32 %v2192_v30, %v2191_v41  ;;  %v4875_v10 = vpop.f32.mrb[109].mxu1  ;;  %v4877_v53 = vpop.f32.mrb[111].mxu0  ;;  %v5559_v41 = vld [vmem:[#allocation26_spill] sm:$0xff] }
 0x20e   :  { %v3214_v23 = vsel %vm3213_vm0, %v3212_v24, %v4795_v46  ;;  %v3232_v37 = vrot.slane %v3090_v49, 6  ;;  %v3260_v26 = vrot.slane %v3092_v21, 6  ;;  %v2879_v48 = vadd.f32 %v2179_v52, %v5558_v17  ;;  %v4882_v6 = vpop.f32.mrb[110].mxu1 }
 0x20f   :  { %v3247_v44 = vsel %vm3213_vm0, %v3246_v20, %v4798_v28  ;;  %v3029_v47 = vmax.f32 %v2965_v61, 0.0  ;;  %v2967_v42 = vmul.f32 %v4708_v45, %v2880_v3  ;;  %v2881_v4 = vadd.f32 %v2193_v2, %v5559_v41  ;;  %v4888_v34 = vpop.f32.mrb[111].mxu1 }
 0x210   :  { %v3233_v15 = vsel %vm3213_vm0, %v3232_v37, %v4803_v55  ;;  %v3261_v46 = vsel %vm3213_vm0, %v3260_v26, %v4818_v16  ;;  %v2966_v30 = vmul.f32 %v4711_v11, %v2879_v48  ;;  %v1782_v21 = vmul.f32 %v4615_v57, %v4549_v38 }
 0x211   :  { %v3093_v24 = vmin.f32 %v3029_v47, 1.0  ;;  %v3031_v49 = vmax.f32 %v2967_v42, 0.0  ;;  %v2968_v28 = vmul.f32 %v4714_v29, %v2881_v4  ;;  %v1784_v20 = vmul.f32 %v4628_v14, %v4596_v12 }
 0x212   :  { %v3030_v52 = vmax.f32 %v2966_v30, 0.0  ;;  %v1783_v55 = vmul.f32 %v4623_v62, %v4617_v58  ;;  %v1790_v16 = vmul.f32 %v4630_v43, %v4645_v54  ;;  %v4904_v61 = vpop.f32.mrb[112].mxu0  ;;  %v1785_v37 = vmul.f32 %v4638_v1, %v4625_v32 }
 0x213   :  { %v3215_v35 = vrot.slane %v3093_v24, 5  ;;  %v3095_v3 = vmin.f32 %v3031_v49, 1.0  ;;  %v3032_v2 = vmax.f32 %v2968_v28, 0.0  ;;  %v4908_v26 = vpop.f32.mrb[113].mxu0  ;;  %v1792_v14 = vmul.f32 %v4647_v13, %v4660_v19 }
 0x214   :  { %v3094_v57 = vmin.f32 %v3030_v52, 1.0  ;;  %v2222_v17 = vadd.f32 %v1790_v16, %v1782_v21  ;;  %v1791_v62 = vmul.f32 %v4640_v25, %v4662_v9  ;;  %v4914_v48 = vpop.f32.mrb[112].mxu1  ;;  %v4916_v43 = vpop.f32.mrb[114].mxu0  ;;  %v1793_v1 = vmul.f32 %v4650_v0, %v4680_v36  ;;  %v5564_v21 = vld [vmem:[#allocation9_spill] sm:$0xff] }
 0x215   :  { %5560 = vst [vmem:[#allocation23_spill] sm:$0xff] %v4916_v43  ;;  %v4919_v47 = vsel %vm3216_vm5, %v3215_v35, %v3214_v23  ;;  %v3248_v42 = vrot.slane %v3095_v3, 5  ;;  %v3096_v41 = vmin.f32 %v3032_v2, 1.0  ;;  %v4923_v4 = vpop.f32.mrb[113].mxu1  ;;  %v4925_v30 = vpop.f32.mrb[115].mxu0  ;;  %v2236_v49 = vadd.f32 %v1792_v14, %v1784_v20 }
 0x216   :  { %5561 = vst [vmem:[#allocation24_spill] sm:$0xff] %v4923_v4  ;;  %5562 = vst [vmem:[#allocation25_spill] sm:$0xff] %v4925_v30  ;;  %v3234_v13 = vrot.slane %v3094_v57, 5  ;;  %v2223_v24 = vrot.slane %v2222_v17, 4  ;;  %v2229_v25 = vadd.f32 %v1791_v62, %v1783_v55  ;;  %v4927_v28 = vpop.f32.mrb[114].mxu1  ;;  %v5565_v52 = vrot.slane %v5564_v21, 1 }
 0x217   :  { %5563 = vst [vmem:[#allocation26_spill] sm:$0xff] %v4927_v28  ;;  %v4935_v16 = vsel %vm3216_vm5, %v3248_v42, %v3247_v44  ;;  %v3262_v35 = vrot.slane %v3096_v41, 5  ;;  %v2243_v0 = vadd.f32 %v1793_v1, %v1785_v37  ;;  %v4937_v3 = vpop.f32.mrb[115].mxu1  ;;  %v2237_v20 = vrot.slane %v2236_v49, 4 }
 0x218   :  { %v4932_v23 = vadd.f32 %v5565_v52, %v5564_v21  ;;  %5567 = vst [vmem:[#allocation94_spill] sm:$0xff] %v4937_v3  ;;  %v4940_v2 = vsel %vm3216_vm5, %v3234_v13, %v3233_v15  ;;  %v2224_v57 = vadd.f32 %v2223_v24, %v2222_v17  ;;  %v2230_v55 = vrot.slane %v2229_v25, 4  ;;  %v5570_v52 = vld [vmem:[#allocation7_spill] sm:$0xff] }
 0x219   :  { %v4943_v14 = vsel %vm3216_vm5, %v3262_v35, %v3261_v46  ;;  %v2244_v62 = vrot.slane %v2243_v0, 4  ;;  %v1798_v21 = vmul.f32 %v4666_v33, %v4549_v38  ;;  %v1800_v44 = vmul.f32 %v4684_v51, %v4596_v12 }
 0x21a   :  { %5566 = vst [vmem:[#allocation9_spill] sm:$0xff] %v4932_v23  ;;  %v2225_v42 = vrot.slane %v2224_v57, 2  ;;  %v2238_v37 = vadd.f32 %v2237_v20, %v2236_v49  ;;  %v2231_v41 = vadd.f32 %v2230_v55, %v2229_v25  ;;  %v1799_v15 = vmul.f32 %v4676_v63, %v4617_v58  ;;  %v4951_v1 = vpop.f32.mrb[116].mxu0 }
 0x21b   :  { %5568 = vst [vmem:[#allocation95_spill] sm:$0xff] %v4951_v1  ;;  %v2245_v17 = vadd.f32 %v2244_v62, %v2243_v0  ;;  %v1801_v46 = vmul.f32 %v4692_v22, %v4625_v32  ;;  %v1806_v13 = vmul.f32 %v4686_v18, %v4645_v54  ;;  %v1808_v33 = vmul.f32 %v4698_v50, %v4660_v19  ;;  %v4959_v24 = vpop.f32.mrb[117].mxu0  ;;  %v5573_v18 = vld [vmem:[#allocation8_spill] sm:$0xff] }
 0x21c   :  { %5569 = vst [vmem:[#allocation96_spill] sm:$0xff] %v4959_v24  ;;  %v2226_v51 = vadd.f32 %v2225_v42, %v2224_v57  ;;  %v2239_v49 = vrot.slane %v2238_v37, 2  ;;  %v2232_v25 = vrot.slane %v2231_v41, 2  ;;  %v1807_v63 = vmul.f32 %v5570_v52, %v4662_v9  ;;  %v4963_v35 = vpop.f32.mrb[116].mxu1  ;;  %v4965_v0 = vpop.f32.mrb[118].mxu0 }
 0x21d   :  { %5571 = vst [vmem:[#allocation7_spill] sm:$0xff] %v4963_v35  ;;  %5572 = vst [vmem:[#allocation97_spill] sm:$0xff] %v4965_v0  ;;  %v2246_v20 = vrot.slane %v2245_v17, 2  ;;  %v2278_v22 = vadd.f32 %v1806_v13, %v1798_v21  ;;  %v2292_v55 = vadd.f32 %v1808_v33, %v1800_v44  ;;  %v1809_v62 = vmul.f32 %v5573_v18, %v4680_v36  ;;  %v4969_v23 = vpop.f32.mrb[117].mxu1  ;;  %v4971_v50 = vpop.f32.mrb[119].mxu0 }
 0x21e   :  { %5574 = vst [vmem:[#allocation8_spill] sm:$0xff] %v4969_v23  ;;  %5575 = vst [vmem:[#allocation98_spill] sm:$0xff] %v4971_v50  ;;  %v2227_v57 = vrot.slane %v2226_v51, 1  ;;  %v2240_v42 = vadd.f32 %v2239_v49, %v2238_v37  ;;  %v2233_v24 = vadd.f32 %v2232_v25, %v2231_v41  ;;  %v2285_v1 = vadd.f32 %v1807_v63, %v1799_v15  ;;  %v4973_v3 = vpop.f32.mrb[118].mxu1  ;;  %v5578_v37 = vld [vmem:[#allocation27_spill] sm:$0xff] }
 0x21f   :  { %5576 = vst [vmem:[#allocation99_spill] sm:$0xff] %v4973_v3  ;;  %v2247_v52 = vadd.f32 %v2246_v20, %v2245_v17  ;;  %v2279_v35 = vrot.slane %v2278_v22, 4  ;;  %v2293_v30 = vrot.slane %v2292_v55, 4  ;;  %v2299_v0 = vadd.f32 %v1809_v62, %v1801_v46  ;;  %v4975_v28 = vpop.f32.mrb[119].mxu1  ;;  %v5580_v3 = vld [vmem:[#allocation29_spill] sm:$0xff] }
 0x220   :  { %5577 = vst [vmem:[#allocation100_spill] sm:$0xff] %v4975_v28  ;;  %v2228_v21 = vadd.f32 %v2227_v57, %v2226_v51  ;;  %v2241_v44 = vrot.slane %v2240_v42, 1  ;;  %v2234_v13 = vrot.slane %v2233_v24, 1  ;;  %v2286_v33 = vrot.slane %v2285_v1, 4  ;;  %v5579_v57 = vld [vmem:[#allocation28_spill] sm:$0xff] }
 0x221   :  { %v2248_v18 = vrot.slane %v2247_v52, 1  ;;  %v2280_v23 = vadd.f32 %v2279_v35, %v2278_v22  ;;  %v2294_v50 = vadd.f32 %v2293_v30, %v2292_v55  ;;  %v2300_v43 = vrot.slane %v2299_v0, 4  ;;  %v5582_v55 = vld [vmem:[#allocation30_spill] sm:$0xff] }
 0x222   :  { %v2882_v41 = vadd.f32 %v2228_v21, %v5578_v37  ;;  %v2242_v15 = vadd.f32 %v2241_v44, %v2240_v42  ;;  %v2235_v49 = vadd.f32 %v2234_v13, %v2233_v24  ;;  %v2287_v25 = vadd.f32 %v2286_v33, %v2285_v1  ;;  %v4978_v17 = vpop.f32.mrb[120].mxu0 }
 0x223   :  { %v2249_v63 = vadd.f32 %v2248_v18, %v2247_v52  ;;  %v2281_v46 = vrot.slane %v2280_v23, 2  ;;  %v2295_v20 = vrot.slane %v2294_v50, 2  ;;  %v2301_v62 = vadd.f32 %v2300_v43, %v2299_v0  ;;  %v4985_v22 = vpop.f32.mrb[121].mxu0 }
 0x224   :  { %v2969_v51 = vmul.f32 %v4705_v59, %v2882_v41  ;;  %v2884_v28 = vadd.f32 %v2242_v15, %v5579_v57  ;;  %v2883_v4 = vadd.f32 %v2235_v49, %v5580_v3  ;;  %v2288_v35 = vrot.slane %v2287_v25, 2  ;;  %v4983_v30 = vpop.f32.mrb[120].mxu1  ;;  %5581 = vst [vmem:[#allocation27_spill] sm:$0xff] %v4985_v22  ;;  %v4990_v44 = vpop.f32.mrb[122].mxu0 }
 0x225   :  { %v2885_v24 = vadd.f32 %v2249_v63, %v5582_v55  ;;  %v2282_v1 = vadd.f32 %v2281_v46, %v2280_v23  ;;  %v2296_v42 = vadd.f32 %v2295_v20, %v2294_v50  ;;  %v2302_v21 = vrot.slane %v2301_v62, 2  ;;  %v4988_v52 = vpop.f32.mrb[121].mxu1  ;;  %5584 = vst [vmem:[#allocation29_spill] sm:$0xff] %v4990_v44  ;;  %v4996_v18 = vpop.f32.mrb[123].mxu0  ;;  %v5587_v44 = vld [vmem:[#allocation31_spill] sm:$0xff] }
 0x226   :  { %5583 = vst [vmem:[#allocation28_spill] sm:$0xff] %v4988_v52  ;;  %v3033_v43 = vmax.f32 %v2969_v51, 0.0  ;;  %v2971_v0 = vmul.f32 %v4708_v45, %v2884_v28  ;;  %v2970_v13 = vmul.f32 %v4711_v11, %v2883_v4  ;;  %v2289_v3 = vadd.f32 %v2288_v35, %v2287_v25  ;;  %v4994_v33 = vpop.f32.mrb[122].mxu1  ;;  %5586 = vst [vmem:[#allocation101_spill] sm:$0xff] %v4996_v18  ;;  %v5588_v52 = vld [vmem:[#allocation32_spill] sm:$0xff] }
 0x227   :  { %5585 = vst [vmem:[#allocation30_spill] sm:$0xff] %v4994_v33  ;;  %v2972_v37 = vmul.f32 %v4714_v29, %v2885_v24  ;;  %v2283_v41 = vrot.slane %v2282_v1, 1  ;;  %v2297_v23 = vrot.slane %v2296_v42, 1  ;;  %v2303_v50 = vadd.f32 %v2302_v21, %v2301_v62  ;;  %v4999_v15 = vpop.f32.mrb[123].mxu1 }
 0x228   :  { %v3097_v49 = vmin.f32 %v3033_v43, 1.0  ;;  %v3035_v63 = vmax.f32 %v2971_v0, 0.0  ;;  %v3034_v46 = vmax.f32 %v2970_v13, 0.0  ;;  %v2290_v20 = vrot.slane %v2289_v3, 1 }
 0x229   :  { %v3036_v51 = vmax.f32 %v2972_v37, 0.0  ;;  %v2284_v28 = vadd.f32 %v2283_v41, %v2282_v1  ;;  %v2298_v57 = vadd.f32 %v2297_v23, %v2296_v42  ;;  %v2304_v4 = vrot.slane %v2303_v50, 1  ;;  %v5590_v1 = vld [vmem:[#allocation33_spill] sm:$0xff]  ;;  %v5591_v23 = vld [vmem:[#allocation34_spill] sm:$0xff] }
 0x22a   :  { %v3218_v25 = vrot.slane %v3097_v49, 4  ;;  %v3099_v35 = vmin.f32 %v3035_v63, 1.0  ;;  %v3098_v55 = vmin.f32 %v3034_v46, 1.0  ;;  %v2291_v33 = vadd.f32 %v2290_v20, %v2289_v3  ;;  %v5003_v21 = vpop.f32.mrb[124].mxu0  ;;  %v5593_v20 = vld [vmem:[#allocation80_spill] sm:$0xff] }
 0x22b   :  { %v3100_v18 = vmin.f32 %v3036_v51, 1.0  ;;  %v2886_v24 = vadd.f32 %v2284_v28, %v5587_v44  ;;  %v2888_v22 = vadd.f32 %v2298_v57, %v5588_v52  ;;  %v2305_v62 = vadd.f32 %v2304_v4, %v2303_v50  ;;  %5589 = vst [vmem:[#allocation31_spill] sm:$0xff] %v5003_v21  ;;  %v5027_v4 = vpop.f32.mrb[125].mxu0 }
 0x22c   :  { %v3220_v43 = vsel %vm3219_vm7, %v3218_v25, %v4919_v47  ;;  %v3250_v0 = vrot.slane %v3099_v35, 4  ;;  %v3236_v13 = vrot.slane %v3098_v55, 4  ;;  %v2887_v42 = vadd.f32 %v2291_v33, %v5590_v1  ;;  %v5016_v50 = vpop.f32.mrb[124].mxu1  ;;  %5596 = vst [vmem:[#allocation33_spill] sm:$0xff] %v5027_v4 }
 0x22d   :  { %v3264_v37 = vrot.slane %v3100_v18, 4  ;;  %v2973_v41 = vmul.f32 %v4705_v59, %v2886_v24  ;;  %v2975_v3 = vmul.f32 %v4708_v45, %v2888_v22  ;;  %v2889_v49 = vadd.f32 %v2305_v62, %v5591_v23  ;;  %5592 = vst [vmem:[#allocation32_spill] sm:$0xff] %v5016_v50  ;;  %v5029_v25 = vpop.f32.mrb[125].mxu1  ;;  %v5598_v24 = vld [vmem:[#allocation83_spill] sm:$0xff]  ;;  %v5603_v23 = vld [vmem:[#allocation85_spill] sm:$0xff] }
 0x22e   :  { %v3251_v52 = vsel %vm3219_vm7, %v3250_v0, %v4935_v16  ;;  %v3237_v44 = vsel %vm3219_vm7, %v3236_v13, %v4940_v2  ;;  %vm3222_vm8 = vcmask 1045509   ;;  %v2974_v47 = vmul.f32 %v4711_v11, %v2887_v42  ;;  %v5594_v16 = vld [vmem:[#allocation82_spill] sm:$0xff]  ;;  %v5595_v2 = vld [vmem:[#allocation81_spill] sm:$0xff]  ;;  %5597 = vst [vmem:[#allocation34_spill] sm:$0xff] %v5029_v25  ;;  %v5033_v0 = vpop.f32.mrb[126].mxu0  ;;  %v5035_v13 = vpop.f32.mrb[126].mxu1 }
 0x22f   :  { %v3265_v33 = vsel %vm3219_vm7, %v3264_v37, %v4943_v14  ;;  %v3037_v18 = vmax.f32 %v2973_v41, 0.0  ;;  %v3039_v63 = vmax.f32 %v2975_v3, 0.0  ;;  %v2976_v22 = vmul.f32 %v4714_v29, %v2889_v49  ;;  %5599 = vst [vmem:[#allocation80_spill] sm:$0xff] %v5033_v0  ;;  %5600 = vst [vmem:[#allocation82_spill] sm:$0xff] %v5035_v13  ;;  %v5601_v42 = vld [vmem:[#allocation84_spill] sm:$0xff]  ;;  %v5602_v41 = vld [vmem:[#allocation86_spill] sm:$0xff] }
 0x230   :  { %v3038_v46 = vmax.f32 %v2974_v47, 0.0  ;;  %v1814_v51 = vmul.f32 %v5593_v20, %v4549_v38  ;;  %v1816_v28 = vmul.f32 %v5594_v16, %v4596_v12  ;;  %v1815_v57 = vmul.f32 %v5595_v2, %v4617_v58  ;;  %v5043_v47 = vpop.f32.mrb[127].mxu0  ;;  %v5606_v13 = vld [vmem:[#allocation87_spill] sm:$0xff] }
 0x231   :  { %v3101_v35 = vmin.f32 %v3037_v18, 1.0  ;;  %v3103_v14 = vmin.f32 %v3039_v63, 1.0  ;;  %v3040_v55 = vmax.f32 %v2976_v22, 0.0  ;;  %v1822_v62 = vmul.f32 %v5598_v24, %v4645_v54  ;;  %5604 = vst [vmem:[#allocation81_spill] sm:$0xff] %v5043_v47  ;;  %v5045_v18 = vpop.f32.mrb[127].mxu1 }
 0x232   :  { %v3102_v1 = vmin.f32 %v3038_v46, 1.0  ;;  %v1817_v37 = vmul.f32 %v5601_v42, %v4625_v32  ;;  %v1824_v3 = vmul.f32 %v5602_v41, %v4660_v19  ;;  %v1823_v49 = vmul.f32 %v5603_v23, %v4662_v9  ;;  %5605 = vst [vmem:[#allocation83_spill] sm:$0xff] %v5045_v18 }
 0x233   :  { %v3221_v63 = vrot.slane %v3101_v35, 3  ;;  %v3252_v22 = vrot.slane %v3103_v14, 3  ;;  %v3104_v20 = vmin.f32 %v3040_v55, 1.0  ;;  %v2334_v16 = vadd.f32 %v1822_v62, %v1814_v51  ;;  %v5607_v55 = vld [vmem:[#allocation67_spill] sm:$0xff] }
 0x234   :  { %v3238_v2 = vrot.slane %v3102_v1, 3  ;;  %v2348_v24 = vadd.f32 %v1824_v3, %v1816_v28  ;;  %v2341_v46 = vadd.f32 %v1823_v49, %v1815_v57  ;;  %v1825_v42 = vmul.f32 %v5606_v13, %v4680_v36 }
 0x235   :  { %v5050_v0 = vsel %vm3222_vm8, %v3221_v63, %v3220_v43  ;;  %v5053_v41 = vsel %vm3222_vm8, %v3252_v22, %v3251_v52  ;;  %v3266_v23 = vrot.slane %v3104_v20, 3  ;;  %v2335_v47 = vrot.slane %v2334_v16, 4  ;;  %v5610_v63 = vld [vmem:[#allocation13_spill] sm:$0xff] }
 0x236   :  { %v5056_v18 = vsel %vm3222_vm8, %v3238_v2, %v3237_v44  ;;  %v2349_v35 = vrot.slane %v2348_v24, 4  ;;  %v2342_v14 = vrot.slane %v2341_v46, 4  ;;  %v2355_v51 = vadd.f32 %v1825_v42, %v1817_v37 }
 0x237   :  { %v5608_v28 = vrot.slane %v5607_v55, 1  ;;  %v5064_v62 = vsel %vm3222_vm8, %v3266_v23, %v3265_v33  ;;  %v2336_v43 = vadd.f32 %v2335_v47, %v2334_v16  ;;  %v1830_v52 = vmul.f32 %v4734_v56, %v4549_v38  ;;  %v5611_v33 = vld [vmem:[#allocation11_spill] sm:$0xff] }
 0x238   :  { %v2350_v13 = vadd.f32 %v2349_v35, %v2348_v24  ;;  %v2343_v1 = vadd.f32 %v2342_v14, %v2341_v46  ;;  %v2356_v3 = vrot.slane %v2355_v51, 4  ;;  %v1832_v44 = vmul.f32 %v4740_v5, %v4596_v12  ;;  %v5612_v56 = vld [vmem:[#allocation15_spill] sm:$0xff]  ;;  %v5613_v5 = vld [vmem:[#allocation12_spill] sm:$0xff]  ;;  %v5614_v35 = vld [vmem:[#allocation17_spill] sm:$0xff] }
 0x239   :  { %v5061_v57 = vadd.f32 %v5608_v28, %v5607_v55  ;;  %v2337_v49 = vrot.slane %v2336_v43, 2  ;;  %v1831_v37 = vmul.f32 %v4737_v7, %v4617_v58  ;;  %v1833_v22 = vmul.f32 %v5610_v63, %v4625_v32 }
 0x23a   :  { %v1838_v20 = vmul.f32 %v5611_v33, %v4645_v54  ;;  %v2351_v47 = vrot.slane %v2350_v13, 2  ;;  %v2344_v16 = vrot.slane %v2343_v1, 2  ;;  %v2357_v2 = vadd.f32 %v2356_v3, %v2355_v51 }
 0x23b   :  { %5609 = vst [vmem:[#allocation84_spill] sm:$0xff] %v5061_v57  ;;  %v1840_v24 = vmul.f32 %v5612_v56, %v4660_v19  ;;  %v2338_v46 = vadd.f32 %v2337_v49, %v2336_v43  ;;  %v1839_v23 = vmul.f32 %v5613_v5, %v4662_v9  ;;  %v1841_v7 = vmul.f32 %v5614_v35, %v4680_v36 }
 0x23c   :  { %v2390_v42 = vadd.f32 %v1838_v20, %v1830_v52  ;;  %v2352_v14 = vadd.f32 %v2351_v47, %v2350_v13  ;;  %v2345_v55 = vadd.f32 %v2344_v16, %v2343_v1  ;;  %v2358_v28 = vrot.slane %v2357_v2, 2  ;;  %v5615_v1 = vld [vmem:[#allocation35_spill] sm:$0xff] }
 0x23d   :  { %v2404_v63 = vadd.f32 %v1840_v24, %v1832_v44  ;;  %v2339_v57 = vrot.slane %v2338_v46, 1  ;;  %v2397_v25 = vadd.f32 %v1839_v23, %v1831_v37  ;;  %v2411_v4 = vadd.f32 %v1841_v7, %v1833_v22  ;;  %v5616_v37 = vld [vmem:[#allocation36_spill] sm:$0xff]  ;;  %v5617_v23 = vld [vmem:[#allocation37_spill] sm:$0xff] }
 0x23e   :  { %v2391_v33 = vrot.slane %v2390_v42, 4  ;;  %v2353_v51 = vrot.slane %v2352_v14, 1  ;;  %v2346_v3 = vrot.slane %v2345_v55, 1  ;;  %v2359_v50 = vadd.f32 %v2358_v28, %v2357_v2 }
 0x23f   :  { %v2405_v56 = vrot.slane %v2404_v63, 4  ;;  %v2340_v43 = vadd.f32 %v2339_v57, %v2338_v46  ;;  %v2398_v49 = vrot.slane %v2397_v25, 4  ;;  %v2412_v20 = vrot.slane %v2411_v4, 4 }
 0x240   :  { %v2392_v52 = vadd.f32 %v2391_v33, %v2390_v42  ;;  %vm3225_vm9 = vcmask 1046534   ;;  %v2354_v5 = vadd.f32 %v2353_v51, %v2352_v14  ;;  %v2347_v21 = vadd.f32 %v2346_v3, %v2345_v55 }
 0x241   :  { %v2360_v35 = vrot.slane %v2359_v50, 1  ;;  %v2406_v13 = vadd.f32 %v2405_v56, %v2404_v63  ;;  %v2890_v47 = vadd.f32 %v2340_v43, %v5615_v1  ;;  %v2399_v16 = vadd.f32 %v2398_v49, %v2397_v25  ;;  %v5618_v63 = vld [vmem:[#allocation38_spill] sm:$0xff] }
 0x242   :  { %v2393_v44 = vrot.slane %v2392_v52, 2  ;;  %v2413_v24 = vadd.f32 %v2412_v20, %v2411_v4  ;;  %v2892_v22 = vadd.f32 %v2354_v5, %v5616_v37  ;;  %v2891_v7 = vadd.f32 %v2347_v21, %v5617_v23 }
 0x243   :  { %v2361_v2 = vadd.f32 %v2360_v35, %v2359_v50  ;;  %v2407_v28 = vrot.slane %v2406_v13, 2  ;;  %v2977_v57 = vmul.f32 %v4705_v59, %v2890_v47  ;;  %v2400_v42 = vrot.slane %v2399_v16, 2 }
 0x244   :  { %v2394_v46 = vadd.f32 %v2393_v44, %v2392_v52  ;;  %v2414_v33 = vrot.slane %v2413_v24, 2  ;;  %v2979_v14 = vmul.f32 %v4708_v45, %v2892_v22  ;;  %v2978_v55 = vmul.f32 %v4711_v11, %v2891_v7 }
 0x245   :  { %v2893_v51 = vadd.f32 %v2361_v2, %v5618_v63  ;;  %v2408_v3 = vadd.f32 %v2407_v28, %v2406_v13  ;;  %v3041_v25 = vmax.f32 %v2977_v57, 0.0  ;;  %v2401_v56 = vadd.f32 %v2400_v42, %v2399_v16  ;;  %v5619_v13 = vld [vmem:[#allocation39_spill] sm:$0xff]  ;;  %v5620_v42 = vld [vmem:[#allocation40_spill] sm:$0xff] }
 0x246   :  { %v2395_v4 = vrot.slane %v2394_v46, 1  ;;  %v2415_v43 = vadd.f32 %v2414_v33, %v2413_v24  ;;  %v3043_v49 = vmax.f32 %v2979_v14, 0.0  ;;  %v3042_v21 = vmax.f32 %v2978_v55, 0.0  ;;  %v5621_v55 = vld [vmem:[#allocation41_spill] sm:$0xff] }
 0x247   :  { %v2980_v50 = vmul.f32 %v4714_v29, %v2893_v51  ;;  %v2409_v20 = vrot.slane %v2408_v3, 1  ;;  %v3105_v5 = vmin.f32 %v3041_v25, 1.0  ;;  %v2402_v35 = vrot.slane %v2401_v56, 1  ;;  %v5622_v51 = vld [vmem:[#allocation42_spill] sm:$0xff] }
 0x248   :  { %v2396_v52 = vadd.f32 %v2395_v4, %v2394_v46  ;;  %v2416_v1 = vrot.slane %v2415_v43, 1  ;;  %v3107_v47 = vmin.f32 %v3043_v49, 1.0  ;;  %v3106_v44 = vmin.f32 %v3042_v21, 1.0 }
 0x249   :  { %v3044_v37 = vmax.f32 %v2980_v50, 0.0  ;;  %vm3228_vm10 = vcmask 1047559   ;;  %v2410_v22 = vadd.f32 %v2409_v20, %v2408_v3  ;;  %v3224_v23 = vrot.slane %v3105_v5, 2  ;;  %v5623_v50 = vld [vmem:[#allocation14_spill] sm:$0xff] }
 0x24a   :  { %v2894_v7 = vadd.f32 %v2396_v52, %v5619_v13  ;;  %v2403_v2 = vadd.f32 %v2402_v35, %v2401_v56  ;;  %v2417_v16 = vadd.f32 %v2416_v1, %v2415_v43  ;;  %v3254_v24 = vrot.slane %v3107_v47, 2 }
 0x24b   :  { %v3240_v28 = vrot.slane %v3106_v44, 2  ;;  %v3108_v57 = vmin.f32 %v3044_v37, 1.0  ;;  %v2896_v33 = vadd.f32 %v2410_v22, %v5620_v42  ;;  %v3226_v46 = vsel %vm3225_vm9, %v3224_v23, %v5050_v0  ;;  %v5626_v22 = vld [vmem:[#allocation89_spill] sm:$0xff] }
 0x24c   :  { %v2981_v14 = vmul.f32 %v4705_v59, %v2894_v7  ;;  %v2895_v63 = vadd.f32 %v2403_v2, %v5621_v55  ;;  %v2897_v25 = vadd.f32 %v2417_v16, %v5622_v51  ;;  %v3255_v3 = vsel %vm3225_vm9, %v3254_v24, %v5053_v41  ;;  %v5624_v41 = vld [vmem:[#allocation18_spill] sm:$0xff]  ;;  %v5627_v7 = vld [vmem:[#allocation88_spill] sm:$0xff] }
 0x24d   :  { %v3241_v4 = vsel %vm3225_vm9, %v3240_v28, %v5056_v18  ;;  %v3268_v56 = vrot.slane %v3108_v57, 2  ;;  %v2983_v43 = vmul.f32 %v4708_v45, %v2896_v33  ;;  %v1846_v20 = vmul.f32 %v5623_v50, %v4549_v38  ;;  %v5625_v18 = vld [vmem:[#allocation16_spill] sm:$0xff]  ;;  %v5628_v16 = vld [vmem:[#allocation10_spill] sm:$0xff] }
 0x24e   :  { %v3045_v49 = vmax.f32 %v2981_v14, 0.0  ;;  %v2982_v21 = vmul.f32 %v4711_v11, %v2895_v63  ;;  %v2984_v0 = vmul.f32 %v4714_v29, %v2897_v25  ;;  %v1848_v35 = vmul.f32 %v5624_v41, %v4596_v12  ;;  %v5629_v24 = vld [vmem:[#allocation90_spill] sm:$0xff]  ;;  %v5630_v14 = vld [vmem:[#allocation91_spill] sm:$0xff] }
 0x24f   :  { %v3269_v5 = vsel %vm3225_vm9, %v3268_v56, %v5064_v62  ;;  %v3047_v52 = vmax.f32 %v2983_v43, 0.0  ;;  %v1847_v1 = vmul.f32 %v5625_v18, %v4617_v58  ;;  %v1849_v23 = vmul.f32 %v5626_v22, %v4625_v32  ;;  %v5632_v22 = vld [vmem:[#allocation73_spill] sm:$0xff] }
 0x250   :  { %v3109_v47 = vmin.f32 %v3045_v49, 1.0  ;;  %v3046_v44 = vmax.f32 %v2982_v21, 0.0  ;;  %v3048_v37 = vmax.f32 %v2984_v0, 0.0  ;;  %v1854_v2 = vmul.f32 %v5627_v7, %v4645_v54  ;;  %v5634_v7 = vld [vmem:[#allocation76_spill] sm:$0xff] }
 0x251   :  { %v3111_v13 = vmin.f32 %v3047_v52, 1.0  ;;  %v1856_v62 = vmul.f32 %v5628_v16, %v4660_v19  ;;  %v1855_v28 = vmul.f32 %v5629_v24, %v4662_v9  ;;  %v1857_v55 = vmul.f32 %v5630_v14, %v4680_v36  ;;  %v5635_v16 = vld [vmem:[#allocation75_spill] sm:$0xff] }
 0x252   :  { %v3227_v57 = vrot.slane %v3109_v47, 1  ;;  %v3110_v42 = vmin.f32 %v3046_v44, 1.0  ;;  %v3112_v33 = vmin.f32 %v3048_v37, 1.0  ;;  %v2446_v51 = vadd.f32 %v1854_v2, %v1846_v20 }
 0x253   :  { %v3256_v63 = vrot.slane %v3111_v13, 1  ;;  %v2460_v25 = vadd.f32 %v1856_v62, %v1848_v35  ;;  %v2453_v56 = vadd.f32 %v1855_v28, %v1847_v1  ;;  %v2467_v0 = vadd.f32 %v1857_v55, %v1849_v23  ;;  %v5631_v1 = vld [vmem:[#allocation72_spill] sm:$0xff] }
 0x254   :  { %v3229_v43 = vsel %vm3228_vm10, %v3227_v57, %v3226_v46  ;;  %v3242_v49 = vrot.slane %v3110_v42, 1  ;;  %v3270_v21 = vrot.slane %v3112_v33, 1  ;;  %v2447_v52 = vrot.slane %v2446_v51, 4  ;;  %v5636_v42 = vld [vmem:[#allocation77_spill] sm:$0xff] }
 0x255   :  { %3336 = vst [vmem:[%s5393_s3] sm:$0xff] %v3229_v43  ;;  %v3257_v50 = vsel %vm3228_vm10, %v3256_v63, %v3255_v3  ;;  %v2461_v41 = vrot.slane %v2460_v25, 4  ;;  %v2454_v18 = vrot.slane %v2453_v56, 4  ;;  %v2468_v35 = vrot.slane %v2467_v0, 4  ;;  %v5637_v63 = vld [vmem:[#allocation6_spill] sm:$0xff] }
 0x256   :  { %3338 = vst [vmem:[%s5393_s3 + $0x10] sm:$0xff] %v3257_v50  ;;  %v3243_v20 = vsel %vm3228_vm10, %v3242_v49, %v3241_v4  ;;  %v3271_v46 = vsel %vm3228_vm10, %v3270_v21, %v3269_v5  ;;  %v1862_v47 = vmul.f32 %v5631_v1, %v4549_v38  ;;  %v2448_v3 = vadd.f32 %v2447_v52, %v2446_v51  ;;  %v5633_v5 = vld [vmem:[#allocation5_spill] sm:$0xff] }
 0x257   :  { %3337 = vst [vmem:[%s5393_s3 + $0x8] sm:$0xff] %v3243_v20  ;;  %3339 = vst [vmem:[%s5393_s3 + $0x18] sm:$0xff] %v3271_v46  ;;  %v2462_v44 = vadd.f32 %v2461_v41, %v2460_v25  ;;  %v2455_v37 = vadd.f32 %v2454_v18, %v2453_v56  ;;  %v1864_v4 = vmul.f32 %v5632_v22, %v4596_v12  ;;  %v5638_v25 = vld [vmem:[#allocation78_spill] sm:$0xff] }
 0x258   :  { %v2469_v23 = vadd.f32 %v2468_v35, %v2467_v0  ;;  %v1863_v13 = vmul.f32 %v5633_v5, %v4617_v58  ;;  %v1865_v2 = vmul.f32 %v5634_v7, %v4625_v32  ;;  %v1870_v62 = vmul.f32 %v5635_v16, %v4645_v54 }
 0x259   :  { %v2449_v24 = vrot.slane %v2448_v3, 2  ;;  %v2463_v28 = vrot.slane %v2462_v44, 2  ;;  %v2456_v57 = vrot.slane %v2455_v37, 2  ;;  %v1872_v33 = vmul.f32 %v5636_v42, %v4660_v19 }
 0x25a   :  { %v2470_v14 = vrot.slane %v2469_v23, 2  ;;  %v2502_v55 = vadd.f32 %v1870_v62, %v1862_v47  ;;  %v1871_v51 = vmul.f32 %v5637_v63, %v4662_v9  ;;  %v1873_v56 = vmul.f32 %v5638_v25, %v4680_v36 }
 0x25b   :  { %v2450_v43 = vadd.f32 %v2449_v24, %v2448_v3  ;;  %v2464_v49 = vadd.f32 %v2463_v28, %v2462_v44  ;;  %v2457_v21 = vadd.f32 %v2456_v57, %v2455_v37  ;;  %v2516_v0 = vadd.f32 %v1872_v33, %v1864_v4  ;;  %v5641_v28 = vld [vmem:[#allocation45_spill] sm:$0xff] }
 0x25c   :  { %v2471_v50 = vadd.f32 %v2470_v14, %v2469_v23  ;;  %v2503_v52 = vrot.slane %v2502_v55, 4  ;;  %v2509_v41 = vadd.f32 %v1871_v51, %v1863_v13  ;;  %v2523_v18 = vadd.f32 %v1873_v56, %v1865_v2  ;;  %v5639_v23 = vld [vmem:[#allocation43_spill] sm:$0xff]  ;;  %v5640_v13 = vld [vmem:[#allocation44_spill] sm:$0xff]  ;;  %v5642_v14 = vld [vmem:[#allocation46_spill] sm:$0xff] }
 0x25d   :  { %v2451_v20 = vrot.slane %v2450_v43, 1  ;;  %v2465_v46 = vrot.slane %v2464_v49, 1  ;;  %v2458_v35 = vrot.slane %v2457_v21, 1  ;;  %v2517_v1 = vrot.slane %v2516_v0, 4 }
 0x25e   :  { %v2472_v22 = vrot.slane %v2471_v50, 1  ;;  %v2504_v47 = vadd.f32 %v2503_v52, %v2502_v55  ;;  %v2510_v5 = vrot.slane %v2509_v41, 4  ;;  %v2524_v7 = vrot.slane %v2523_v18, 4 }
 0x25f   :  { %v2452_v16 = vadd.f32 %v2451_v20, %v2450_v43  ;;  %v2466_v62 = vadd.f32 %v2465_v46, %v2464_v49  ;;  %v2459_v42 = vadd.f32 %v2458_v35, %v2457_v21  ;;  %v2518_v63 = vadd.f32 %v2517_v1, %v2516_v0 }
 0x260   :  { %v2473_v3 = vadd.f32 %v2472_v22, %v2471_v50  ;;  %v2505_v44 = vrot.slane %v2504_v47, 2  ;;  %v2511_v37 = vadd.f32 %v2510_v5, %v2509_v41  ;;  %v2525_v4 = vadd.f32 %v2524_v7, %v2523_v18 }
 0x261   :  { %v2898_v24 = vadd.f32 %v2452_v16, %v5639_v23  ;;  %v2900_v2 = vadd.f32 %v2466_v62, %v5640_v13  ;;  %v2899_v57 = vadd.f32 %v2459_v42, %v5641_v28  ;;  %v2519_v33 = vrot.slane %v2518_v63, 2  ;;  %v5643_v23 = vld [vmem:[#allocation47_spill] sm:$0xff] }
 0x262   :  { %v2901_v51 = vadd.f32 %v2473_v3, %v5642_v14  ;;  %v2506_v55 = vadd.f32 %v2505_v44, %v2504_v47  ;;  %v2512_v25 = vrot.slane %v2511_v37, 2  ;;  %v2526_v56 = vrot.slane %v2525_v4, 2 }
 0x263   :  { %v2985_v43 = vmul.f32 %v4705_v59, %v2898_v24  ;;  %v2987_v49 = vmul.f32 %v4708_v45, %v2900_v2  ;;  %v2986_v21 = vmul.f32 %v4711_v11, %v2899_v57  ;;  %v2520_v0 = vadd.f32 %v2519_v33, %v2518_v63  ;;  %v5644_v2 = vld [vmem:[#allocation48_spill] sm:$0xff] }
 0x264   :  { %v2988_v50 = vmul.f32 %v4714_v29, %v2901_v51  ;;  %v2507_v52 = vrot.slane %v2506_v55, 1  ;;  %v2513_v41 = vadd.f32 %v2512_v25, %v2511_v37  ;;  %v2527_v18 = vadd.f32 %v2526_v56, %v2525_v4  ;;  %v5645_v57 = vld [vmem:[#allocation92_spill] sm:$0xff]  ;;  %v5646_v51 = vld [vmem:[#allocation49_spill] sm:$0xff]  ;;  %v5647_v25 = vld [vmem:[#allocation50_spill] sm:$0xff] }
 0x265   :  { %v3049_v20 = vmax.f32 %v2985_v43, 0.0  ;;  %v3051_v46 = vmax.f32 %v2987_v49, 0.0  ;;  %v3050_v35 = vmax.f32 %v2986_v21, 0.0  ;;  %v2521_v1 = vrot.slane %v2520_v0, 1  ;;  %v5648_v43 = vld [vmem:[#allocation20_spill] sm:$0xff] }
 0x266   :  { %v3052_v22 = vmax.f32 %v2988_v50, 0.0  ;;  %v2508_v47 = vadd.f32 %v2507_v52, %v2506_v55  ;;  %v2514_v5 = vrot.slane %v2513_v41, 1  ;;  %v2528_v7 = vrot.slane %v2527_v18, 1  ;;  %v5650_v50 = vld [vmem:[#allocation21_spill] sm:$0xff] }
 0x267   :  { %v3113_v16 = vmin.f32 %v3049_v20, 1.0  ;;  %v3115_v62 = vmin.f32 %v3051_v46, 1.0  ;;  %v3114_v42 = vmin.f32 %v3050_v35, 1.0  ;;  %v2522_v3 = vadd.f32 %v2521_v1, %v2520_v0  ;;  %v5649_v0 = vld [vmem:[#allocation19_spill] sm:$0xff]  ;;  %v5651_v52 = vld [vmem:[#allocation93_spill] sm:$0xff]  ;;  %v5652_v35 = vld [vmem:[#allocation22_spill] sm:$0xff] }
 0x268   :  { %v3116_v44 = vmin.f32 %v3052_v22, 1.0  ;;  %v2902_v63 = vadd.f32 %v2508_v47, %v5643_v23  ;;  %v2515_v24 = vadd.f32 %v2514_v5, %v2513_v41  ;;  %v2529_v13 = vadd.f32 %v2528_v7, %v2527_v18 }
 0x269   :  { %v2904_v37 = vadd.f32 %v2522_v3, %v5644_v2  ;;  %v1878_v4 = vmul.f32 %v4840_v27, %v4549_v38  ;;  %v1880_v28 = vmul.f32 %v4845_v40, %v4596_v12  ;;  %v1879_v33 = vmul.f32 %v5645_v57, %v4617_v58 }
 0x26a   :  { %v2989_v14 = vmul.f32 %v4705_v59, %v2902_v63  ;;  %v2903_v55 = vadd.f32 %v2515_v24, %v5646_v51  ;;  %v2905_v56 = vadd.f32 %v2529_v13, %v5647_v25  ;;  %v1881_v49 = vmul.f32 %v5648_v43, %v4625_v32 }
 0x26b   :  { %v2991_v21 = vmul.f32 %v4708_v45, %v2904_v37  ;;  %v1886_v27 = vmul.f32 %v5649_v0, %v4645_v54  ;;  %v1888_v40 = vmul.f32 %v5650_v50, %v4660_v19  ;;  %v1887_v41 = vmul.f32 %v5651_v52, %v4662_v9 }
 0x26c   :  { %v3053_v18 = vmax.f32 %v2989_v14, 0.0  ;;  %v2990_v20 = vmul.f32 %v4711_v11, %v2903_v55  ;;  %v2992_v46 = vmul.f32 %v4714_v29, %v2905_v56  ;;  %v1889_v1 = vmul.f32 %v5652_v35, %v4680_v36 }
 0x26d   :  { %v3055_v22 = vmax.f32 %v2991_v21, 0.0  ;;  %v2558_v47 = vadd.f32 %v1886_v27, %v1878_v4  ;;  %v2572_v5 = vadd.f32 %v1888_v40, %v1880_v28  ;;  %v2565_v7 = vadd.f32 %v1887_v41, %v1879_v33 }
 0x26e   :  { %v3117_v3 = vmin.f32 %v3053_v18, 1.0  ;;  %v3054_v23 = vmax.f32 %v2990_v20, 0.0  ;;  %v3056_v63 = vmax.f32 %v2992_v46, 0.0  ;;  %v2579_v24 = vadd.f32 %v1889_v1, %v1881_v49 }
 0x26f   :  { %v3119_v13 = vmin.f32 %v3055_v22, 1.0  ;;  %v2559_v2 = vrot.slane %v2558_v47, 4  ;;  %v2573_v37 = vrot.slane %v2572_v5, 4  ;;  %v2566_v57 = vrot.slane %v2565_v7, 4 }
 0x270   :  { %v3272_v14 = vrot.slane %v3117_v3, 7  ;;  %v3118_v51 = vmin.f32 %v3054_v23, 1.0  ;;  %v3120_v55 = vmin.f32 %v3056_v63, 1.0  ;;  %v2580_v25 = vrot.slane %v2579_v24, 4 }
 0x271   :  { %v3300_v56 = vrot.slane %v3119_v13, 7  ;;  %v2560_v43 = vadd.f32 %v2559_v2, %v2558_v47  ;;  %v2574_v0 = vadd.f32 %v2573_v37, %v2572_v5  ;;  %v2567_v50 = vadd.f32 %v2566_v57, %v2565_v7 }
 0x272   :  { %v5187_v4 = vsel %vm3210_vm13, %v3272_v14, %v3113_v16  ;;  %v3286_v28 = vrot.slane %v3118_v51, 7  ;;  %v3314_v33 = vrot.slane %v3120_v55, 7  ;;  %v2581_v21 = vadd.f32 %v2580_v25, %v2579_v24  ;;  %v5653_v51 = vld [vmem:[#allocation51_spill] sm:$0xff]  ;;  %v5654_v25 = vld [vmem:[#allocation52_spill] sm:$0xff] }
 0x273   :  { %v5190_v49 = vsel %vm3210_vm13, %v3300_v56, %v3115_v62  ;;  %v2561_v27 = vrot.slane %v2560_v43, 2  ;;  %v2575_v40 = vrot.slane %v2574_v0, 2  ;;  %v2568_v52 = vrot.slane %v2567_v50, 2  ;;  %v5655_v56 = vld [vmem:[#allocation53_spill] sm:$0xff] }
 0x274   :  { %v5193_v41 = vsel %vm3210_vm13, %v3286_v28, %v3114_v42  ;;  %v5196_v18 = vsel %vm3210_vm13, %v3314_v33, %v3116_v44  ;;  %v2582_v20 = vrot.slane %v2581_v21, 2  ;;  %v1894_v16 = vmul.f32 %v4864_v8, %v4549_v38 }
 0x275   :  { %v2562_v46 = vadd.f32 %v2561_v27, %v2560_v43  ;;  %v2576_v35 = vadd.f32 %v2575_v40, %v2574_v0  ;;  %v2569_v1 = vadd.f32 %v2568_v52, %v2567_v50  ;;  %v1896_v62 = vmul.f32 %v4869_v31, %v4596_v12  ;;  %v5656_v50 = vld [vmem:[#allocation54_spill] sm:$0xff] }
 0x276   :  { %v2583_v22 = vadd.f32 %v2582_v20, %v2581_v21  ;;  %v1895_v47 = vmul.f32 %v4867_v39, %v4617_v58  ;;  %v1897_v42 = vmul.f32 %v4875_v10, %v4625_v32  ;;  %v1902_v44 = vmul.f32 %v4871_v60, %v4645_v54 }
 0x277   :  { %v2563_v5 = vrot.slane %v2562_v46, 1  ;;  %v2577_v7 = vrot.slane %v2576_v35, 1  ;;  %v2570_v3 = vrot.slane %v2569_v1, 1  ;;  %v1904_v8 = vmul.f32 %v4882_v6, %v4660_v19 }
 0x278   :  { %v2584_v23 = vrot.slane %v2583_v22, 1  ;;  %v2614_v63 = vadd.f32 %v1902_v44, %v1894_v16  ;;  %v1903_v31 = vmul.f32 %v4877_v53, %v4662_v9  ;;  %v1905_v39 = vmul.f32 %v4888_v34, %v4680_v36 }
 0x279   :  { %v2564_v24 = vadd.f32 %v2563_v5, %v2562_v46  ;;  %v2578_v13 = vadd.f32 %v2577_v7, %v2576_v35  ;;  %v2571_v10 = vadd.f32 %v2570_v3, %v2569_v1  ;;  %v2628_v2 = vadd.f32 %v1904_v8, %v1896_v62 }
 0x27a   :  { %v2585_v37 = vadd.f32 %v2584_v23, %v2583_v22  ;;  %v2615_v60 = vrot.slane %v2614_v63, 4  ;;  %v2621_v57 = vadd.f32 %v1903_v31, %v1895_v47  ;;  %v2635_v14 = vadd.f32 %v1905_v39, %v1897_v42 }
 0x27b   :  { %v2906_v55 = vadd.f32 %v2564_v24, %v5653_v51  ;;  %v2908_v6 = vadd.f32 %v2578_v13, %v5654_v25  ;;  %v2907_v43 = vadd.f32 %v2571_v10, %v5655_v56  ;;  %v2629_v0 = vrot.slane %v2628_v2, 4 }
 0x27c   :  { %v2909_v53 = vadd.f32 %v2585_v37, %v5656_v50  ;;  %v2616_v28 = vadd.f32 %v2615_v60, %v2614_v63  ;;  %v2622_v33 = vrot.slane %v2621_v57, 4  ;;  %v2636_v34 = vrot.slane %v2635_v14, 4  ;;  %v5657_v50 = vld [vmem:[#allocation55_spill] sm:$0xff] }
 0x27d   :  { %v2993_v21 = vmul.f32 %v4705_v59, %v2906_v55  ;;  %v2995_v27 = vmul.f32 %v4708_v45, %v2908_v6  ;;  %v2994_v40 = vmul.f32 %v4711_v11, %v2907_v43  ;;  %v2630_v52 = vadd.f32 %v2629_v0, %v2628_v2 }
 0x27e   :  { %v2996_v20 = vmul.f32 %v4714_v29, %v2909_v53  ;;  %v2617_v16 = vrot.slane %v2616_v28, 2  ;;  %v2623_v46 = vadd.f32 %v2622_v33, %v2621_v57  ;;  %v2637_v35 = vadd.f32 %v2636_v34, %v2635_v14  ;;  %v5658_v34 = vld [vmem:[#allocation56_spill] sm:$0xff] }
 0x27f   :  { %v3057_v1 = vmax.f32 %v2993_v21, 0.0  ;;  %v3059_v62 = vmax.f32 %v2995_v27, 0.0  ;;  %v3058_v22 = vmax.f32 %v2994_v40, 0.0  ;;  %v2631_v47 = vrot.slane %v2630_v52, 2  ;;  %v5659_v40 = vld [vmem:[#allocation57_spill] sm:$0xff] }
 0x280   :  { %v3060_v42 = vmax.f32 %v2996_v20, 0.0  ;;  %v2618_v44 = vadd.f32 %v2617_v16, %v2616_v28  ;;  %v2624_v5 = vrot.slane %v2623_v46, 2  ;;  %v2638_v7 = vrot.slane %v2637_v35, 2  ;;  %v5661_v16 = vld [vmem:[#allocation24_spill] sm:$0xff] }
 0x281   :  { %v3121_v3 = vmin.f32 %v3057_v1, 1.0  ;;  %v3123_v8 = vmin.f32 %v3059_v62, 1.0  ;;  %v3122_v23 = vmin.f32 %v3058_v22, 1.0  ;;  %v2632_v63 = vadd.f32 %v2631_v47, %v2630_v52  ;;  %v5662_v1 = vld [vmem:[#allocation23_spill] sm:$0xff]  ;;  %v5663_v62 = vld [vmem:[#allocation26_spill] sm:$0xff]  ;;  %v5664_v22 = vld [vmem:[#allocation25_spill] sm:$0xff] }
 0x282   :  { %v3124_v31 = vmin.f32 %v3060_v42, 1.0  ;;  %v2619_v39 = vrot.slane %v2618_v44, 1  ;;  %v2625_v24 = vadd.f32 %v2624_v5, %v2623_v46  ;;  %v2639_v13 = vadd.f32 %v2638_v7, %v2637_v35  ;;  %v5665_v5 = vld [vmem:[#allocation94_spill] sm:$0xff] }
 0x283   :  { %v3274_v10 = vrot.slane %v3121_v3, 6  ;;  %v3302_v2 = vrot.slane %v3123_v8, 6  ;;  %v3288_v37 = vrot.slane %v3122_v23, 6  ;;  %v2633_v60 = vrot.slane %v2632_v63, 1 }
 0x284   :  { %v3316_v57 = vrot.slane %v3124_v31, 6  ;;  %v2620_v14 = vadd.f32 %v2619_v39, %v2618_v44  ;;  %v2626_v51 = vrot.slane %v2625_v24, 1  ;;  %v2640_v55 = vrot.slane %v2639_v13, 1 }
 0x285   :  { %v3275_v25 = vsel %vm3213_vm0, %v3274_v10, %v5187_v4  ;;  %v3303_v6 = vsel %vm3213_vm0, %v3302_v2, %v5190_v49  ;;  %v3289_v56 = vsel %vm3213_vm0, %v3288_v37, %v5193_v41  ;;  %v2634_v43 = vadd.f32 %v2633_v60, %v2632_v63 }
 0x286   :  { %v3317_v0 = vsel %vm3213_vm0, %v3316_v57, %v5196_v18  ;;  %v2910_v53 = vadd.f32 %v2620_v14, %v5657_v50  ;;  %v2627_v28 = vadd.f32 %v2626_v51, %v2625_v24  ;;  %v2641_v33 = vadd.f32 %v2640_v55, %v2639_v13  ;;  %v5660_v18 = vld [vmem:[#allocation58_spill] sm:$0xff] }
 0x287   :  { %v2912_v21 = vadd.f32 %v2634_v43, %v5658_v34  ;;  %v1910_v27 = vmul.f32 %v4904_v61, %v4549_v38  ;;  %v1912_v4 = vmul.f32 %v4914_v48, %v4596_v12  ;;  %v1911_v49 = vmul.f32 %v4908_v26, %v4617_v58 }
 0x288   :  { %v2997_v41 = vmul.f32 %v4705_v59, %v2910_v53  ;;  %v2911_v52 = vadd.f32 %v2627_v28, %v5659_v40  ;;  %v2913_v20 = vadd.f32 %v2641_v33, %v5660_v18  ;;  %v1913_v46 = vmul.f32 %v5661_v16, %v4625_v32  ;;  %v5666_v16 = vld [vmem:[#allocation95_spill] sm:$0xff] }
 0x289   :  { %v2999_v35 = vmul.f32 %v4708_v45, %v2912_v21  ;;  %v1918_v61 = vmul.f32 %v5662_v1, %v4645_v54  ;;  %v1920_v48 = vmul.f32 %v5663_v62, %v4660_v19  ;;  %v1919_v26 = vmul.f32 %v5664_v22, %v4662_v9 }
 0x28a   :  { %v3061_v47 = vmax.f32 %v2997_v41, 0.0  ;;  %v2998_v42 = vmul.f32 %v4711_v11, %v2911_v52  ;;  %v3000_v44 = vmul.f32 %v4714_v29, %v2913_v20  ;;  %v1921_v7 = vmul.f32 %v5665_v5, %v4680_v36 }
 0x28b   :  { %v3063_v3 = vmax.f32 %v2999_v35, 0.0  ;;  %v2670_v8 = vadd.f32 %v1918_v61, %v1910_v27  ;;  %v2684_v23 = vadd.f32 %v1920_v48, %v1912_v4  ;;  %v2677_v63 = vadd.f32 %v1919_v26, %v1911_v49  ;;  %v5667_v61 = vld [vmem:[#allocation7_spill] sm:$0xff]  ;;  %v5668_v48 = vld [vmem:[#allocation96_spill] sm:$0xff] }
 0x28c   :  { %v3125_v31 = vmin.f32 %v3061_v47, 1.0  ;;  %v3062_v39 = vmax.f32 %v2998_v42, 0.0  ;;  %v3064_v24 = vmax.f32 %v3000_v44, 0.0  ;;  %v2691_v13 = vadd.f32 %v1921_v7, %v1913_v46  ;;  %v5671_v7 = vld [vmem:[#allocation99_spill] sm:$0xff] }
 0x28d   :  { %v3127_v10 = vmin.f32 %v3063_v3, 1.0  ;;  %v2671_v2 = vrot.slane %v2670_v8, 4  ;;  %v2685_v37 = vrot.slane %v2684_v23, 4  ;;  %v2678_v60 = vrot.slane %v2677_v63, 4 }
 0x28e   :  { %v3276_v57 = vrot.slane %v3125_v31, 5  ;;  %v3126_v14 = vmin.f32 %v3062_v39, 1.0  ;;  %v3128_v51 = vmin.f32 %v3064_v24, 1.0  ;;  %v2692_v55 = vrot.slane %v2691_v13, 4  ;;  %v5673_v39 = vld [vmem:[#allocation100_spill] sm:$0xff] }
 0x28f   :  { %v3304_v43 = vrot.slane %v3127_v10, 5  ;;  %v2672_v50 = vadd.f32 %v2671_v2, %v2670_v8  ;;  %v2686_v53 = vadd.f32 %v2685_v37, %v2684_v23  ;;  %v2679_v28 = vadd.f32 %v2678_v60, %v2677_v63  ;;  %v5672_v63 = vld [vmem:[#allocation98_spill] sm:$0xff] }
 0x290   :  { %v5255_v33 = vsel %vm3216_vm5, %v3276_v57, %v3275_v25  ;;  %v3290_v34 = vrot.slane %v3126_v14, 5  ;;  %v3318_v21 = vrot.slane %v3128_v51, 5  ;;  %v2693_v27 = vadd.f32 %v2692_v55, %v2691_v13  ;;  %v5674_v55 = vld [vmem:[#allocation59_spill] sm:$0xff] }
 0x291   :  { %v5258_v4 = vsel %vm3216_vm5, %v3304_v43, %v3303_v6  ;;  %v2673_v49 = vrot.slane %v2672_v50, 2  ;;  %v2687_v41 = vrot.slane %v2686_v53, 2  ;;  %v2680_v40 = vrot.slane %v2679_v28, 2 }
 0x292   :  { %v5261_v52 = vsel %vm3216_vm5, %v3290_v34, %v3289_v56  ;;  %v5264_v18 = vsel %vm3216_vm5, %v3318_v21, %v3317_v0  ;;  %v2694_v20 = vrot.slane %v2693_v27, 2  ;;  %v1926_v25 = vmul.f32 %v5666_v16, %v4549_v38  ;;  %v5669_v56 = vld [vmem:[#allocation8_spill] sm:$0xff]  ;;  %v5670_v0 = vld [vmem:[#allocation97_spill] sm:$0xff] }
 0x293   :  { %v2674_v46 = vadd.f32 %v2673_v49, %v2672_v50  ;;  %v2688_v35 = vadd.f32 %v2687_v41, %v2686_v53  ;;  %v2681_v1 = vadd.f32 %v2680_v40, %v2679_v28  ;;  %v1928_v6 = vmul.f32 %v5667_v61, %v4596_v12  ;;  %v5675_v50 = vld [vmem:[#allocation60_spill] sm:$0xff]  ;;  %v5676_v28 = vld [vmem:[#allocation61_spill] sm:$0xff] }
 0x294   :  { %v2695_v62 = vadd.f32 %v2694_v20, %v2693_v27  ;;  %v1927_v22 = vmul.f32 %v5668_v48, %v4617_v58  ;;  %v1929_v26 = vmul.f32 %v5669_v56, %v4625_v32  ;;  %v1934_v47 = vmul.f32 %v5670_v0, %v4645_v54  ;;  %v5677_v27 = vld [vmem:[#allocation62_spill] sm:$0xff] }
 0x295   :  { %v2675_v42 = vrot.slane %v2674_v46, 1  ;;  %v2689_v44 = vrot.slane %v2688_v35, 1  ;;  %v2682_v5 = vrot.slane %v2681_v1, 1  ;;  %v1936_v3 = vmul.f32 %v5671_v7, %v4660_v19 }
 0x296   :  { %v2696_v8 = vrot.slane %v2695_v62, 1  ;;  %v2726_v23 = vadd.f32 %v1934_v47, %v1926_v25  ;;  %v1935_v31 = vmul.f32 %v5672_v63, %v4662_v9  ;;  %v1937_v24 = vmul.f32 %v5673_v39, %v4680_v36 }
 0x297   :  { %v2676_v13 = vadd.f32 %v2675_v42, %v2674_v46  ;;  %v2690_v10 = vadd.f32 %v2689_v44, %v2688_v35  ;;  %v2683_v2 = vadd.f32 %v2682_v5, %v2681_v1  ;;  %v2740_v37 = vadd.f32 %v1936_v3, %v1928_v6 }
 0x298   :  { %v2697_v60 = vadd.f32 %v2696_v8, %v2695_v62  ;;  %v2727_v57 = vrot.slane %v2726_v23, 4  ;;  %v2733_v14 = vadd.f32 %v1935_v31, %v1927_v22  ;;  %v2747_v51 = vadd.f32 %v1937_v24, %v1929_v26 }
 0x299   :  { %v2914_v43 = vadd.f32 %v2676_v13, %v5674_v55  ;;  %v2916_v53 = vadd.f32 %v2690_v10, %v5675_v50  ;;  %v2915_v34 = vadd.f32 %v2683_v2, %v5676_v28  ;;  %v2741_v21 = vrot.slane %v2740_v37, 4  ;;  %v5678_v28 = vld [vmem:[#allocation63_spill] sm:$0xff] }
 0x29a   :  { %v2917_v49 = vadd.f32 %v2697_v60, %v5677_v27  ;;  %v2728_v41 = vadd.f32 %v2727_v57, %v2726_v23  ;;  %v2734_v40 = vrot.slane %v2733_v14, 4  ;;  %v2748_v20 = vrot.slane %v2747_v51, 4 }
 0x29b   :  { %v3001_v16 = vmul.f32 %v4705_v59, %v2914_v43  ;;  %v3003_v25 = vmul.f32 %v4708_v45, %v2916_v53  ;;  %v3002_v46 = vmul.f32 %v4711_v11, %v2915_v34  ;;  %v2742_v35 = vadd.f32 %v2741_v21, %v2740_v37 }
 0x29c   :  { %v3004_v1 = vmul.f32 %v4714_v29, %v2917_v49  ;;  %v2729_v61 = vrot.slane %v2728_v41, 2  ;;  %v2735_v6 = vadd.f32 %v2734_v40, %v2733_v14  ;;  %v2749_v62 = vadd.f32 %v2748_v20, %v2747_v51  ;;  %v5679_v49 = vld [vmem:[#allocation64_spill] sm:$0xff] }
 0x29d   :  { %v3065_v48 = vmax.f32 %v3001_v16, 0.0  ;;  %v3067_v22 = vmax.f32 %v3003_v25, 0.0  ;;  %v3066_v56 = vmax.f32 %v3002_v46, 0.0  ;;  %v2743_v26 = vrot.slane %v2742_v35, 2  ;;  %v5681_v16 = vld [vmem:[#allocation65_spill] sm:$0xff] }
 0x29e   :  { %v3068_v0 = vmax.f32 %v3004_v1, 0.0  ;;  %v2730_v47 = vadd.f32 %v2729_v61, %v2728_v41  ;;  %v2736_v42 = vrot.slane %v2735_v6, 2  ;;  %v2750_v44 = vrot.slane %v2749_v62, 2 }
 0x29f   :  { %v3129_v5 = vmin.f32 %v3065_v48, 1.0  ;;  %v3131_v7 = vmin.f32 %v3067_v22, 1.0  ;;  %v3130_v3 = vmin.f32 %v3066_v56, 1.0  ;;  %v2744_v8 = vadd.f32 %v2743_v26, %v2742_v35  ;;  %v5683_v35 = vld [vmem:[#allocation28_spill] sm:$0xff]  ;;  %v5686_v48 = vld [vmem:[#allocation101_spill] sm:$0xff] }
 0x2a0   :  { %v3132_v23 = vmin.f32 %v3068_v0, 1.0  ;;  %v2731_v63 = vrot.slane %v2730_v47, 1  ;;  %v2737_v31 = vadd.f32 %v2736_v42, %v2735_v6  ;;  %v2751_v39 = vadd.f32 %v2750_v44, %v2749_v62  ;;  %v5684_v6 = vld [vmem:[#allocation29_spill] sm:$0xff]  ;;  %v5685_v62 = vld [vmem:[#allocation30_spill] sm:$0xff] }
 0x2a1   :  { %v3278_v24 = vrot.slane %v3129_v5, 4  ;;  %v3306_v13 = vrot.slane %v3131_v7, 4  ;;  %v3292_v10 = vrot.slane %v3130_v3, 4  ;;  %v2745_v2 = vrot.slane %v2744_v8, 1 }
 0x2a2   :  { %v3320_v37 = vrot.slane %v3132_v23, 4  ;;  %v2732_v60 = vadd.f32 %v2731_v63, %v2730_v47  ;;  %v2738_v57 = vrot.slane %v2737_v31, 1  ;;  %v2752_v14 = vrot.slane %v2751_v39, 1 }
 0x2a3   :  { %v3279_v51 = vsel %vm3219_vm7, %v3278_v24, %v5255_v33  ;;  %v3307_v55 = vsel %vm3219_vm7, %v3306_v13, %v5258_v4  ;;  %v3293_v43 = vsel %vm3219_vm7, %v3292_v10, %v5261_v52  ;;  %v2746_v50 = vadd.f32 %v2745_v2, %v2744_v8  ;;  %v5680_v4 = vld [vmem:[#allocation27_spill] sm:$0xff] }
 0x2a4   :  { %v3321_v53 = vsel %vm3219_vm7, %v3320_v37, %v5264_v18  ;;  %v2918_v34 = vadd.f32 %v2732_v60, %v5678_v28  ;;  %v2739_v21 = vadd.f32 %v2738_v57, %v2737_v31  ;;  %v2753_v27 = vadd.f32 %v2752_v14, %v2751_v39  ;;  %v5682_v18 = vld [vmem:[#allocation66_spill] sm:$0xff] }
 0x2a5   :  { %v2920_v41 = vadd.f32 %v2746_v50, %v5679_v49  ;;  %v1942_v40 = vmul.f32 %v4978_v17, %v4549_v38  ;;  %v1944_v33 = vmul.f32 %v4983_v30, %v4596_v12  ;;  %v1943_v20 = vmul.f32 %v5680_v4, %v4617_v58 }
 0x2a6   :  { %v3005_v52 = vmul.f32 %v4705_v59, %v2918_v34  ;;  %v2919_v25 = vadd.f32 %v2739_v21, %v5681_v16  ;;  %v2921_v46 = vadd.f32 %v2753_v27, %v5682_v18  ;;  %v1945_v1 = vmul.f32 %v5683_v35, %v4625_v32  ;;  %v5687_v16 = vld [vmem:[#allocation31_spill] sm:$0xff]  ;;  %v5688_v35 = vld [vmem:[#allocation32_spill] sm:$0xff] }
 0x2a7   :  { %v3007_v61 = vmul.f32 %v4708_v45, %v2920_v41  ;;  %v1950_v17 = vmul.f32 %v5684_v6, %v4645_v54  ;;  %v1952_v30 = vmul.f32 %v5685_v62, %v4660_v19  ;;  %v1951_v22 = vmul.f32 %v5686_v48, %v4662_v9 }
 0x2a8   :  { %v3069_v56 = vmax.f32 %v3005_v52, 0.0  ;;  %v3006_v26 = vmul.f32 %v4711_v11, %v2919_v25  ;;  %v3008_v0 = vmul.f32 %v4714_v29, %v2921_v46  ;;  %v1953_v47 = vmul.f32 %v4999_v15, %v4680_v36 }
 0x2a9   :  { %v3071_v42 = vmax.f32 %v3007_v61, 0.0  ;;  %v2782_v44 = vadd.f32 %v1950_v17, %v1942_v40  ;;  %v2796_v5 = vadd.f32 %v1952_v30, %v1944_v33  ;;  %v2789_v7 = vadd.f32 %v1951_v22, %v1943_v20  ;;  %v5689_v61 = vld [vmem:[#allocation33_spill] sm:$0xff] }
 0x2aa   :  { %v3133_v3 = vmin.f32 %v3069_v56, 1.0  ;;  %v3070_v8 = vmax.f32 %v3006_v26, 0.0  ;;  %v3072_v23 = vmax.f32 %v3008_v0, 0.0  ;;  %v2803_v63 = vadd.f32 %v1953_v47, %v1945_v1 }
 0x2ab   :  { %v3135_v31 = vmin.f32 %v3071_v42, 1.0  ;;  %v2783_v39 = vrot.slane %v2782_v44, 4  ;;  %v2797_v24 = vrot.slane %v2796_v5, 4  ;;  %v2790_v13 = vrot.slane %v2789_v7, 4  ;;  %v5694_v42 = vld [vmem:[#allocation83_spill] sm:$0xff] }
 0x2ac   :  { %v3280_v10 = vrot.slane %v3133_v3, 3  ;;  %v3134_v2 = vmin.f32 %v3070_v8, 1.0  ;;  %v3136_v37 = vmin.f32 %v3072_v23, 1.0  ;;  %v2804_v60 = vrot.slane %v2803_v63, 4 }
 0x2ad   :  { %v3308_v57 = vrot.slane %v3135_v31, 3  ;;  %v2784_v14 = vadd.f32 %v2783_v39, %v2782_v44  ;;  %v2798_v50 = vadd.f32 %v2797_v24, %v2796_v5  ;;  %v2791_v15 = vadd.f32 %v2790_v13, %v2789_v7  ;;  %v5696_v39 = vld [vmem:[#allocation69_spill] sm:$0xff]  ;;  %v5697_v24 = vld [vmem:[#allocation70_spill] sm:$0xff] }
 0x2ae   :  { %v5323_v28 = vsel %vm3222_vm8, %v3280_v10, %v3279_v51  ;;  %v3294_v34 = vrot.slane %v3134_v2, 3  ;;  %v3322_v21 = vrot.slane %v3136_v37, 3  ;;  %v2805_v27 = vadd.f32 %v2804_v60, %v2803_v63  ;;  %v5695_v63 = vld [vmem:[#allocation68_spill] sm:$0xff]  ;;  %v5698_v2 = vld [vmem:[#allocation71_spill] sm:$0xff] }
 0x2af   :  { %v5326_v49 = vsel %vm3222_vm8, %v3308_v57, %v3307_v55  ;;  %v2785_v41 = vrot.slane %v2784_v14, 2  ;;  %v2799_v40 = vrot.slane %v2798_v50, 2  ;;  %v2792_v33 = vrot.slane %v2791_v15, 2 }
 0x2b0   :  { %v5329_v4 = vsel %vm3222_vm8, %v3294_v34, %v3293_v43  ;;  %v5332_v20 = vsel %vm3222_vm8, %v3322_v21, %v3321_v53  ;;  %v2806_v52 = vrot.slane %v2805_v27, 2  ;;  %v1958_v51 = vmul.f32 %v5687_v16, %v4549_v38  ;;  %v5690_v43 = vld [vmem:[#allocation34_spill] sm:$0xff]  ;;  %v5691_v53 = vld [vmem:[#allocation80_spill] sm:$0xff] }
 0x2b1   :  { %v2786_v25 = vadd.f32 %v2785_v41, %v2784_v14  ;;  %v2800_v18 = vadd.f32 %v2799_v40, %v2798_v50  ;;  %v2793_v46 = vadd.f32 %v2792_v33, %v2791_v15  ;;  %v1960_v55 = vmul.f32 %v5688_v35, %v4596_v12  ;;  %v5692_v38 = vld [vmem:[#allocation82_spill] sm:$0xff]  ;;  %v5693_v12 = vld [vmem:[#allocation81_spill] sm:$0xff] }
 0x2b2   :  { %v2807_v1 = vadd.f32 %v2806_v52, %v2805_v27  ;;  %v1959_v6 = vmul.f32 %v5689_v61, %v4617_v58  ;;  %v1961_v17 = vmul.f32 %v5690_v43, %v4625_v32  ;;  %v1966_v62 = vmul.f32 %v5691_v53, %v4645_v54 }
 0x2b3   :  { %v2787_v30 = vrot.slane %v2786_v25, 1  ;;  %v2801_v48 = vrot.slane %v2800_v18, 1  ;;  %v2794_v22 = vrot.slane %v2793_v46, 1  ;;  %v1968_v56 = vmul.f32 %v5692_v38, %v4660_v19 }
 0x2b4   :  { %v2808_v26 = vrot.slane %v2807_v1, 1  ;;  %v2838_v0 = vadd.f32 %v1966_v62, %v1958_v51  ;;  %v1967_v47 = vmul.f32 %v5693_v12, %v4662_v9  ;;  %v1969_v58 = vmul.f32 %v5694_v42, %v4680_v36 }
 0x2b5   :  { %v2788_v44 = vadd.f32 %v2787_v30, %v2786_v25  ;;  %v2802_v5 = vadd.f32 %v2801_v48, %v2800_v18  ;;  %v2795_v32 = vadd.f32 %v2794_v22, %v2793_v46  ;;  %v2852_v7 = vadd.f32 %v1968_v56, %v1960_v55 }
 0x2b6   :  { %v2809_v3 = vadd.f32 %v2808_v26, %v2807_v1  ;;  %v2839_v54 = vrot.slane %v2838_v0, 4  ;;  %v2845_v8 = vadd.f32 %v1967_v47, %v1959_v6  ;;  %v2859_v23 = vadd.f32 %v1969_v58, %v1961_v17 }
 0x2b7   :  { %v2922_v31 = vadd.f32 %v2788_v44, %v5695_v63  ;;  %v2924_v19 = vadd.f32 %v2802_v5, %v5696_v39  ;;  %v2923_v13 = vadd.f32 %v2795_v32, %v5697_v24  ;;  %v2853_v10 = vrot.slane %v2852_v7, 4  ;;  %v5699_v5 = vld [vmem:[#allocation74_spill] sm:$0xff]  ;;  %v5701_v63 = vld [vmem:[#allocation9_spill] sm:$0xff] }
 0x2b8   :  { %v2925_v9 = vadd.f32 %v2809_v3, %v5698_v2  ;;  %v2840_v37 = vadd.f32 %v2839_v54, %v2838_v0  ;;  %v2846_v60 = vrot.slane %v2845_v8, 4  ;;  %v2860_v36 = vrot.slane %v2859_v23, 4  ;;  %v5700_v54 = vld [vmem:[#allocation79_spill] sm:$0xff] }
 0x2b9   :  { %v3009_v57 = vmul.f32 %v4705_v59, %v2922_v31  ;;  %v3011_v14 = vmul.f32 %v4708_v45, %v2924_v19  ;;  %v3010_v50 = vmul.f32 %v4711_v11, %v2923_v13  ;;  %v2854_v15 = vadd.f32 %v2853_v10, %v2852_v7  ;;  %v5702_v31 = vld [vmem:[#allocation84_spill] sm:$0xff] }
 0x2ba   :  { %v3012_v34 = vmul.f32 %v4714_v29, %v2925_v9  ;;  %v2841_v21 = vrot.slane %v2840_v37, 2  ;;  %v2847_v27 = vadd.f32 %v2846_v60, %v2845_v8  ;;  %v2861_v41 = vadd.f32 %v2860_v36, %v2859_v23 }
 0x2bb   :  { %v3073_v40 = vmax.f32 %v3009_v57, 0.0  ;;  %v3075_v33 = vmax.f32 %v3011_v14, 0.0  ;;  %v3074_v52 = vmax.f32 %v3010_v50, 0.0  ;;  %v2855_v16 = vrot.slane %v2854_v15, 2 }
 0x2bc   :  { %v3076_v51 = vmax.f32 %v3012_v34, 0.0  ;;  %v2842_v25 = vadd.f32 %v2841_v21, %v2840_v37  ;;  %v2848_v18 = vrot.slane %v2847_v27, 2  ;;  %v2862_v46 = vrot.slane %v2861_v41, 2 }
 0x2bd   :  { %v3137_v35 = vmin.f32 %v3073_v40, 1.0  ;;  %v3139_v55 = vmin.f32 %v3075_v33, 1.0  ;;  %v3138_v1 = vmin.f32 %v3074_v52, 1.0  ;;  %v2856_v61 = vadd.f32 %v2855_v16, %v2854_v15 }
 0x2be   :  { %v3140_v6 = vmin.f32 %v3076_v51, 1.0  ;;  %v2843_v43 = vrot.slane %v2842_v25, 1  ;;  %v2849_v17 = vadd.f32 %v2848_v18, %v2847_v27  ;;  %v2863_v53 = vadd.f32 %v2862_v46, %v2861_v41 }
 0x2bf   :  { %v3282_v62 = vrot.slane %v3137_v35, 2  ;;  %v3310_v30 = vrot.slane %v3139_v55, 2  ;;  %v3296_v48 = vrot.slane %v3138_v1, 2  ;;  %v2857_v22 = vrot.slane %v2856_v61, 1 }
 0x2c0   :  { %v3324_v38 = vrot.slane %v3140_v6, 2  ;;  %v2844_v56 = vadd.f32 %v2843_v43, %v2842_v25  ;;  %v2850_v26 = vrot.slane %v2849_v17, 1  ;;  %v2864_v0 = vrot.slane %v2863_v53, 1 }
 0x2c1   :  { %v3283_v12 = vsel %vm3225_vm9, %v3282_v62, %v5323_v28  ;;  %v3311_v47 = vsel %vm3225_vm9, %v3310_v30, %v5326_v49  ;;  %v3297_v42 = vsel %vm3225_vm9, %v3296_v48, %v5329_v4  ;;  %v2858_v58 = vadd.f32 %v2857_v22, %v2856_v61 }
 0x2c2   :  { %v3325_v44 = vsel %vm3225_vm9, %v3324_v38, %v5332_v20  ;;  %v2926_v32 = vadd.f32 %v2844_v56, %v5699_v5  ;;  %v2851_v7 = vadd.f32 %v2850_v26, %v2849_v17  ;;  %v2865_v3 = vadd.f32 %v2864_v0, %v2863_v53 }
 0x2c3   :  { %v2928_v8 = vadd.f32 %v2858_v58, %v5700_v54 }
 0x2c4   :  { %v3013_v23 = vmul.f32 %v4705_v59, %v2926_v32  ;;  %v2927_v28 = vadd.f32 %v2851_v7, %v5701_v63  ;;  %v2929_v39 = vadd.f32 %v2865_v3, %v5702_v31 }
 0x2c5   :  { %v3015_v49 = vmul.f32 %v4708_v45, %v2928_v8 }
 0x2c6   :  { %v3077_v19 = vmax.f32 %v3013_v23, 0.0  ;;  %v3014_v4 = vmul.f32 %v4711_v11, %v2927_v28  ;;  %v3016_v24 = vmul.f32 %v4714_v29, %v2929_v39 }
 0x2c7   :  { %v3079_v20 = vmax.f32 %v3015_v49, 0.0 }
 0x2c8   :  { %v3141_v13 = vmin.f32 %v3077_v19, 1.0  ;;  %v3078_v10 = vmax.f32 %v3014_v4, 0.0  ;;  %v3080_v2 = vmax.f32 %v3016_v24, 0.0 }
 0x2c9   :  { %v3143_v9 = vmin.f32 %v3079_v20, 1.0 }
 0x2ca   :  { %v3284_v37 = vrot.slane %v3141_v13, 1  ;;  %v3142_v60 = vmin.f32 %v3078_v10, 1.0  ;;  %v3144_v36 = vmin.f32 %v3080_v2, 1.0 }
 0x2cb   :  { %v3312_v59 = vrot.slane %v3143_v9, 1 }
 0x2cc   :  { %v3285_v57 = vsel %vm3228_vm10, %v3284_v37, %v3283_v12  ;;  %v3298_v14 = vrot.slane %v3142_v60, 1  ;;  %v3326_v50 = vrot.slane %v3144_v36, 1 }
 0x2cd   :  { %3340 = vst [vmem:[%s5393_s3 + $0x20] sm:$0xff] %v3285_v57  ;;  %v3313_v45 = vsel %vm3228_vm10, %v3312_v59, %v3311_v47 }
 0x2ce   :  { %3342 = vst [vmem:[%s5393_s3 + $0x30] sm:$0xff] %v3313_v45  ;;  %v3299_v11 = vsel %vm3228_vm10, %v3298_v14, %v3297_v42  ;;  %v3327_v29 = vsel %vm3228_vm10, %v3326_v50, %v3325_v44 }
 0x2cf   :  { %3341 = vst [vmem:[%s5393_s3 + $0x28] sm:$0xff] %v3299_v11  ;;  %3343 = vst [vmem:[%s5393_s3 + $0x38] sm:$0xff] %v3327_v29 }
 0x2d0   :  { %3348 = vsyncpa [#allocation3], 1 }

</bundles_post_ra>
